<compile_context>
chip_gen: v5e
topology: v5e:2x2
jax: 0.10.0
libtpu: 0.0.40
codegen_flags: <defaults>
</compile_context>

<pallas_src>
import functools
import math

import jax
import jax.numpy as jnp
from jax import lax
from jax.experimental import pallas as pl
from jax.experimental.pallas import tpu as pltpu

D = 128          # feature_size
NUM_LAYERS = 4   # num_gnn_layers
HIDDEN = 32      # edge-regressor hidden width


# ----------------------------------------------------------------------------
# Fused kernel: all 4 GNN layers + per-layer edge regression in one call
# ----------------------------------------------------------------------------
def _fused_affattn_kernel(emb_ref, wf_ref, b1_ref, w2b2_ref, aff_out_ref, *, N, M):
    """emb_ref:  (P, D)        bf16 node embeddings (detections then tracks)
       wf_ref:   (L, D, 2D+H)  bf16 per-layer fused weight [W3^T | W4^T | W1]
       b1_ref:   (H, 1)        f32  edge-regressor layer-1 bias (column form)
       w2b2_ref: (H+1,) SMEM   f32  [w2[0..H-1], b2]
       aff_out:  (N, M)        f32  final predicted affinity matrix"""
    f32 = jnp.float32
    bf16 = jnp.bfloat16

    # --- hoisted small constants / params (built once, reused by every layer) ---
    b1c = b1_ref[...]                                              # (H, 1)
    rows = lax.broadcasted_iota(jnp.int32, (M, M), 0)
    cols = lax.broadcasted_iota(jnp.int32, (M, M), 1)
    eye_m = (rows == cols).astype(f32)                             # (M, M) identity
    ones_col = jnp.ones((N, 1), bf16)                              # deg_t ones lane
    b2 = w2b2_ref[HIDDEN]                                          # scalar (SMEM)

    def regress(p1):
        """p1 = h @ W1 (P, H) f32 -> sigmoid edge-regressor output (N, M) f32.
        Decomposed as relu(t1[j] - a1[i]); no (N*M, D) or (N, M, H) intermediates."""
        a1 = p1[:N, :]                                             # (N, H)
        p1t = p1[N:, :]                                            # (M, H)
        # (M, H) -> (H, M) transpose via the MXU (identity matmul): keeps the
        # track-side pre-activations lane-oriented for the (N, M) VPU passes.
        t1t = lax.dot_general(p1t, eye_m, (((0,), (0,)), ((), ())),
                              preferred_element_type=f32) + b1c    # (H, M)
        logits = jnp.full((N, M), b2, f32)
        for hh in range(HIDDEN):                                   # unrolled, lane-dense
            diff = t1t[hh:hh + 1, :] - a1[:, hh:hh + 1]            # (1,M)-(N,1)->(N,M)
            logits = logits + w2b2_ref[hh] * jnp.maximum(diff, 0.0)
        return jax.nn.sigmoid(logits)

    h_bf = emb_ref[...]                                            # (P, D) bf16
    for layer in range(NUM_LAYERS):                                # fully unrolled
        wf = wf_ref[layer]                                         # (D, 2D+H) bf16
        # One bf16 MXU matmul per layer: z3 | z4 | regressor pre-activations.
        zp = jnp.dot(h_bf, wf, preferred_element_type=f32)         # (P, 2D+H) f32
        z3 = zp[:, :D]
        z4 = zp[:, D:2 * D]

        if layer == 0:
            # aff == ones: aggregation reduces to column sums, degrees are constants
            # (self-loop terms of A = bipartite + I cancel algebraically).
            s_t = jnp.sum(z3[N:, :], axis=0, keepdims=True)        # (1, D)
            s_d = jnp.sum(z3[:N, :], axis=0, keepdims=True)        # (1, D)
            hd = z4[:N, :] + s_t - float(M) * z3[:N, :]
            ht = z4[N:, :] + s_d - float(N) * z3[N:, :]
        else:
            # The W1 slice of the SAME matmul is h_post_{layer-1} @ W1: regress the
            # previous layer's affinity here (no extra narrow matmul).
            aff = regress(zp[:, 2 * D:])
            aff_bf = aff.astype(bf16)
            z3d_bf = z3[:N, :].astype(bf16)
            z3t_bf = z3[N:, :].astype(bf16)

            deg_d = jnp.sum(aff, axis=1, keepdims=True)            # (N, 1) lane reduce
            agg_d = jnp.dot(aff_bf, z3t_bf,
                            preferred_element_type=f32)            # (N, D)
            # Fold deg_t into the transposed aggregation matmul (ones lane on z3d).
            z3d_aug = jnp.concatenate([z3d_bf, ones_col], axis=1)  # (N, D+1)
            aggdeg_t = lax.dot_general(aff_bf, z3d_aug, (((0,), (0,)), ((), ())),
                                       preferred_element_type=f32)  # (M, D+1)
            agg_t = aggdeg_t[:, :D]
            deg_t = aggdeg_t[:, D:]

            hd = z4[:N, :] + agg_d - deg_d * z3[:N, :]
            ht = z4[N:, :] + agg_t - deg_t * z3[N:, :]

        h = jnp.concatenate([hd, ht], axis=0)                      # (P, D) f32
        h_bf = h.astype(bf16)

    # Final regression on the last layer's updated h (W1 columns reused from the
    # resident fused weight slab — no separate W1 input).
    w1_bf = wf_ref[NUM_LAYERS - 1][:, 2 * D:]                      # (D, H) bf16
    p1 = jnp.dot(h_bf, w1_bf, preferred_element_type=f32)          # (P, H)
    aff_out_ref[...] = regress(p1)


def affinity_attention_op(embeddings, N, M, w3s, w4s, w1, b1, w2, b2):
    """Eval-mode forward of AffinityAttentionOp: returns pred_aff_mat (N, M)."""
    P, Dd = embeddings.shape
    assert P == N + M and Dd == D
    assert N % 8 == 0  # keep f32 row slices on sublane-tile boundaries

    # Per-layer fused weight [W3^T | W4^T | W1] -> (L, D, 2D+H), pre-cast to bf16
    # (MXU operands); one matmul per layer yields z3, z4 and regressor pre-acts.
    w34t = jnp.concatenate(
        [jnp.transpose(w3s, (0, 2, 1)), jnp.transpose(w4s, (0, 2, 1))], axis=-1)
    wfused = jnp.concatenate(
        [w34t, jnp.broadcast_to(w1[None].astype(w34t.dtype),
                                (NUM_LAYERS, D, HIDDEN))],
        axis=-1).astype(jnp.bfloat16)
    b1c = jnp.reshape(b1, (HIDDEN, 1)).astype(jnp.float32)          # column form
    w2b2 = jnp.concatenate(
        [jnp.reshape(w2, (HIDDEN,)), jnp.reshape(b2, (1,))]).astype(jnp.float32)
    emb_bf = embeddings.astype(jnp.bfloat16)

    kernel = functools.partial(_fused_affattn_kernel, N=N, M=M)
    return pl.pallas_call(
        kernel,
        out_shape=jax.ShapeDtypeStruct((N, M), jnp.float32),
        grid=(1,),
        in_specs=[
            pl.BlockSpec((P, D), lambda i: (0, 0)),                              # emb (bf16)
            pl.BlockSpec((NUM_LAYERS, D, 2 * D + HIDDEN), lambda i: (0, 0, 0)),  # fused W
            pl.BlockSpec((HIDDEN, 1), lambda i: (0, 0)),                         # b1 column
            pl.BlockSpec(memory_space=pltpu.MemorySpace.SMEM),                   # [w2 | b2]
        ],
        out_specs=pl.BlockSpec((N, M), lambda i: (0, 0)),
        compiler_params=pltpu.CompilerParams(
            dimension_semantics=("arbitrary",),
            vmem_limit_bytes=32 * 1024 * 1024,
        ),
    )(emb_bf, wfused, b1c, w2b2)


# ----------------------------------------------------------------------------
# Pure-JAX f32 reference (faithful to the PyTorch spec: builds the full (P,P) A
# and the (N*M, D) pairwise-difference tensor)
# ----------------------------------------------------------------------------
def _ref_forward(embeddings, N, M, w3s, w4s, w1, b1, w2, b2):
    hi = jax.lax.Precision.HIGHEST
    P = N + M
    h = embeddings
    pred_aff = jnp.ones((N, M), jnp.float32)
    for layer in range(NUM_LAYERS):
        A = jnp.zeros((P, P), jnp.float32)
        A = A.at[:N, N:].set(pred_aff)
        A = A.at[N:, :N].set(pred_aff.T)
        A = A + jnp.eye(P, dtype=jnp.float32)
        z3 = jnp.dot(h, w3s[layer].T, precision=hi)
        z4 = jnp.dot(h, w4s[layer].T, precision=hi)
        deg = jnp.sum(A, axis=0)
        h = z4 + jnp.dot(A.T, z3, precision=hi) - deg[:, None] * z3
        diff = (h[N:N + M][None, :, :] - h[:N][:, None, :]).reshape(N * M, D)
        h1 = jnp.maximum(jnp.dot(diff, w1, precision=hi) + b1, 0.0)
        pred_aff = jax.nn.sigmoid(jnp.dot(h1, w2, precision=hi) + b2).reshape(N, M)
    return pred_aff


# ----------------------------------------------------------------------------
if __name__ == "__main__":
    key = jax.random.PRNGKey(0)
    N, M = 8, 8
    P = N + M

    k_h, k_w3, k_w4, k_r1, k_rb1, k_r2 = jax.random.split(key, 6)
    embeddings = jax.random.normal(k_h, (P, D), jnp.float32)

    # xavier_normal_(gain=sqrt(2)) std for (out, in)=(D, D) weights, damped by 0.2 so
    # the 4-layer forward stays numerically well-conditioned (non-saturated sigmoids)
    # for the bf16-MXU vs f32-reference comparison.
    w_std = 0.2 * math.sqrt(2.0) * math.sqrt(2.0 / (D + D))
    w3s = jax.random.normal(k_w3, (NUM_LAYERS, D, D), jnp.float32) * w_std
    w4s = jax.random.normal(k_w4, (NUM_LAYERS, D, D), jnp.float32) * w_std

    # deterministic synthetic edge-regressor parameters (config not in the snippet)
    w1 = jax.random.normal(k_r1, (D, HIDDEN), jnp.float32) * 0.1
    b1 = jax.random.normal(k_rb1, (1, HIDDEN), jnp.float32) * 0.05
    w2 = jax.random.normal(k_r2, (HIDDEN, 1), jnp.float32) * 0.015
    b2 = jnp.full((1, 1), 0.1, jnp.float32)

    fwd = jax.jit(affinity_attention_op, static_argnums=(1, 2))
    pred_aff = jax.block_until_ready(fwd(embeddings, N, M, w3s, w4s, w1, b1, w2, b2))

    ref = _ref_forward(embeddings, N, M, w3s, w4s, w1, b1, w2, b2)
    max_err = float(jnp.max(jnp.abs(pred_aff - ref)))
    assert pred_aff.shape == (N, M)
    # 2e-2 bound accounts for bf16 MXU operands through 4 layers; observed error is
    # expected to be well below 1e-2 for this conditioned test.
    assert max_err < 2e-2, f"mismatch vs f32 reference: {max_err}"

    print("KERNEL_OK")
</pallas_src>

<mosaic_0001>
module attributes {stable_mosaic.version = 11 : i64} {
  func.func @_fused_affattn_kernel(%arg0: i32, %arg1: memref<16x128xbf16, #tpu.memory_space<vmem>>, %arg2: memref<4x128x288xbf16, #tpu.memory_space<vmem>>, %arg3: memref<32x1xf32, #tpu.memory_space<vmem>>, %arg4: memref<33xf32, #tpu.memory_space<smem>>, %arg5: memref<8x8xf32, #tpu.memory_space<vmem>>) attributes {dimension_semantics = [#tpu.dimension_semantics<arbitrary>], iteration_bounds = array<i64: 1>, scalar_prefetch = 0 : i64, scratch_operands = 0 : i64, tpu.core_type = #tpu.core_type<tc>, window_params = [{pipeline_mode = #tpu.pipeline_mode<synchronous>, transform_indices = @transform_0, window_bounds = array<i64: 16, 128>}, {pipeline_mode = #tpu.pipeline_mode<synchronous>, transform_indices = @transform_1, window_bounds = array<i64: 4, 128, 288>}, {pipeline_mode = #tpu.pipeline_mode<synchronous>, transform_indices = @transform_2, window_bounds = array<i64: 32, 1>}, {transform_indices = @transform_3, window_bounds = array<i64: 33>}, {pipeline_mode = #tpu.pipeline_mode<synchronous>, transform_indices = @transform_4, window_bounds = array<i64: 8, 8>}]} {
    %c0 = arith.constant 0 : index
    %c0_0 = arith.constant 0 : index
    %0 = vector.load %arg3[%c0, %c0_0] : memref<32x1xf32, #tpu.memory_space<vmem>>, vector<32x1xf32>
    %1 = tpu.iota {dimensions = array<i32: 0>} : vector<8x8xi32>
    %2 = tpu.iota {dimensions = array<i32: 1>} : vector<8x8xi32>
    %3 = arith.cmpi eq, %1, %2 : vector<8x8xi32>
    %4 = arith.extui %3 : vector<8x8xi1> to vector<8x8xi32>
    %5 = arith.sitofp %4 : vector<8x8xi32> to vector<8x8xf32>
    %cst = arith.constant 1.000000e+00 : bf16
    %6 = vector.broadcast %cst : bf16 to vector<8x1xbf16>
    %c32 = arith.constant 32 : index
    %7 = memref.load %arg4[%c32] : memref<33xf32, #tpu.memory_space<smem>>
    %c0_1 = arith.constant 0 : index
    %c0_2 = arith.constant 0 : index
    %8 = vector.load %arg1[%c0_1, %c0_2] : memref<16x128xbf16, #tpu.memory_space<vmem>>, vector<16x128xbf16>
    %c0_3 = arith.constant 0 : index
    %c0_4 = arith.constant 0 : index
    %c0_5 = arith.constant 0 : index
    %9 = vector.load %arg2[%c0_3, %c0_4, %c0_5] : memref<4x128x288xbf16, #tpu.memory_space<vmem>>, vector<1x128x288xbf16>
    %10 = vector.shape_cast %9 : vector<1x128x288xbf16> to vector<128x288xbf16>
    %cst_6 = arith.constant dense<0.000000e+00> : vector<16x288xf32>
    %11 = tpu.matmul %8, %10, %cst_6 {dimension_numbers = #tpu.dot_dimension_numbers<[1], [0], [0], [1], [0, 0, 1, 1], [], []>} : vector<16x128xbf16>, vector<128x288xbf16>, vector<16x288xf32> -> vector<16x288xf32>
    %12 = vector.extract_strided_slice %11 {offsets = [0, 0], sizes = [16, 128], strides = [1, 1]} : vector<16x288xf32> to vector<16x128xf32>
    %13 = vector.extract_strided_slice %11 {offsets = [0, 128], sizes = [16, 128], strides = [1, 1]} : vector<16x288xf32> to vector<16x128xf32>
    %14 = vector.extract_strided_slice %12 {offsets = [8, 0], sizes = [8, 128], strides = [1, 1]} : vector<16x128xf32> to vector<8x128xf32>
    %cst_7 = arith.constant dense<0.000000e+00> : vector<128xf32>
    %15 = vector.multi_reduction <add>, %14, %cst_7 [0] : vector<8x128xf32> to vector<128xf32>
    %16 = vector.shape_cast %15 : vector<128xf32> to vector<1x128xf32>
    %17 = vector.extract_strided_slice %12 {offsets = [0, 0], sizes = [8, 128], strides = [1, 1]} : vector<16x128xf32> to vector<8x128xf32>
    %cst_8 = arith.constant dense<0.000000e+00> : vector<128xf32>
    %18 = vector.multi_reduction <add>, %17, %cst_8 [0] : vector<8x128xf32> to vector<128xf32>
    %19 = vector.shape_cast %18 : vector<128xf32> to vector<1x128xf32>
    %20 = vector.extract_strided_slice %13 {offsets = [0, 0], sizes = [8, 128], strides = [1, 1]} : vector<16x128xf32> to vector<8x128xf32>
    %21 = vector.broadcast %16 : vector<1x128xf32> to vector<8x128xf32>
    %22 = arith.addf %20, %21 : vector<8x128xf32>
    %23 = vector.extract_strided_slice %12 {offsets = [0, 0], sizes = [8, 128], strides = [1, 1]} : vector<16x128xf32> to vector<8x128xf32>
    %cst_9 = arith.constant 8.000000e+00 : f32
    %24 = vector.broadcast %cst_9 : f32 to vector<8x128xf32>
    %25 = arith.mulf %24, %23 : vector<8x128xf32>
    %26 = arith.subf %22, %25 : vector<8x128xf32>
    %27 = vector.extract_strided_slice %13 {offsets = [8, 0], sizes = [8, 128], strides = [1, 1]} : vector<16x128xf32> to vector<8x128xf32>
    %28 = vector.broadcast %19 : vector<1x128xf32> to vector<8x128xf32>
    %29 = arith.addf %27, %28 : vector<8x128xf32>
    %30 = vector.extract_strided_slice %12 {offsets = [8, 0], sizes = [8, 128], strides = [1, 1]} : vector<16x128xf32> to vector<8x128xf32>
    %cst_10 = arith.constant 8.000000e+00 : f32
    %31 = vector.broadcast %cst_10 : f32 to vector<8x128xf32>
    %32 = arith.mulf %31, %30 : vector<8x128xf32>
    %33 = arith.subf %29, %32 : vector<8x128xf32>
    %34 = tpu.concatenate %26, %33 in 0 : vector<8x128xf32>, vector<8x128xf32> -> vector<16x128xf32>
    %35 = arith.truncf %34 : vector<16x128xf32> to vector<16x128xbf16>
    %c1 = arith.constant 1 : index
    %c0_11 = arith.constant 0 : index
    %c0_12 = arith.constant 0 : index
    %36 = vector.load %arg2[%c1, %c0_11, %c0_12] : memref<4x128x288xbf16, #tpu.memory_space<vmem>>, vector<1x128x288xbf16>
    %37 = vector.shape_cast %36 : vector<1x128x288xbf16> to vector<128x288xbf16>
    %cst_13 = arith.constant dense<0.000000e+00> : vector<16x288xf32>
    %38 = tpu.matmul %35, %37, %cst_13 {dimension_numbers = #tpu.dot_dimension_numbers<[1], [0], [0], [1], [0, 0, 1, 1], [], []>} : vector<16x128xbf16>, vector<128x288xbf16>, vector<16x288xf32> -> vector<16x288xf32>
    %39 = vector.extract_strided_slice %38 {offsets = [0, 0], sizes = [16, 128], strides = [1, 1]} : vector<16x288xf32> to vector<16x128xf32>
    %40 = vector.extract_strided_slice %38 {offsets = [0, 128], sizes = [16, 128], strides = [1, 1]} : vector<16x288xf32> to vector<16x128xf32>
    %41 = vector.extract_strided_slice %38 {offsets = [0, 256], sizes = [16, 32], strides = [1, 1]} : vector<16x288xf32> to vector<16x32xf32>
    %42 = vector.extract_strided_slice %41 {offsets = [0, 0], sizes = [8, 32], strides = [1, 1]} : vector<16x32xf32> to vector<8x32xf32>
    %43 = vector.extract_strided_slice %41 {offsets = [8, 0], sizes = [8, 32], strides = [1, 1]} : vector<16x32xf32> to vector<8x32xf32>
    %cst_14 = arith.constant dense<0.000000e+00> : vector<32x8xf32>
    %44 = tpu.matmul %43, %5, %cst_14 {dimension_numbers = #tpu.dot_dimension_numbers<[0], [0], [1], [1], [0, 1, 1, 1], [], []>} : vector<8x32xf32>, vector<8x8xf32>, vector<32x8xf32> -> vector<32x8xf32>
    %45 = vector.broadcast %0 : vector<32x1xf32> to vector<32x8xf32>
    %46 = arith.addf %44, %45 : vector<32x8xf32>
    %47 = vector.broadcast %7 : f32 to vector<8x8xf32>
    %48 = vector.extract_strided_slice %46 {offsets = [0, 0], sizes = [1, 8], strides = [1, 1]} : vector<32x8xf32> to vector<1x8xf32>
    %49 = vector.extract_strided_slice %42 {offsets = [0, 0], sizes = [8, 1], strides = [1, 1]} : vector<8x32xf32> to vector<8x1xf32>
    %50 = vector.broadcast %48 : vector<1x8xf32> to vector<8x8xf32>
    %51 = vector.broadcast %49 : vector<8x1xf32> to vector<8x8xf32>
    %52 = arith.subf %50, %51 : vector<8x8xf32>
    %c0_15 = arith.constant 0 : index
    %53 = memref.load %arg4[%c0_15] : memref<33xf32, #tpu.memory_space<smem>>
    %cst_16 = arith.constant 0.000000e+00 : f32
    %54 = vector.broadcast %cst_16 : f32 to vector<8x8xf32>
    %55 = arith.maximumf %52, %54 : vector<8x8xf32>
    %56 = vector.broadcast %53 : f32 to vector<8x8xf32>
    %57 = arith.mulf %56, %55 : vector<8x8xf32>
    %58 = arith.addf %47, %57 : vector<8x8xf32>
    %59 = vector.extract_strided_slice %46 {offsets = [1, 0], sizes = [1, 8], strides = [1, 1]} : vector<32x8xf32> to vector<1x8xf32>
    %60 = vector.extract_strided_slice %42 {offsets = [0, 1], sizes = [8, 1], strides = [1, 1]} : vector<8x32xf32> to vector<8x1xf32>
    %61 = vector.broadcast %59 : vector<1x8xf32> to vector<8x8xf32>
    %62 = vector.broadcast %60 : vector<8x1xf32> to vector<8x8xf32>
    %63 = arith.subf %61, %62 : vector<8x8xf32>
    %c1_17 = arith.constant 1 : index
    %64 = memref.load %arg4[%c1_17] : memref<33xf32, #tpu.memory_space<smem>>
    %cst_18 = arith.constant 0.000000e+00 : f32
    %65 = vector.broadcast %cst_18 : f32 to vector<8x8xf32>
    %66 = arith.maximumf %63, %65 : vector<8x8xf32>
    %67 = vector.broadcast %64 : f32 to vector<8x8xf32>
    %68 = arith.mulf %67, %66 : vector<8x8xf32>
    %69 = arith.addf %58, %68 : vector<8x8xf32>
    %70 = vector.extract_strided_slice %46 {offsets = [2, 0], sizes = [1, 8], strides = [1, 1]} : vector<32x8xf32> to vector<1x8xf32>
    %71 = vector.extract_strided_slice %42 {offsets = [0, 2], sizes = [8, 1], strides = [1, 1]} : vector<8x32xf32> to vector<8x1xf32>
    %72 = vector.broadcast %70 : vector<1x8xf32> to vector<8x8xf32>
    %73 = vector.broadcast %71 : vector<8x1xf32> to vector<8x8xf32>
    %74 = arith.subf %72, %73 : vector<8x8xf32>
    %c2 = arith.constant 2 : index
    %75 = memref.load %arg4[%c2] : memref<33xf32, #tpu.memory_space<smem>>
    %cst_19 = arith.constant 0.000000e+00 : f32
    %76 = vector.broadcast %cst_19 : f32 to vector<8x8xf32>
    %77 = arith.maximumf %74, %76 : vector<8x8xf32>
    %78 = vector.broadcast %75 : f32 to vector<8x8xf32>
    %79 = arith.mulf %78, %77 : vector<8x8xf32>
    %80 = arith.addf %69, %79 : vector<8x8xf32>
    %81 = vector.extract_strided_slice %46 {offsets = [3, 0], sizes = [1, 8], strides = [1, 1]} : vector<32x8xf32> to vector<1x8xf32>
    %82 = vector.extract_strided_slice %42 {offsets = [0, 3], sizes = [8, 1], strides = [1, 1]} : vector<8x32xf32> to vector<8x1xf32>
    %83 = vector.broadcast %81 : vector<1x8xf32> to vector<8x8xf32>
    %84 = vector.broadcast %82 : vector<8x1xf32> to vector<8x8xf32>
    %85 = arith.subf %83, %84 : vector<8x8xf32>
    %c3 = arith.constant 3 : index
    %86 = memref.load %arg4[%c3] : memref<33xf32, #tpu.memory_space<smem>>
    %cst_20 = arith.constant 0.000000e+00 : f32
    %87 = vector.broadcast %cst_20 : f32 to vector<8x8xf32>
    %88 = arith.maximumf %85, %87 : vector<8x8xf32>
    %89 = vector.broadcast %86 : f32 to vector<8x8xf32>
    %90 = arith.mulf %89, %88 : vector<8x8xf32>
    %91 = arith.addf %80, %90 : vector<8x8xf32>
    %92 = vector.extract_strided_slice %46 {offsets = [4, 0], sizes = [1, 8], strides = [1, 1]} : vector<32x8xf32> to vector<1x8xf32>
    %93 = vector.extract_strided_slice %42 {offsets = [0, 4], sizes = [8, 1], strides = [1, 1]} : vector<8x32xf32> to vector<8x1xf32>
    %94 = vector.broadcast %92 : vector<1x8xf32> to vector<8x8xf32>
    %95 = vector.broadcast %93 : vector<8x1xf32> to vector<8x8xf32>
    %96 = arith.subf %94, %95 : vector<8x8xf32>
    %c4 = arith.constant 4 : index
    %97 = memref.load %arg4[%c4] : memref<33xf32, #tpu.memory_space<smem>>
    %cst_21 = arith.constant 0.000000e+00 : f32
    %98 = vector.broadcast %cst_21 : f32 to vector<8x8xf32>
    %99 = arith.maximumf %96, %98 : vector<8x8xf32>
    %100 = vector.broadcast %97 : f32 to vector<8x8xf32>
    %101 = arith.mulf %100, %99 : vector<8x8xf32>
    %102 = arith.addf %91, %101 : vector<8x8xf32>
    %103 = vector.extract_strided_slice %46 {offsets = [5, 0], sizes = [1, 8], strides = [1, 1]} : vector<32x8xf32> to vector<1x8xf32>
    %104 = vector.extract_strided_slice %42 {offsets = [0, 5], sizes = [8, 1], strides = [1, 1]} : vector<8x32xf32> to vector<8x1xf32>
    %105 = vector.broadcast %103 : vector<1x8xf32> to vector<8x8xf32>
    %106 = vector.broadcast %104 : vector<8x1xf32> to vector<8x8xf32>
    %107 = arith.subf %105, %106 : vector<8x8xf32>
    %c5 = arith.constant 5 : index
    %108 = memref.load %arg4[%c5] : memref<33xf32, #tpu.memory_space<smem>>
    %cst_22 = arith.constant 0.000000e+00 : f32
    %109 = vector.broadcast %cst_22 : f32 to vector<8x8xf32>
    %110 = arith.maximumf %107, %109 : vector<8x8xf32>
    %111 = vector.broadcast %108 : f32 to vector<8x8xf32>
    %112 = arith.mulf %111, %110 : vector<8x8xf32>
    %113 = arith.addf %102, %112 : vector<8x8xf32>
    %114 = vector.extract_strided_slice %46 {offsets = [6, 0], sizes = [1, 8], strides = [1, 1]} : vector<32x8xf32> to vector<1x8xf32>
    %115 = vector.extract_strided_slice %42 {offsets = [0, 6], sizes = [8, 1], strides = [1, 1]} : vector<8x32xf32> to vector<8x1xf32>
    %116 = vector.broadcast %114 : vector<1x8xf32> to vector<8x8xf32>
    %117 = vector.broadcast %115 : vector<8x1xf32> to vector<8x8xf32>
    %118 = arith.subf %116, %117 : vector<8x8xf32>
    %c6 = arith.constant 6 : index
    %119 = memref.load %arg4[%c6] : memref<33xf32, #tpu.memory_space<smem>>
    %cst_23 = arith.constant 0.000000e+00 : f32
    %120 = vector.broadcast %cst_23 : f32 to vector<8x8xf32>
    %121 = arith.maximumf %118, %120 : vector<8x8xf32>
    %122 = vector.broadcast %119 : f32 to vector<8x8xf32>
    %123 = arith.mulf %122, %121 : vector<8x8xf32>
    %124 = arith.addf %113, %123 : vector<8x8xf32>
    %125 = vector.extract_strided_slice %46 {offsets = [7, 0], sizes = [1, 8], strides = [1, 1]} : vector<32x8xf32> to vector<1x8xf32>
    %126 = vector.extract_strided_slice %42 {offsets = [0, 7], sizes = [8, 1], strides = [1, 1]} : vector<8x32xf32> to vector<8x1xf32>
    %127 = vector.broadcast %125 : vector<1x8xf32> to vector<8x8xf32>
    %128 = vector.broadcast %126 : vector<8x1xf32> to vector<8x8xf32>
    %129 = arith.subf %127, %128 : vector<8x8xf32>
    %c7 = arith.constant 7 : index
    %130 = memref.load %arg4[%c7] : memref<33xf32, #tpu.memory_space<smem>>
    %cst_24 = arith.constant 0.000000e+00 : f32
    %131 = vector.broadcast %cst_24 : f32 to vector<8x8xf32>
    %132 = arith.maximumf %129, %131 : vector<8x8xf32>
    %133 = vector.broadcast %130 : f32 to vector<8x8xf32>
    %134 = arith.mulf %133, %132 : vector<8x8xf32>
    %135 = arith.addf %124, %134 : vector<8x8xf32>
    %136 = vector.extract_strided_slice %46 {offsets = [8, 0], sizes = [1, 8], strides = [1, 1]} : vector<32x8xf32> to vector<1x8xf32>
    %137 = vector.extract_strided_slice %42 {offsets = [0, 8], sizes = [8, 1], strides = [1, 1]} : vector<8x32xf32> to vector<8x1xf32>
    %138 = vector.broadcast %136 : vector<1x8xf32> to vector<8x8xf32>
    %139 = vector.broadcast %137 : vector<8x1xf32> to vector<8x8xf32>
    %140 = arith.subf %138, %139 : vector<8x8xf32>
    %c8 = arith.constant 8 : index
    %141 = memref.load %arg4[%c8] : memref<33xf32, #tpu.memory_space<smem>>
    %cst_25 = arith.constant 0.000000e+00 : f32
    %142 = vector.broadcast %cst_25 : f32 to vector<8x8xf32>
    %143 = arith.maximumf %140, %142 : vector<8x8xf32>
    %144 = vector.broadcast %141 : f32 to vector<8x8xf32>
    %145 = arith.mulf %144, %143 : vector<8x8xf32>
    %146 = arith.addf %135, %145 : vector<8x8xf32>
    %147 = vector.extract_strided_slice %46 {offsets = [9, 0], sizes = [1, 8], strides = [1, 1]} : vector<32x8xf32> to vector<1x8xf32>
    %148 = vector.extract_strided_slice %42 {offsets = [0, 9], sizes = [8, 1], strides = [1, 1]} : vector<8x32xf32> to vector<8x1xf32>
    %149 = vector.broadcast %147 : vector<1x8xf32> to vector<8x8xf32>
    %150 = vector.broadcast %148 : vector<8x1xf32> to vector<8x8xf32>
    %151 = arith.subf %149, %150 : vector<8x8xf32>
    %c9 = arith.constant 9 : index
    %152 = memref.load %arg4[%c9] : memref<33xf32, #tpu.memory_space<smem>>
    %cst_26 = arith.constant 0.000000e+00 : f32
    %153 = vector.broadcast %cst_26 : f32 to vector<8x8xf32>
    %154 = arith.maximumf %151, %153 : vector<8x8xf32>
    %155 = vector.broadcast %152 : f32 to vector<8x8xf32>
    %156 = arith.mulf %155, %154 : vector<8x8xf32>
    %157 = arith.addf %146, %156 : vector<8x8xf32>
    %158 = vector.extract_strided_slice %46 {offsets = [10, 0], sizes = [1, 8], strides = [1, 1]} : vector<32x8xf32> to vector<1x8xf32>
    %159 = vector.extract_strided_slice %42 {offsets = [0, 10], sizes = [8, 1], strides = [1, 1]} : vector<8x32xf32> to vector<8x1xf32>
    %160 = vector.broadcast %158 : vector<1x8xf32> to vector<8x8xf32>
    %161 = vector.broadcast %159 : vector<8x1xf32> to vector<8x8xf32>
    %162 = arith.subf %160, %161 : vector<8x8xf32>
    %c10 = arith.constant 10 : index
    %163 = memref.load %arg4[%c10] : memref<33xf32, #tpu.memory_space<smem>>
    %cst_27 = arith.constant 0.000000e+00 : f32
    %164 = vector.broadcast %cst_27 : f32 to vector<8x8xf32>
    %165 = arith.maximumf %162, %164 : vector<8x8xf32>
    %166 = vector.broadcast %163 : f32 to vector<8x8xf32>
    %167 = arith.mulf %166, %165 : vector<8x8xf32>
    %168 = arith.addf %157, %167 : vector<8x8xf32>
    %169 = vector.extract_strided_slice %46 {offsets = [11, 0], sizes = [1, 8], strides = [1, 1]} : vector<32x8xf32> to vector<1x8xf32>
    %170 = vector.extract_strided_slice %42 {offsets = [0, 11], sizes = [8, 1], strides = [1, 1]} : vector<8x32xf32> to vector<8x1xf32>
    %171 = vector.broadcast %169 : vector<1x8xf32> to vector<8x8xf32>
    %172 = vector.broadcast %170 : vector<8x1xf32> to vector<8x8xf32>
    %173 = arith.subf %171, %172 : vector<8x8xf32>
    %c11 = arith.constant 11 : index
    %174 = memref.load %arg4[%c11] : memref<33xf32, #tpu.memory_space<smem>>
    %cst_28 = arith.constant 0.000000e+00 : f32
    %175 = vector.broadcast %cst_28 : f32 to vector<8x8xf32>
    %176 = arith.maximumf %173, %175 : vector<8x8xf32>
    %177 = vector.broadcast %174 : f32 to vector<8x8xf32>
    %178 = arith.mulf %177, %176 : vector<8x8xf32>
    %179 = arith.addf %168, %178 : vector<8x8xf32>
    %180 = vector.extract_strided_slice %46 {offsets = [12, 0], sizes = [1, 8], strides = [1, 1]} : vector<32x8xf32> to vector<1x8xf32>
    %181 = vector.extract_strided_slice %42 {offsets = [0, 12], sizes = [8, 1], strides = [1, 1]} : vector<8x32xf32> to vector<8x1xf32>
    %182 = vector.broadcast %180 : vector<1x8xf32> to vector<8x8xf32>
    %183 = vector.broadcast %181 : vector<8x1xf32> to vector<8x8xf32>
    %184 = arith.subf %182, %183 : vector<8x8xf32>
    %c12 = arith.constant 12 : index
    %185 = memref.load %arg4[%c12] : memref<33xf32, #tpu.memory_space<smem>>
    %cst_29 = arith.constant 0.000000e+00 : f32
    %186 = vector.broadcast %cst_29 : f32 to vector<8x8xf32>
    %187 = arith.maximumf %184, %186 : vector<8x8xf32>
    %188 = vector.broadcast %185 : f32 to vector<8x8xf32>
    %189 = arith.mulf %188, %187 : vector<8x8xf32>
    %190 = arith.addf %179, %189 : vector<8x8xf32>
    %191 = vector.extract_strided_slice %46 {offsets = [13, 0], sizes = [1, 8], strides = [1, 1]} : vector<32x8xf32> to vector<1x8xf32>
    %192 = vector.extract_strided_slice %42 {offsets = [0, 13], sizes = [8, 1], strides = [1, 1]} : vector<8x32xf32> to vector<8x1xf32>
    %193 = vector.broadcast %191 : vector<1x8xf32> to vector<8x8xf32>
    %194 = vector.broadcast %192 : vector<8x1xf32> to vector<8x8xf32>
    %195 = arith.subf %193, %194 : vector<8x8xf32>
    %c13 = arith.constant 13 : index
    %196 = memref.load %arg4[%c13] : memref<33xf32, #tpu.memory_space<smem>>
    %cst_30 = arith.constant 0.000000e+00 : f32
    %197 = vector.broadcast %cst_30 : f32 to vector<8x8xf32>
    %198 = arith.maximumf %195, %197 : vector<8x8xf32>
    %199 = vector.broadcast %196 : f32 to vector<8x8xf32>
    %200 = arith.mulf %199, %198 : vector<8x8xf32>
    %201 = arith.addf %190, %200 : vector<8x8xf32>
    %202 = vector.extract_strided_slice %46 {offsets = [14, 0], sizes = [1, 8], strides = [1, 1]} : vector<32x8xf32> to vector<1x8xf32>
    %203 = vector.extract_strided_slice %42 {offsets = [0, 14], sizes = [8, 1], strides = [1, 1]} : vector<8x32xf32> to vector<8x1xf32>
    %204 = vector.broadcast %202 : vector<1x8xf32> to vector<8x8xf32>
    %205 = vector.broadcast %203 : vector<8x1xf32> to vector<8x8xf32>
    %206 = arith.subf %204, %205 : vector<8x8xf32>
    %c14 = arith.constant 14 : index
    %207 = memref.load %arg4[%c14] : memref<33xf32, #tpu.memory_space<smem>>
    %cst_31 = arith.constant 0.000000e+00 : f32
    %208 = vector.broadcast %cst_31 : f32 to vector<8x8xf32>
    %209 = arith.maximumf %206, %208 : vector<8x8xf32>
    %210 = vector.broadcast %207 : f32 to vector<8x8xf32>
    %211 = arith.mulf %210, %209 : vector<8x8xf32>
    %212 = arith.addf %201, %211 : vector<8x8xf32>
    %213 = vector.extract_strided_slice %46 {offsets = [15, 0], sizes = [1, 8], strides = [1, 1]} : vector<32x8xf32> to vector<1x8xf32>
    %214 = vector.extract_strided_slice %42 {offsets = [0, 15], sizes = [8, 1], strides = [1, 1]} : vector<8x32xf32> to vector<8x1xf32>
    %215 = vector.broadcast %213 : vector<1x8xf32> to vector<8x8xf32>
    %216 = vector.broadcast %214 : vector<8x1xf32> to vector<8x8xf32>
    %217 = arith.subf %215, %216 : vector<8x8xf32>
    %c15 = arith.constant 15 : index
    %218 = memref.load %arg4[%c15] : memref<33xf32, #tpu.memory_space<smem>>
    %cst_32 = arith.constant 0.000000e+00 : f32
    %219 = vector.broadcast %cst_32 : f32 to vector<8x8xf32>
    %220 = arith.maximumf %217, %219 : vector<8x8xf32>
    %221 = vector.broadcast %218 : f32 to vector<8x8xf32>
    %222 = arith.mulf %221, %220 : vector<8x8xf32>
    %223 = arith.addf %212, %222 : vector<8x8xf32>
    %224 = vector.extract_strided_slice %46 {offsets = [16, 0], sizes = [1, 8], strides = [1, 1]} : vector<32x8xf32> to vector<1x8xf32>
    %225 = vector.extract_strided_slice %42 {offsets = [0, 16], sizes = [8, 1], strides = [1, 1]} : vector<8x32xf32> to vector<8x1xf32>
    %226 = vector.broadcast %224 : vector<1x8xf32> to vector<8x8xf32>
    %227 = vector.broadcast %225 : vector<8x1xf32> to vector<8x8xf32>
    %228 = arith.subf %226, %227 : vector<8x8xf32>
    %c16 = arith.constant 16 : index
    %229 = memref.load %arg4[%c16] : memref<33xf32, #tpu.memory_space<smem>>
    %cst_33 = arith.constant 0.000000e+00 : f32
    %230 = vector.broadcast %cst_33 : f32 to vector<8x8xf32>
    %231 = arith.maximumf %228, %230 : vector<8x8xf32>
    %232 = vector.broadcast %229 : f32 to vector<8x8xf32>
    %233 = arith.mulf %232, %231 : vector<8x8xf32>
    %234 = arith.addf %223, %233 : vector<8x8xf32>
    %235 = vector.extract_strided_slice %46 {offsets = [17, 0], sizes = [1, 8], strides = [1, 1]} : vector<32x8xf32> to vector<1x8xf32>
    %236 = vector.extract_strided_slice %42 {offsets = [0, 17], sizes = [8, 1], strides = [1, 1]} : vector<8x32xf32> to vector<8x1xf32>
    %237 = vector.broadcast %235 : vector<1x8xf32> to vector<8x8xf32>
    %238 = vector.broadcast %236 : vector<8x1xf32> to vector<8x8xf32>
    %239 = arith.subf %237, %238 : vector<8x8xf32>
    %c17 = arith.constant 17 : index
    %240 = memref.load %arg4[%c17] : memref<33xf32, #tpu.memory_space<smem>>
    %cst_34 = arith.constant 0.000000e+00 : f32
    %241 = vector.broadcast %cst_34 : f32 to vector<8x8xf32>
    %242 = arith.maximumf %239, %241 : vector<8x8xf32>
    %243 = vector.broadcast %240 : f32 to vector<8x8xf32>
    %244 = arith.mulf %243, %242 : vector<8x8xf32>
    %245 = arith.addf %234, %244 : vector<8x8xf32>
    %246 = vector.extract_strided_slice %46 {offsets = [18, 0], sizes = [1, 8], strides = [1, 1]} : vector<32x8xf32> to vector<1x8xf32>
    %247 = vector.extract_strided_slice %42 {offsets = [0, 18], sizes = [8, 1], strides = [1, 1]} : vector<8x32xf32> to vector<8x1xf32>
    %248 = vector.broadcast %246 : vector<1x8xf32> to vector<8x8xf32>
    %249 = vector.broadcast %247 : vector<8x1xf32> to vector<8x8xf32>
    %250 = arith.subf %248, %249 : vector<8x8xf32>
    %c18 = arith.constant 18 : index
    %251 = memref.load %arg4[%c18] : memref<33xf32, #tpu.memory_space<smem>>
    %cst_35 = arith.constant 0.000000e+00 : f32
    %252 = vector.broadcast %cst_35 : f32 to vector<8x8xf32>
    %253 = arith.maximumf %250, %252 : vector<8x8xf32>
    %254 = vector.broadcast %251 : f32 to vector<8x8xf32>
    %255 = arith.mulf %254, %253 : vector<8x8xf32>
    %256 = arith.addf %245, %255 : vector<8x8xf32>
    %257 = vector.extract_strided_slice %46 {offsets = [19, 0], sizes = [1, 8], strides = [1, 1]} : vector<32x8xf32> to vector<1x8xf32>
    %258 = vector.extract_strided_slice %42 {offsets = [0, 19], sizes = [8, 1], strides = [1, 1]} : vector<8x32xf32> to vector<8x1xf32>
    %259 = vector.broadcast %257 : vector<1x8xf32> to vector<8x8xf32>
    %260 = vector.broadcast %258 : vector<8x1xf32> to vector<8x8xf32>
    %261 = arith.subf %259, %260 : vector<8x8xf32>
    %c19 = arith.constant 19 : index
    %262 = memref.load %arg4[%c19] : memref<33xf32, #tpu.memory_space<smem>>
    %cst_36 = arith.constant 0.000000e+00 : f32
    %263 = vector.broadcast %cst_36 : f32 to vector<8x8xf32>
    %264 = arith.maximumf %261, %263 : vector<8x8xf32>
    %265 = vector.broadcast %262 : f32 to vector<8x8xf32>
    %266 = arith.mulf %265, %264 : vector<8x8xf32>
    %267 = arith.addf %256, %266 : vector<8x8xf32>
    %268 = vector.extract_strided_slice %46 {offsets = [20, 0], sizes = [1, 8], strides = [1, 1]} : vector<32x8xf32> to vector<1x8xf32>
    %269 = vector.extract_strided_slice %42 {offsets = [0, 20], sizes = [8, 1], strides = [1, 1]} : vector<8x32xf32> to vector<8x1xf32>
    %270 = vector.broadcast %268 : vector<1x8xf32> to vector<8x8xf32>
    %271 = vector.broadcast %269 : vector<8x1xf32> to vector<8x8xf32>
    %272 = arith.subf %270, %271 : vector<8x8xf32>
    %c20 = arith.constant 20 : index
    %273 = memref.load %arg4[%c20] : memref<33xf32, #tpu.memory_space<smem>>
    %cst_37 = arith.constant 0.000000e+00 : f32
    %274 = vector.broadcast %cst_37 : f32 to vector<8x8xf32>
    %275 = arith.maximumf %272, %274 : vector<8x8xf32>
    %276 = vector.broadcast %273 : f32 to vector<8x8xf32>
    %277 = arith.mulf %276, %275 : vector<8x8xf32>
    %278 = arith.addf %267, %277 : vector<8x8xf32>
    %279 = vector.extract_strided_slice %46 {offsets = [21, 0], sizes = [1, 8], strides = [1, 1]} : vector<32x8xf32> to vector<1x8xf32>
    %280 = vector.extract_strided_slice %42 {offsets = [0, 21], sizes = [8, 1], strides = [1, 1]} : vector<8x32xf32> to vector<8x1xf32>
    %281 = vector.broadcast %279 : vector<1x8xf32> to vector<8x8xf32>
    %282 = vector.broadcast %280 : vector<8x1xf32> to vector<8x8xf32>
    %283 = arith.subf %281, %282 : vector<8x8xf32>
    %c21 = arith.constant 21 : index
    %284 = memref.load %arg4[%c21] : memref<33xf32, #tpu.memory_space<smem>>
    %cst_38 = arith.constant 0.000000e+00 : f32
    %285 = vector.broadcast %cst_38 : f32 to vector<8x8xf32>
    %286 = arith.maximumf %283, %285 : vector<8x8xf32>
    %287 = vector.broadcast %284 : f32 to vector<8x8xf32>
    %288 = arith.mulf %287, %286 : vector<8x8xf32>
    %289 = arith.addf %278, %288 : vector<8x8xf32>
    %290 = vector.extract_strided_slice %46 {offsets = [22, 0], sizes = [1, 8], strides = [1, 1]} : vector<32x8xf32> to vector<1x8xf32>
    %291 = vector.extract_strided_slice %42 {offsets = [0, 22], sizes = [8, 1], strides = [1, 1]} : vector<8x32xf32> to vector<8x1xf32>
    %292 = vector.broadcast %290 : vector<1x8xf32> to vector<8x8xf32>
    %293 = vector.broadcast %291 : vector<8x1xf32> to vector<8x8xf32>
    %294 = arith.subf %292, %293 : vector<8x8xf32>
    %c22 = arith.constant 22 : index
    %295 = memref.load %arg4[%c22] : memref<33xf32, #tpu.memory_space<smem>>
    %cst_39 = arith.constant 0.000000e+00 : f32
    %296 = vector.broadcast %cst_39 : f32 to vector<8x8xf32>
    %297 = arith.maximumf %294, %296 : vector<8x8xf32>
    %298 = vector.broadcast %295 : f32 to vector<8x8xf32>
    %299 = arith.mulf %298, %297 : vector<8x8xf32>
    %300 = arith.addf %289, %299 : vector<8x8xf32>
    %301 = vector.extract_strided_slice %46 {offsets = [23, 0], sizes = [1, 8], strides = [1, 1]} : vector<32x8xf32> to vector<1x8xf32>
    %302 = vector.extract_strided_slice %42 {offsets = [0, 23], sizes = [8, 1], strides = [1, 1]} : vector<8x32xf32> to vector<8x1xf32>
    %303 = vector.broadcast %301 : vector<1x8xf32> to vector<8x8xf32>
    %304 = vector.broadcast %302 : vector<8x1xf32> to vector<8x8xf32>
    %305 = arith.subf %303, %304 : vector<8x8xf32>
    %c23 = arith.constant 23 : index
    %306 = memref.load %arg4[%c23] : memref<33xf32, #tpu.memory_space<smem>>
    %cst_40 = arith.constant 0.000000e+00 : f32
    %307 = vector.broadcast %cst_40 : f32 to vector<8x8xf32>
    %308 = arith.maximumf %305, %307 : vector<8x8xf32>
    %309 = vector.broadcast %306 : f32 to vector<8x8xf32>
    %310 = arith.mulf %309, %308 : vector<8x8xf32>
    %311 = arith.addf %300, %310 : vector<8x8xf32>
    %312 = vector.extract_strided_slice %46 {offsets = [24, 0], sizes = [1, 8], strides = [1, 1]} : vector<32x8xf32> to vector<1x8xf32>
    %313 = vector.extract_strided_slice %42 {offsets = [0, 24], sizes = [8, 1], strides = [1, 1]} : vector<8x32xf32> to vector<8x1xf32>
    %314 = vector.broadcast %312 : vector<1x8xf32> to vector<8x8xf32>
    %315 = vector.broadcast %313 : vector<8x1xf32> to vector<8x8xf32>
    %316 = arith.subf %314, %315 : vector<8x8xf32>
    %c24 = arith.constant 24 : index
    %317 = memref.load %arg4[%c24] : memref<33xf32, #tpu.memory_space<smem>>
    %cst_41 = arith.constant 0.000000e+00 : f32
    %318 = vector.broadcast %cst_41 : f32 to vector<8x8xf32>
    %319 = arith.maximumf %316, %318 : vector<8x8xf32>
    %320 = vector.broadcast %317 : f32 to vector<8x8xf32>
    %321 = arith.mulf %320, %319 : vector<8x8xf32>
    %322 = arith.addf %311, %321 : vector<8x8xf32>
    %323 = vector.extract_strided_slice %46 {offsets = [25, 0], sizes = [1, 8], strides = [1, 1]} : vector<32x8xf32> to vector<1x8xf32>
    %324 = vector.extract_strided_slice %42 {offsets = [0, 25], sizes = [8, 1], strides = [1, 1]} : vector<8x32xf32> to vector<8x1xf32>
    %325 = vector.broadcast %323 : vector<1x8xf32> to vector<8x8xf32>
    %326 = vector.broadcast %324 : vector<8x1xf32> to vector<8x8xf32>
    %327 = arith.subf %325, %326 : vector<8x8xf32>
    %c25 = arith.constant 25 : index
    %328 = memref.load %arg4[%c25] : memref<33xf32, #tpu.memory_space<smem>>
    %cst_42 = arith.constant 0.000000e+00 : f32
    %329 = vector.broadcast %cst_42 : f32 to vector<8x8xf32>
    %330 = arith.maximumf %327, %329 : vector<8x8xf32>
    %331 = vector.broadcast %328 : f32 to vector<8x8xf32>
    %332 = arith.mulf %331, %330 : vector<8x8xf32>
    %333 = arith.addf %322, %332 : vector<8x8xf32>
    %334 = vector.extract_strided_slice %46 {offsets = [26, 0], sizes = [1, 8], strides = [1, 1]} : vector<32x8xf32> to vector<1x8xf32>
    %335 = vector.extract_strided_slice %42 {offsets = [0, 26], sizes = [8, 1], strides = [1, 1]} : vector<8x32xf32> to vector<8x1xf32>
    %336 = vector.broadcast %334 : vector<1x8xf32> to vector<8x8xf32>
    %337 = vector.broadcast %335 : vector<8x1xf32> to vector<8x8xf32>
    %338 = arith.subf %336, %337 : vector<8x8xf32>
    %c26 = arith.constant 26 : index
    %339 = memref.load %arg4[%c26] : memref<33xf32, #tpu.memory_space<smem>>
    %cst_43 = arith.constant 0.000000e+00 : f32
    %340 = vector.broadcast %cst_43 : f32 to vector<8x8xf32>
    %341 = arith.maximumf %338, %340 : vector<8x8xf32>
    %342 = vector.broadcast %339 : f32 to vector<8x8xf32>
    %343 = arith.mulf %342, %341 : vector<8x8xf32>
    %344 = arith.addf %333, %343 : vector<8x8xf32>
    %345 = vector.extract_strided_slice %46 {offsets = [27, 0], sizes = [1, 8], strides = [1, 1]} : vector<32x8xf32> to vector<1x8xf32>
    %346 = vector.extract_strided_slice %42 {offsets = [0, 27], sizes = [8, 1], strides = [1, 1]} : vector<8x32xf32> to vector<8x1xf32>
    %347 = vector.broadcast %345 : vector<1x8xf32> to vector<8x8xf32>
    %348 = vector.broadcast %346 : vector<8x1xf32> to vector<8x8xf32>
    %349 = arith.subf %347, %348 : vector<8x8xf32>
    %c27 = arith.constant 27 : index
    %350 = memref.load %arg4[%c27] : memref<33xf32, #tpu.memory_space<smem>>
    %cst_44 = arith.constant 0.000000e+00 : f32
    %351 = vector.broadcast %cst_44 : f32 to vector<8x8xf32>
    %352 = arith.maximumf %349, %351 : vector<8x8xf32>
    %353 = vector.broadcast %350 : f32 to vector<8x8xf32>
    %354 = arith.mulf %353, %352 : vector<8x8xf32>
    %355 = arith.addf %344, %354 : vector<8x8xf32>
    %356 = vector.extract_strided_slice %46 {offsets = [28, 0], sizes = [1, 8], strides = [1, 1]} : vector<32x8xf32> to vector<1x8xf32>
    %357 = vector.extract_strided_slice %42 {offsets = [0, 28], sizes = [8, 1], strides = [1, 1]} : vector<8x32xf32> to vector<8x1xf32>
    %358 = vector.broadcast %356 : vector<1x8xf32> to vector<8x8xf32>
    %359 = vector.broadcast %357 : vector<8x1xf32> to vector<8x8xf32>
    %360 = arith.subf %358, %359 : vector<8x8xf32>
    %c28 = arith.constant 28 : index
    %361 = memref.load %arg4[%c28] : memref<33xf32, #tpu.memory_space<smem>>
    %cst_45 = arith.constant 0.000000e+00 : f32
    %362 = vector.broadcast %cst_45 : f32 to vector<8x8xf32>
    %363 = arith.maximumf %360, %362 : vector<8x8xf32>
    %364 = vector.broadcast %361 : f32 to vector<8x8xf32>
    %365 = arith.mulf %364, %363 : vector<8x8xf32>
    %366 = arith.addf %355, %365 : vector<8x8xf32>
    %367 = vector.extract_strided_slice %46 {offsets = [29, 0], sizes = [1, 8], strides = [1, 1]} : vector<32x8xf32> to vector<1x8xf32>
    %368 = vector.extract_strided_slice %42 {offsets = [0, 29], sizes = [8, 1], strides = [1, 1]} : vector<8x32xf32> to vector<8x1xf32>
    %369 = vector.broadcast %367 : vector<1x8xf32> to vector<8x8xf32>
    %370 = vector.broadcast %368 : vector<8x1xf32> to vector<8x8xf32>
    %371 = arith.subf %369, %370 : vector<8x8xf32>
    %c29 = arith.constant 29 : index
    %372 = memref.load %arg4[%c29] : memref<33xf32, #tpu.memory_space<smem>>
    %cst_46 = arith.constant 0.000000e+00 : f32
    %373 = vector.broadcast %cst_46 : f32 to vector<8x8xf32>
    %374 = arith.maximumf %371, %373 : vector<8x8xf32>
    %375 = vector.broadcast %372 : f32 to vector<8x8xf32>
    %376 = arith.mulf %375, %374 : vector<8x8xf32>
    %377 = arith.addf %366, %376 : vector<8x8xf32>
    %378 = vector.extract_strided_slice %46 {offsets = [30, 0], sizes = [1, 8], strides = [1, 1]} : vector<32x8xf32> to vector<1x8xf32>
    %379 = vector.extract_strided_slice %42 {offsets = [0, 30], sizes = [8, 1], strides = [1, 1]} : vector<8x32xf32> to vector<8x1xf32>
    %380 = vector.broadcast %378 : vector<1x8xf32> to vector<8x8xf32>
    %381 = vector.broadcast %379 : vector<8x1xf32> to vector<8x8xf32>
    %382 = arith.subf %380, %381 : vector<8x8xf32>
    %c30 = arith.constant 30 : index
    %383 = memref.load %arg4[%c30] : memref<33xf32, #tpu.memory_space<smem>>
    %cst_47 = arith.constant 0.000000e+00 : f32
    %384 = vector.broadcast %cst_47 : f32 to vector<8x8xf32>
    %385 = arith.maximumf %382, %384 : vector<8x8xf32>
    %386 = vector.broadcast %383 : f32 to vector<8x8xf32>
    %387 = arith.mulf %386, %385 : vector<8x8xf32>
    %388 = arith.addf %377, %387 : vector<8x8xf32>
    %389 = vector.extract_strided_slice %46 {offsets = [31, 0], sizes = [1, 8], strides = [1, 1]} : vector<32x8xf32> to vector<1x8xf32>
    %390 = vector.extract_strided_slice %42 {offsets = [0, 31], sizes = [8, 1], strides = [1, 1]} : vector<8x32xf32> to vector<8x1xf32>
    %391 = vector.broadcast %389 : vector<1x8xf32> to vector<8x8xf32>
    %392 = vector.broadcast %390 : vector<8x1xf32> to vector<8x8xf32>
    %393 = arith.subf %391, %392 : vector<8x8xf32>
    %c31 = arith.constant 31 : index
    %394 = memref.load %arg4[%c31] : memref<33xf32, #tpu.memory_space<smem>>
    %cst_48 = arith.constant 0.000000e+00 : f32
    %395 = vector.broadcast %cst_48 : f32 to vector<8x8xf32>
    %396 = arith.maximumf %393, %395 : vector<8x8xf32>
    %397 = vector.broadcast %394 : f32 to vector<8x8xf32>
    %398 = arith.mulf %397, %396 : vector<8x8xf32>
    %399 = arith.addf %388, %398 : vector<8x8xf32>
    %400 = arith.negf %399 : vector<8x8xf32>
    %401 = math.exp %400 : vector<8x8xf32>
    %cst_49 = arith.constant 1.000000e+00 : f32
    %402 = vector.broadcast %cst_49 : f32 to vector<8x8xf32>
    %403 = arith.addf %402, %401 : vector<8x8xf32>
    %404 = arith.divf %402, %403 : vector<8x8xf32>
    %405 = arith.truncf %404 : vector<8x8xf32> to vector<8x8xbf16>
    %406 = vector.extract_strided_slice %39 {offsets = [0, 0], sizes = [8, 128], strides = [1, 1]} : vector<16x128xf32> to vector<8x128xf32>
    %407 = arith.truncf %406 : vector<8x128xf32> to vector<8x128xbf16>
    %408 = vector.extract_strided_slice %39 {offsets = [8, 0], sizes = [8, 128], strides = [1, 1]} : vector<16x128xf32> to vector<8x128xf32>
    %409 = arith.truncf %408 : vector<8x128xf32> to vector<8x128xbf16>
    %cst_50 = arith.constant dense<0.000000e+00> : vector<8xf32>
    %410 = vector.multi_reduction <add>, %404, %cst_50 [1] : vector<8x8xf32> to vector<8xf32>
    %411 = vector.shape_cast %410 : vector<8xf32> to vector<8x1xf32>
    %cst_51 = arith.constant dense<0.000000e+00> : vector<8x128xf32>
    %412 = tpu.matmul %405, %409, %cst_51 {dimension_numbers = #tpu.dot_dimension_numbers<[1], [0], [0], [1], [0, 0, 1, 1], [], []>} : vector<8x8xbf16>, vector<8x128xbf16>, vector<8x128xf32> -> vector<8x128xf32>
    %413 = tpu.concatenate %407, %6 in 1 : vector<8x128xbf16>, vector<8x1xbf16> -> vector<8x129xbf16>
    %cst_52 = arith.constant dense<0.000000e+00> : vector<8x129xf32>
    %414 = tpu.matmul %405, %413, %cst_52 {dimension_numbers = #tpu.dot_dimension_numbers<[0], [0], [1], [1], [0, 1, 1, 1], [], []>} : vector<8x8xbf16>, vector<8x129xbf16>, vector<8x129xf32> -> vector<8x129xf32>
    %415 = vector.extract_strided_slice %414 {offsets = [0, 0], sizes = [8, 128], strides = [1, 1]} : vector<8x129xf32> to vector<8x128xf32>
    %416 = vector.extract_strided_slice %414 {offsets = [0, 128], sizes = [8, 1], strides = [1, 1]} : vector<8x129xf32> to vector<8x1xf32>
    %417 = vector.extract_strided_slice %40 {offsets = [0, 0], sizes = [8, 128], strides = [1, 1]} : vector<16x128xf32> to vector<8x128xf32>
    %418 = arith.addf %417, %412 : vector<8x128xf32>
    %419 = vector.extract_strided_slice %39 {offsets = [0, 0], sizes = [8, 128], strides = [1, 1]} : vector<16x128xf32> to vector<8x128xf32>
    %420 = vector.broadcast %411 : vector<8x1xf32> to vector<8x128xf32>
    %421 = arith.mulf %420, %419 : vector<8x128xf32>
    %422 = arith.subf %418, %421 : vector<8x128xf32>
    %423 = vector.extract_strided_slice %40 {offsets = [8, 0], sizes = [8, 128], strides = [1, 1]} : vector<16x128xf32> to vector<8x128xf32>
    %424 = arith.addf %423, %415 : vector<8x128xf32>
    %425 = vector.extract_strided_slice %39 {offsets = [8, 0], sizes = [8, 128], strides = [1, 1]} : vector<16x128xf32> to vector<8x128xf32>
    %426 = vector.broadcast %416 : vector<8x1xf32> to vector<8x128xf32>
    %427 = arith.mulf %426, %425 : vector<8x128xf32>
    %428 = arith.subf %424, %427 : vector<8x128xf32>
    %429 = tpu.concatenate %422, %428 in 0 : vector<8x128xf32>, vector<8x128xf32> -> vector<16x128xf32>
    %430 = arith.truncf %429 : vector<16x128xf32> to vector<16x128xbf16>
    %c2_53 = arith.constant 2 : index
    %c0_54 = arith.constant 0 : index
    %c0_55 = arith.constant 0 : index
    %431 = vector.load %arg2[%c2_53, %c0_54, %c0_55] : memref<4x128x288xbf16, #tpu.memory_space<vmem>>, vector<1x128x288xbf16>
    %432 = vector.shape_cast %431 : vector<1x128x288xbf16> to vector<128x288xbf16>
    %cst_56 = arith.constant dense<0.000000e+00> : vector<16x288xf32>
    %433 = tpu.matmul %430, %432, %cst_56 {dimension_numbers = #tpu.dot_dimension_numbers<[1], [0], [0], [1], [0, 0, 1, 1], [], []>} : vector<16x128xbf16>, vector<128x288xbf16>, vector<16x288xf32> -> vector<16x288xf32>
    %434 = vector.extract_strided_slice %433 {offsets = [0, 0], sizes = [16, 128], strides = [1, 1]} : vector<16x288xf32> to vector<16x128xf32>
    %435 = vector.extract_strided_slice %433 {offsets = [0, 128], sizes = [16, 128], strides = [1, 1]} : vector<16x288xf32> to vector<16x128xf32>
    %436 = vector.extract_strided_slice %433 {offsets = [0, 256], sizes = [16, 32], strides = [1, 1]} : vector<16x288xf32> to vector<16x32xf32>
    %437 = vector.extract_strided_slice %436 {offsets = [0, 0], sizes = [8, 32], strides = [1, 1]} : vector<16x32xf32> to vector<8x32xf32>
    %438 = vector.extract_strided_slice %436 {offsets = [8, 0], sizes = [8, 32], strides = [1, 1]} : vector<16x32xf32> to vector<8x32xf32>
    %cst_57 = arith.constant dense<0.000000e+00> : vector<32x8xf32>
    %439 = tpu.matmul %438, %5, %cst_57 {dimension_numbers = #tpu.dot_dimension_numbers<[0], [0], [1], [1], [0, 1, 1, 1], [], []>} : vector<8x32xf32>, vector<8x8xf32>, vector<32x8xf32> -> vector<32x8xf32>
    %440 = vector.broadcast %0 : vector<32x1xf32> to vector<32x8xf32>
    %441 = arith.addf %439, %440 : vector<32x8xf32>
    %442 = vector.broadcast %7 : f32 to vector<8x8xf32>
    %443 = vector.extract_strided_slice %441 {offsets = [0, 0], sizes = [1, 8], strides = [1, 1]} : vector<32x8xf32> to vector<1x8xf32>
    %444 = vector.extract_strided_slice %437 {offsets = [0, 0], sizes = [8, 1], strides = [1, 1]} : vector<8x32xf32> to vector<8x1xf32>
    %445 = vector.broadcast %443 : vector<1x8xf32> to vector<8x8xf32>
    %446 = vector.broadcast %444 : vector<8x1xf32> to vector<8x8xf32>
    %447 = arith.subf %445, %446 : vector<8x8xf32>
    %c0_58 = arith.constant 0 : index
    %448 = memref.load %arg4[%c0_58] : memref<33xf32, #tpu.memory_space<smem>>
    %cst_59 = arith.constant 0.000000e+00 : f32
    %449 = vector.broadcast %cst_59 : f32 to vector<8x8xf32>
    %450 = arith.maximumf %447, %449 : vector<8x8xf32>
    %451 = vector.broadcast %448 : f32 to vector<8x8xf32>
    %452 = arith.mulf %451, %450 : vector<8x8xf32>
    %453 = arith.addf %442, %452 : vector<8x8xf32>
    %454 = vector.extract_strided_slice %441 {offsets = [1, 0], sizes = [1, 8], strides = [1, 1]} : vector<32x8xf32> to vector<1x8xf32>
    %455 = vector.extract_strided_slice %437 {offsets = [0, 1], sizes = [8, 1], strides = [1, 1]} : vector<8x32xf32> to vector<8x1xf32>
    %456 = vector.broadcast %454 : vector<1x8xf32> to vector<8x8xf32>
    %457 = vector.broadcast %455 : vector<8x1xf32> to vector<8x8xf32>
    %458 = arith.subf %456, %457 : vector<8x8xf32>
    %c1_60 = arith.constant 1 : index
    %459 = memref.load %arg4[%c1_60] : memref<33xf32, #tpu.memory_space<smem>>
    %cst_61 = arith.constant 0.000000e+00 : f32
    %460 = vector.broadcast %cst_61 : f32 to vector<8x8xf32>
    %461 = arith.maximumf %458, %460 : vector<8x8xf32>
    %462 = vector.broadcast %459 : f32 to vector<8x8xf32>
    %463 = arith.mulf %462, %461 : vector<8x8xf32>
    %464 = arith.addf %453, %463 : vector<8x8xf32>
    %465 = vector.extract_strided_slice %441 {offsets = [2, 0], sizes = [1, 8], strides = [1, 1]} : vector<32x8xf32> to vector<1x8xf32>
    %466 = vector.extract_strided_slice %437 {offsets = [0, 2], sizes = [8, 1], strides = [1, 1]} : vector<8x32xf32> to vector<8x1xf32>
    %467 = vector.broadcast %465 : vector<1x8xf32> to vector<8x8xf32>
    %468 = vector.broadcast %466 : vector<8x1xf32> to vector<8x8xf32>
    %469 = arith.subf %467, %468 : vector<8x8xf32>
    %c2_62 = arith.constant 2 : index
    %470 = memref.load %arg4[%c2_62] : memref<33xf32, #tpu.memory_space<smem>>
    %cst_63 = arith.constant 0.000000e+00 : f32
    %471 = vector.broadcast %cst_63 : f32 to vector<8x8xf32>
    %472 = arith.maximumf %469, %471 : vector<8x8xf32>
    %473 = vector.broadcast %470 : f32 to vector<8x8xf32>
    %474 = arith.mulf %473, %472 : vector<8x8xf32>
    %475 = arith.addf %464, %474 : vector<8x8xf32>
    %476 = vector.extract_strided_slice %441 {offsets = [3, 0], sizes = [1, 8], strides = [1, 1]} : vector<32x8xf32> to vector<1x8xf32>
    %477 = vector.extract_strided_slice %437 {offsets = [0, 3], sizes = [8, 1], strides = [1, 1]} : vector<8x32xf32> to vector<8x1xf32>
    %478 = vector.broadcast %476 : vector<1x8xf32> to vector<8x8xf32>
    %479 = vector.broadcast %477 : vector<8x1xf32> to vector<8x8xf32>
    %480 = arith.subf %478, %479 : vector<8x8xf32>
    %c3_64 = arith.constant 3 : index
    %481 = memref.load %arg4[%c3_64] : memref<33xf32, #tpu.memory_space<smem>>
    %cst_65 = arith.constant 0.000000e+00 : f32
    %482 = vector.broadcast %cst_65 : f32 to vector<8x8xf32>
    %483 = arith.maximumf %480, %482 : vector<8x8xf32>
    %484 = vector.broadcast %481 : f32 to vector<8x8xf32>
    %485 = arith.mulf %484, %483 : vector<8x8xf32>
    %486 = arith.addf %475, %485 : vector<8x8xf32>
    %487 = vector.extract_strided_slice %441 {offsets = [4, 0], sizes = [1, 8], strides = [1, 1]} : vector<32x8xf32> to vector<1x8xf32>
    %488 = vector.extract_strided_slice %437 {offsets = [0, 4], sizes = [8, 1], strides = [1, 1]} : vector<8x32xf32> to vector<8x1xf32>
    %489 = vector.broadcast %487 : vector<1x8xf32> to vector<8x8xf32>
    %490 = vector.broadcast %488 : vector<8x1xf32> to vector<8x8xf32>
    %491 = arith.subf %489, %490 : vector<8x8xf32>
    %c4_66 = arith.constant 4 : index
    %492 = memref.load %arg4[%c4_66] : memref<33xf32, #tpu.memory_space<smem>>
    %cst_67 = arith.constant 0.000000e+00 : f32
    %493 = vector.broadcast %cst_67 : f32 to vector<8x8xf32>
    %494 = arith.maximumf %491, %493 : vector<8x8xf32>
    %495 = vector.broadcast %492 : f32 to vector<8x8xf32>
    %496 = arith.mulf %495, %494 : vector<8x8xf32>
    %497 = arith.addf %486, %496 : vector<8x8xf32>
    %498 = vector.extract_strided_slice %441 {offsets = [5, 0], sizes = [1, 8], strides = [1, 1]} : vector<32x8xf32> to vector<1x8xf32>
    %499 = vector.extract_strided_slice %437 {offsets = [0, 5], sizes = [8, 1], strides = [1, 1]} : vector<8x32xf32> to vector<8x1xf32>
    %500 = vector.broadcast %498 : vector<1x8xf32> to vector<8x8xf32>
    %501 = vector.broadcast %499 : vector<8x1xf32> to vector<8x8xf32>
    %502 = arith.subf %500, %501 : vector<8x8xf32>
    %c5_68 = arith.constant 5 : index
    %503 = memref.load %arg4[%c5_68] : memref<33xf32, #tpu.memory_space<smem>>
    %cst_69 = arith.constant 0.000000e+00 : f32
    %504 = vector.broadcast %cst_69 : f32 to vector<8x8xf32>
    %505 = arith.maximumf %502, %504 : vector<8x8xf32>
    %506 = vector.broadcast %503 : f32 to vector<8x8xf32>
    %507 = arith.mulf %506, %505 : vector<8x8xf32>
    %508 = arith.addf %497, %507 : vector<8x8xf32>
    %509 = vector.extract_strided_slice %441 {offsets = [6, 0], sizes = [1, 8], strides = [1, 1]} : vector<32x8xf32> to vector<1x8xf32>
    %510 = vector.extract_strided_slice %437 {offsets = [0, 6], sizes = [8, 1], strides = [1, 1]} : vector<8x32xf32> to vector<8x1xf32>
    %511 = vector.broadcast %509 : vector<1x8xf32> to vector<8x8xf32>
    %512 = vector.broadcast %510 : vector<8x1xf32> to vector<8x8xf32>
    %513 = arith.subf %511, %512 : vector<8x8xf32>
    %c6_70 = arith.constant 6 : index
    %514 = memref.load %arg4[%c6_70] : memref<33xf32, #tpu.memory_space<smem>>
    %cst_71 = arith.constant 0.000000e+00 : f32
    %515 = vector.broadcast %cst_71 : f32 to vector<8x8xf32>
    %516 = arith.maximumf %513, %515 : vector<8x8xf32>
    %517 = vector.broadcast %514 : f32 to vector<8x8xf32>
    %518 = arith.mulf %517, %516 : vector<8x8xf32>
    %519 = arith.addf %508, %518 : vector<8x8xf32>
    %520 = vector.extract_strided_slice %441 {offsets = [7, 0], sizes = [1, 8], strides = [1, 1]} : vector<32x8xf32> to vector<1x8xf32>
    %521 = vector.extract_strided_slice %437 {offsets = [0, 7], sizes = [8, 1], strides = [1, 1]} : vector<8x32xf32> to vector<8x1xf32>
    %522 = vector.broadcast %520 : vector<1x8xf32> to vector<8x8xf32>
    %523 = vector.broadcast %521 : vector<8x1xf32> to vector<8x8xf32>
    %524 = arith.subf %522, %523 : vector<8x8xf32>
    %c7_72 = arith.constant 7 : index
    %525 = memref.load %arg4[%c7_72] : memref<33xf32, #tpu.memory_space<smem>>
    %cst_73 = arith.constant 0.000000e+00 : f32
    %526 = vector.broadcast %cst_73 : f32 to vector<8x8xf32>
    %527 = arith.maximumf %524, %526 : vector<8x8xf32>
    %528 = vector.broadcast %525 : f32 to vector<8x8xf32>
    %529 = arith.mulf %528, %527 : vector<8x8xf32>
    %530 = arith.addf %519, %529 : vector<8x8xf32>
    %531 = vector.extract_strided_slice %441 {offsets = [8, 0], sizes = [1, 8], strides = [1, 1]} : vector<32x8xf32> to vector<1x8xf32>
    %532 = vector.extract_strided_slice %437 {offsets = [0, 8], sizes = [8, 1], strides = [1, 1]} : vector<8x32xf32> to vector<8x1xf32>
    %533 = vector.broadcast %531 : vector<1x8xf32> to vector<8x8xf32>
    %534 = vector.broadcast %532 : vector<8x1xf32> to vector<8x8xf32>
    %535 = arith.subf %533, %534 : vector<8x8xf32>
    %c8_74 = arith.constant 8 : index
    %536 = memref.load %arg4[%c8_74] : memref<33xf32, #tpu.memory_space<smem>>
    %cst_75 = arith.constant 0.000000e+00 : f32
    %537 = vector.broadcast %cst_75 : f32 to vector<8x8xf32>
    %538 = arith.maximumf %535, %537 : vector<8x8xf32>
    %539 = vector.broadcast %536 : f32 to vector<8x8xf32>
    %540 = arith.mulf %539, %538 : vector<8x8xf32>
    %541 = arith.addf %530, %540 : vector<8x8xf32>
    %542 = vector.extract_strided_slice %441 {offsets = [9, 0], sizes = [1, 8], strides = [1, 1]} : vector<32x8xf32> to vector<1x8xf32>
    %543 = vector.extract_strided_slice %437 {offsets = [0, 9], sizes = [8, 1], strides = [1, 1]} : vector<8x32xf32> to vector<8x1xf32>
    %544 = vector.broadcast %542 : vector<1x8xf32> to vector<8x8xf32>
    %545 = vector.broadcast %543 : vector<8x1xf32> to vector<8x8xf32>
    %546 = arith.subf %544, %545 : vector<8x8xf32>
    %c9_76 = arith.constant 9 : index
    %547 = memref.load %arg4[%c9_76] : memref<33xf32, #tpu.memory_space<smem>>
    %cst_77 = arith.constant 0.000000e+00 : f32
    %548 = vector.broadcast %cst_77 : f32 to vector<8x8xf32>
    %549 = arith.maximumf %546, %548 : vector<8x8xf32>
    %550 = vector.broadcast %547 : f32 to vector<8x8xf32>
    %551 = arith.mulf %550, %549 : vector<8x8xf32>
    %552 = arith.addf %541, %551 : vector<8x8xf32>
    %553 = vector.extract_strided_slice %441 {offsets = [10, 0], sizes = [1, 8], strides = [1, 1]} : vector<32x8xf32> to vector<1x8xf32>
    %554 = vector.extract_strided_slice %437 {offsets = [0, 10], sizes = [8, 1], strides = [1, 1]} : vector<8x32xf32> to vector<8x1xf32>
    %555 = vector.broadcast %553 : vector<1x8xf32> to vector<8x8xf32>
    %556 = vector.broadcast %554 : vector<8x1xf32> to vector<8x8xf32>
    %557 = arith.subf %555, %556 : vector<8x8xf32>
    %c10_78 = arith.constant 10 : index
    %558 = memref.load %arg4[%c10_78] : memref<33xf32, #tpu.memory_space<smem>>
    %cst_79 = arith.constant 0.000000e+00 : f32
    %559 = vector.broadcast %cst_79 : f32 to vector<8x8xf32>
    %560 = arith.maximumf %557, %559 : vector<8x8xf32>
    %561 = vector.broadcast %558 : f32 to vector<8x8xf32>
    %562 = arith.mulf %561, %560 : vector<8x8xf32>
    %563 = arith.addf %552, %562 : vector<8x8xf32>
    %564 = vector.extract_strided_slice %441 {offsets = [11, 0], sizes = [1, 8], strides = [1, 1]} : vector<32x8xf32> to vector<1x8xf32>
    %565 = vector.extract_strided_slice %437 {offsets = [0, 11], sizes = [8, 1], strides = [1, 1]} : vector<8x32xf32> to vector<8x1xf32>
    %566 = vector.broadcast %564 : vector<1x8xf32> to vector<8x8xf32>
    %567 = vector.broadcast %565 : vector<8x1xf32> to vector<8x8xf32>
    %568 = arith.subf %566, %567 : vector<8x8xf32>
    %c11_80 = arith.constant 11 : index
    %569 = memref.load %arg4[%c11_80] : memref<33xf32, #tpu.memory_space<smem>>
    %cst_81 = arith.constant 0.000000e+00 : f32
    %570 = vector.broadcast %cst_81 : f32 to vector<8x8xf32>
    %571 = arith.maximumf %568, %570 : vector<8x8xf32>
    %572 = vector.broadcast %569 : f32 to vector<8x8xf32>
    %573 = arith.mulf %572, %571 : vector<8x8xf32>
    %574 = arith.addf %563, %573 : vector<8x8xf32>
    %575 = vector.extract_strided_slice %441 {offsets = [12, 0], sizes = [1, 8], strides = [1, 1]} : vector<32x8xf32> to vector<1x8xf32>
    %576 = vector.extract_strided_slice %437 {offsets = [0, 12], sizes = [8, 1], strides = [1, 1]} : vector<8x32xf32> to vector<8x1xf32>
    %577 = vector.broadcast %575 : vector<1x8xf32> to vector<8x8xf32>
    %578 = vector.broadcast %576 : vector<8x1xf32> to vector<8x8xf32>
    %579 = arith.subf %577, %578 : vector<8x8xf32>
    %c12_82 = arith.constant 12 : index
    %580 = memref.load %arg4[%c12_82] : memref<33xf32, #tpu.memory_space<smem>>
    %cst_83 = arith.constant 0.000000e+00 : f32
    %581 = vector.broadcast %cst_83 : f32 to vector<8x8xf32>
    %582 = arith.maximumf %579, %581 : vector<8x8xf32>
    %583 = vector.broadcast %580 : f32 to vector<8x8xf32>
    %584 = arith.mulf %583, %582 : vector<8x8xf32>
    %585 = arith.addf %574, %584 : vector<8x8xf32>
    %586 = vector.extract_strided_slice %441 {offsets = [13, 0], sizes = [1, 8], strides = [1, 1]} : vector<32x8xf32> to vector<1x8xf32>
    %587 = vector.extract_strided_slice %437 {offsets = [0, 13], sizes = [8, 1], strides = [1, 1]} : vector<8x32xf32> to vector<8x1xf32>
    %588 = vector.broadcast %586 : vector<1x8xf32> to vector<8x8xf32>
    %589 = vector.broadcast %587 : vector<8x1xf32> to vector<8x8xf32>
    %590 = arith.subf %588, %589 : vector<8x8xf32>
    %c13_84 = arith.constant 13 : index
    %591 = memref.load %arg4[%c13_84] : memref<33xf32, #tpu.memory_space<smem>>
    %cst_85 = arith.constant 0.000000e+00 : f32
    %592 = vector.broadcast %cst_85 : f32 to vector<8x8xf32>
    %593 = arith.maximumf %590, %592 : vector<8x8xf32>
    %594 = vector.broadcast %591 : f32 to vector<8x8xf32>
    %595 = arith.mulf %594, %593 : vector<8x8xf32>
    %596 = arith.addf %585, %595 : vector<8x8xf32>
    %597 = vector.extract_strided_slice %441 {offsets = [14, 0], sizes = [1, 8], strides = [1, 1]} : vector<32x8xf32> to vector<1x8xf32>
    %598 = vector.extract_strided_slice %437 {offsets = [0, 14], sizes = [8, 1], strides = [1, 1]} : vector<8x32xf32> to vector<8x1xf32>
    %599 = vector.broadcast %597 : vector<1x8xf32> to vector<8x8xf32>
    %600 = vector.broadcast %598 : vector<8x1xf32> to vector<8x8xf32>
    %601 = arith.subf %599, %600 : vector<8x8xf32>
    %c14_86 = arith.constant 14 : index
    %602 = memref.load %arg4[%c14_86] : memref<33xf32, #tpu.memory_space<smem>>
    %cst_87 = arith.constant 0.000000e+00 : f32
    %603 = vector.broadcast %cst_87 : f32 to vector<8x8xf32>
    %604 = arith.maximumf %601, %603 : vector<8x8xf32>
    %605 = vector.broadcast %602 : f32 to vector<8x8xf32>
    %606 = arith.mulf %605, %604 : vector<8x8xf32>
    %607 = arith.addf %596, %606 : vector<8x8xf32>
    %608 = vector.extract_strided_slice %441 {offsets = [15, 0], sizes = [1, 8], strides = [1, 1]} : vector<32x8xf32> to vector<1x8xf32>
    %609 = vector.extract_strided_slice %437 {offsets = [0, 15], sizes = [8, 1], strides = [1, 1]} : vector<8x32xf32> to vector<8x1xf32>
    %610 = vector.broadcast %608 : vector<1x8xf32> to vector<8x8xf32>
    %611 = vector.broadcast %609 : vector<8x1xf32> to vector<8x8xf32>
    %612 = arith.subf %610, %611 : vector<8x8xf32>
    %c15_88 = arith.constant 15 : index
    %613 = memref.load %arg4[%c15_88] : memref<33xf32, #tpu.memory_space<smem>>
    %cst_89 = arith.constant 0.000000e+00 : f32
    %614 = vector.broadcast %cst_89 : f32 to vector<8x8xf32>
    %615 = arith.maximumf %612, %614 : vector<8x8xf32>
    %616 = vector.broadcast %613 : f32 to vector<8x8xf32>
    %617 = arith.mulf %616, %615 : vector<8x8xf32>
    %618 = arith.addf %607, %617 : vector<8x8xf32>
    %619 = vector.extract_strided_slice %441 {offsets = [16, 0], sizes = [1, 8], strides = [1, 1]} : vector<32x8xf32> to vector<1x8xf32>
    %620 = vector.extract_strided_slice %437 {offsets = [0, 16], sizes = [8, 1], strides = [1, 1]} : vector<8x32xf32> to vector<8x1xf32>
    %621 = vector.broadcast %619 : vector<1x8xf32> to vector<8x8xf32>
    %622 = vector.broadcast %620 : vector<8x1xf32> to vector<8x8xf32>
    %623 = arith.subf %621, %622 : vector<8x8xf32>
    %c16_90 = arith.constant 16 : index
    %624 = memref.load %arg4[%c16_90] : memref<33xf32, #tpu.memory_space<smem>>
    %cst_91 = arith.constant 0.000000e+00 : f32
    %625 = vector.broadcast %cst_91 : f32 to vector<8x8xf32>
    %626 = arith.maximumf %623, %625 : vector<8x8xf32>
    %627 = vector.broadcast %624 : f32 to vector<8x8xf32>
    %628 = arith.mulf %627, %626 : vector<8x8xf32>
    %629 = arith.addf %618, %628 : vector<8x8xf32>
    %630 = vector.extract_strided_slice %441 {offsets = [17, 0], sizes = [1, 8], strides = [1, 1]} : vector<32x8xf32> to vector<1x8xf32>
    %631 = vector.extract_strided_slice %437 {offsets = [0, 17], sizes = [8, 1], strides = [1, 1]} : vector<8x32xf32> to vector<8x1xf32>
    %632 = vector.broadcast %630 : vector<1x8xf32> to vector<8x8xf32>
    %633 = vector.broadcast %631 : vector<8x1xf32> to vector<8x8xf32>
    %634 = arith.subf %632, %633 : vector<8x8xf32>
    %c17_92 = arith.constant 17 : index
    %635 = memref.load %arg4[%c17_92] : memref<33xf32, #tpu.memory_space<smem>>
    %cst_93 = arith.constant 0.000000e+00 : f32
    %636 = vector.broadcast %cst_93 : f32 to vector<8x8xf32>
    %637 = arith.maximumf %634, %636 : vector<8x8xf32>
    %638 = vector.broadcast %635 : f32 to vector<8x8xf32>
    %639 = arith.mulf %638, %637 : vector<8x8xf32>
    %640 = arith.addf %629, %639 : vector<8x8xf32>
    %641 = vector.extract_strided_slice %441 {offsets = [18, 0], sizes = [1, 8], strides = [1, 1]} : vector<32x8xf32> to vector<1x8xf32>
    %642 = vector.extract_strided_slice %437 {offsets = [0, 18], sizes = [8, 1], strides = [1, 1]} : vector<8x32xf32> to vector<8x1xf32>
    %643 = vector.broadcast %641 : vector<1x8xf32> to vector<8x8xf32>
    %644 = vector.broadcast %642 : vector<8x1xf32> to vector<8x8xf32>
    %645 = arith.subf %643, %644 : vector<8x8xf32>
    %c18_94 = arith.constant 18 : index
    %646 = memref.load %arg4[%c18_94] : memref<33xf32, #tpu.memory_space<smem>>
    %cst_95 = arith.constant 0.000000e+00 : f32
    %647 = vector.broadcast %cst_95 : f32 to vector<8x8xf32>
    %648 = arith.maximumf %645, %647 : vector<8x8xf32>
    %649 = vector.broadcast %646 : f32 to vector<8x8xf32>
    %650 = arith.mulf %649, %648 : vector<8x8xf32>
    %651 = arith.addf %640, %650 : vector<8x8xf32>
    %652 = vector.extract_strided_slice %441 {offsets = [19, 0], sizes = [1, 8], strides = [1, 1]} : vector<32x8xf32> to vector<1x8xf32>
    %653 = vector.extract_strided_slice %437 {offsets = [0, 19], sizes = [8, 1], strides = [1, 1]} : vector<8x32xf32> to vector<8x1xf32>
    %654 = vector.broadcast %652 : vector<1x8xf32> to vector<8x8xf32>
    %655 = vector.broadcast %653 : vector<8x1xf32> to vector<8x8xf32>
    %656 = arith.subf %654, %655 : vector<8x8xf32>
    %c19_96 = arith.constant 19 : index
    %657 = memref.load %arg4[%c19_96] : memref<33xf32, #tpu.memory_space<smem>>
    %cst_97 = arith.constant 0.000000e+00 : f32
    %658 = vector.broadcast %cst_97 : f32 to vector<8x8xf32>
    %659 = arith.maximumf %656, %658 : vector<8x8xf32>
    %660 = vector.broadcast %657 : f32 to vector<8x8xf32>
    %661 = arith.mulf %660, %659 : vector<8x8xf32>
    %662 = arith.addf %651, %661 : vector<8x8xf32>
    %663 = vector.extract_strided_slice %441 {offsets = [20, 0], sizes = [1, 8], strides = [1, 1]} : vector<32x8xf32> to vector<1x8xf32>
    %664 = vector.extract_strided_slice %437 {offsets = [0, 20], sizes = [8, 1], strides = [1, 1]} : vector<8x32xf32> to vector<8x1xf32>
    %665 = vector.broadcast %663 : vector<1x8xf32> to vector<8x8xf32>
    %666 = vector.broadcast %664 : vector<8x1xf32> to vector<8x8xf32>
    %667 = arith.subf %665, %666 : vector<8x8xf32>
    %c20_98 = arith.constant 20 : index
    %668 = memref.load %arg4[%c20_98] : memref<33xf32, #tpu.memory_space<smem>>
    %cst_99 = arith.constant 0.000000e+00 : f32
    %669 = vector.broadcast %cst_99 : f32 to vector<8x8xf32>
    %670 = arith.maximumf %667, %669 : vector<8x8xf32>
    %671 = vector.broadcast %668 : f32 to vector<8x8xf32>
    %672 = arith.mulf %671, %670 : vector<8x8xf32>
    %673 = arith.addf %662, %672 : vector<8x8xf32>
    %674 = vector.extract_strided_slice %441 {offsets = [21, 0], sizes = [1, 8], strides = [1, 1]} : vector<32x8xf32> to vector<1x8xf32>
    %675 = vector.extract_strided_slice %437 {offsets = [0, 21], sizes = [8, 1], strides = [1, 1]} : vector<8x32xf32> to vector<8x1xf32>
    %676 = vector.broadcast %674 : vector<1x8xf32> to vector<8x8xf32>
    %677 = vector.broadcast %675 : vector<8x1xf32> to vector<8x8xf32>
    %678 = arith.subf %676, %677 : vector<8x8xf32>
    %c21_100 = arith.constant 21 : index
    %679 = memref.load %arg4[%c21_100] : memref<33xf32, #tpu.memory_space<smem>>
    %cst_101 = arith.constant 0.000000e+00 : f32
    %680 = vector.broadcast %cst_101 : f32 to vector<8x8xf32>
    %681 = arith.maximumf %678, %680 : vector<8x8xf32>
    %682 = vector.broadcast %679 : f32 to vector<8x8xf32>
    %683 = arith.mulf %682, %681 : vector<8x8xf32>
    %684 = arith.addf %673, %683 : vector<8x8xf32>
    %685 = vector.extract_strided_slice %441 {offsets = [22, 0], sizes = [1, 8], strides = [1, 1]} : vector<32x8xf32> to vector<1x8xf32>
    %686 = vector.extract_strided_slice %437 {offsets = [0, 22], sizes = [8, 1], strides = [1, 1]} : vector<8x32xf32> to vector<8x1xf32>
    %687 = vector.broadcast %685 : vector<1x8xf32> to vector<8x8xf32>
    %688 = vector.broadcast %686 : vector<8x1xf32> to vector<8x8xf32>
    %689 = arith.subf %687, %688 : vector<8x8xf32>
    %c22_102 = arith.constant 22 : index
    %690 = memref.load %arg4[%c22_102] : memref<33xf32, #tpu.memory_space<smem>>
    %cst_103 = arith.constant 0.000000e+00 : f32
    %691 = vector.broadcast %cst_103 : f32 to vector<8x8xf32>
    %692 = arith.maximumf %689, %691 : vector<8x8xf32>
    %693 = vector.broadcast %690 : f32 to vector<8x8xf32>
    %694 = arith.mulf %693, %692 : vector<8x8xf32>
    %695 = arith.addf %684, %694 : vector<8x8xf32>
    %696 = vector.extract_strided_slice %441 {offsets = [23, 0], sizes = [1, 8], strides = [1, 1]} : vector<32x8xf32> to vector<1x8xf32>
    %697 = vector.extract_strided_slice %437 {offsets = [0, 23], sizes = [8, 1], strides = [1, 1]} : vector<8x32xf32> to vector<8x1xf32>
    %698 = vector.broadcast %696 : vector<1x8xf32> to vector<8x8xf32>
    %699 = vector.broadcast %697 : vector<8x1xf32> to vector<8x8xf32>
    %700 = arith.subf %698, %699 : vector<8x8xf32>
    %c23_104 = arith.constant 23 : index
    %701 = memref.load %arg4[%c23_104] : memref<33xf32, #tpu.memory_space<smem>>
    %cst_105 = arith.constant 0.000000e+00 : f32
    %702 = vector.broadcast %cst_105 : f32 to vector<8x8xf32>
    %703 = arith.maximumf %700, %702 : vector<8x8xf32>
    %704 = vector.broadcast %701 : f32 to vector<8x8xf32>
    %705 = arith.mulf %704, %703 : vector<8x8xf32>
    %706 = arith.addf %695, %705 : vector<8x8xf32>
    %707 = vector.extract_strided_slice %441 {offsets = [24, 0], sizes = [1, 8], strides = [1, 1]} : vector<32x8xf32> to vector<1x8xf32>
    %708 = vector.extract_strided_slice %437 {offsets = [0, 24], sizes = [8, 1], strides = [1, 1]} : vector<8x32xf32> to vector<8x1xf32>
    %709 = vector.broadcast %707 : vector<1x8xf32> to vector<8x8xf32>
    %710 = vector.broadcast %708 : vector<8x1xf32> to vector<8x8xf32>
    %711 = arith.subf %709, %710 : vector<8x8xf32>
    %c24_106 = arith.constant 24 : index
    %712 = memref.load %arg4[%c24_106] : memref<33xf32, #tpu.memory_space<smem>>
    %cst_107 = arith.constant 0.000000e+00 : f32
    %713 = vector.broadcast %cst_107 : f32 to vector<8x8xf32>
    %714 = arith.maximumf %711, %713 : vector<8x8xf32>
    %715 = vector.broadcast %712 : f32 to vector<8x8xf32>
    %716 = arith.mulf %715, %714 : vector<8x8xf32>
    %717 = arith.addf %706, %716 : vector<8x8xf32>
    %718 = vector.extract_strided_slice %441 {offsets = [25, 0], sizes = [1, 8], strides = [1, 1]} : vector<32x8xf32> to vector<1x8xf32>
    %719 = vector.extract_strided_slice %437 {offsets = [0, 25], sizes = [8, 1], strides = [1, 1]} : vector<8x32xf32> to vector<8x1xf32>
    %720 = vector.broadcast %718 : vector<1x8xf32> to vector<8x8xf32>
    %721 = vector.broadcast %719 : vector<8x1xf32> to vector<8x8xf32>
    %722 = arith.subf %720, %721 : vector<8x8xf32>
    %c25_108 = arith.constant 25 : index
    %723 = memref.load %arg4[%c25_108] : memref<33xf32, #tpu.memory_space<smem>>
    %cst_109 = arith.constant 0.000000e+00 : f32
    %724 = vector.broadcast %cst_109 : f32 to vector<8x8xf32>
    %725 = arith.maximumf %722, %724 : vector<8x8xf32>
    %726 = vector.broadcast %723 : f32 to vector<8x8xf32>
    %727 = arith.mulf %726, %725 : vector<8x8xf32>
    %728 = arith.addf %717, %727 : vector<8x8xf32>
    %729 = vector.extract_strided_slice %441 {offsets = [26, 0], sizes = [1, 8], strides = [1, 1]} : vector<32x8xf32> to vector<1x8xf32>
    %730 = vector.extract_strided_slice %437 {offsets = [0, 26], sizes = [8, 1], strides = [1, 1]} : vector<8x32xf32> to vector<8x1xf32>
    %731 = vector.broadcast %729 : vector<1x8xf32> to vector<8x8xf32>
    %732 = vector.broadcast %730 : vector<8x1xf32> to vector<8x8xf32>
    %733 = arith.subf %731, %732 : vector<8x8xf32>
    %c26_110 = arith.constant 26 : index
    %734 = memref.load %arg4[%c26_110] : memref<33xf32, #tpu.memory_space<smem>>
    %cst_111 = arith.constant 0.000000e+00 : f32
    %735 = vector.broadcast %cst_111 : f32 to vector<8x8xf32>
    %736 = arith.maximumf %733, %735 : vector<8x8xf32>
    %737 = vector.broadcast %734 : f32 to vector<8x8xf32>
    %738 = arith.mulf %737, %736 : vector<8x8xf32>
    %739 = arith.addf %728, %738 : vector<8x8xf32>
    %740 = vector.extract_strided_slice %441 {offsets = [27, 0], sizes = [1, 8], strides = [1, 1]} : vector<32x8xf32> to vector<1x8xf32>
    %741 = vector.extract_strided_slice %437 {offsets = [0, 27], sizes = [8, 1], strides = [1, 1]} : vector<8x32xf32> to vector<8x1xf32>
    %742 = vector.broadcast %740 : vector<1x8xf32> to vector<8x8xf32>
    %743 = vector.broadcast %741 : vector<8x1xf32> to vector<8x8xf32>
    %744 = arith.subf %742, %743 : vector<8x8xf32>
    %c27_112 = arith.constant 27 : index
    %745 = memref.load %arg4[%c27_112] : memref<33xf32, #tpu.memory_space<smem>>
    %cst_113 = arith.constant 0.000000e+00 : f32
    %746 = vector.broadcast %cst_113 : f32 to vector<8x8xf32>
    %747 = arith.maximumf %744, %746 : vector<8x8xf32>
    %748 = vector.broadcast %745 : f32 to vector<8x8xf32>
    %749 = arith.mulf %748, %747 : vector<8x8xf32>
    %750 = arith.addf %739, %749 : vector<8x8xf32>
    %751 = vector.extract_strided_slice %441 {offsets = [28, 0], sizes = [1, 8], strides = [1, 1]} : vector<32x8xf32> to vector<1x8xf32>
    %752 = vector.extract_strided_slice %437 {offsets = [0, 28], sizes = [8, 1], strides = [1, 1]} : vector<8x32xf32> to vector<8x1xf32>
    %753 = vector.broadcast %751 : vector<1x8xf32> to vector<8x8xf32>
    %754 = vector.broadcast %752 : vector<8x1xf32> to vector<8x8xf32>
    %755 = arith.subf %753, %754 : vector<8x8xf32>
    %c28_114 = arith.constant 28 : index
    %756 = memref.load %arg4[%c28_114] : memref<33xf32, #tpu.memory_space<smem>>
    %cst_115 = arith.constant 0.000000e+00 : f32
    %757 = vector.broadcast %cst_115 : f32 to vector<8x8xf32>
    %758 = arith.maximumf %755, %757 : vector<8x8xf32>
    %759 = vector.broadcast %756 : f32 to vector<8x8xf32>
    %760 = arith.mulf %759, %758 : vector<8x8xf32>
    %761 = arith.addf %750, %760 : vector<8x8xf32>
    %762 = vector.extract_strided_slice %441 {offsets = [29, 0], sizes = [1, 8], strides = [1, 1]} : vector<32x8xf32> to vector<1x8xf32>
    %763 = vector.extract_strided_slice %437 {offsets = [0, 29], sizes = [8, 1], strides = [1, 1]} : vector<8x32xf32> to vector<8x1xf32>
    %764 = vector.broadcast %762 : vector<1x8xf32> to vector<8x8xf32>
    %765 = vector.broadcast %763 : vector<8x1xf32> to vector<8x8xf32>
    %766 = arith.subf %764, %765 : vector<8x8xf32>
    %c29_116 = arith.constant 29 : index
    %767 = memref.load %arg4[%c29_116] : memref<33xf32, #tpu.memory_space<smem>>
    %cst_117 = arith.constant 0.000000e+00 : f32
    %768 = vector.broadcast %cst_117 : f32 to vector<8x8xf32>
    %769 = arith.maximumf %766, %768 : vector<8x8xf32>
    %770 = vector.broadcast %767 : f32 to vector<8x8xf32>
    %771 = arith.mulf %770, %769 : vector<8x8xf32>
    %772 = arith.addf %761, %771 : vector<8x8xf32>
    %773 = vector.extract_strided_slice %441 {offsets = [30, 0], sizes = [1, 8], strides = [1, 1]} : vector<32x8xf32> to vector<1x8xf32>
    %774 = vector.extract_strided_slice %437 {offsets = [0, 30], sizes = [8, 1], strides = [1, 1]} : vector<8x32xf32> to vector<8x1xf32>
    %775 = vector.broadcast %773 : vector<1x8xf32> to vector<8x8xf32>
    %776 = vector.broadcast %774 : vector<8x1xf32> to vector<8x8xf32>
    %777 = arith.subf %775, %776 : vector<8x8xf32>
    %c30_118 = arith.constant 30 : index
    %778 = memref.load %arg4[%c30_118] : memref<33xf32, #tpu.memory_space<smem>>
    %cst_119 = arith.constant 0.000000e+00 : f32
    %779 = vector.broadcast %cst_119 : f32 to vector<8x8xf32>
    %780 = arith.maximumf %777, %779 : vector<8x8xf32>
    %781 = vector.broadcast %778 : f32 to vector<8x8xf32>
    %782 = arith.mulf %781, %780 : vector<8x8xf32>
    %783 = arith.addf %772, %782 : vector<8x8xf32>
    %784 = vector.extract_strided_slice %441 {offsets = [31, 0], sizes = [1, 8], strides = [1, 1]} : vector<32x8xf32> to vector<1x8xf32>
    %785 = vector.extract_strided_slice %437 {offsets = [0, 31], sizes = [8, 1], strides = [1, 1]} : vector<8x32xf32> to vector<8x1xf32>
    %786 = vector.broadcast %784 : vector<1x8xf32> to vector<8x8xf32>
    %787 = vector.broadcast %785 : vector<8x1xf32> to vector<8x8xf32>
    %788 = arith.subf %786, %787 : vector<8x8xf32>
    %c31_120 = arith.constant 31 : index
    %789 = memref.load %arg4[%c31_120] : memref<33xf32, #tpu.memory_space<smem>>
    %cst_121 = arith.constant 0.000000e+00 : f32
    %790 = vector.broadcast %cst_121 : f32 to vector<8x8xf32>
    %791 = arith.maximumf %788, %790 : vector<8x8xf32>
    %792 = vector.broadcast %789 : f32 to vector<8x8xf32>
    %793 = arith.mulf %792, %791 : vector<8x8xf32>
    %794 = arith.addf %783, %793 : vector<8x8xf32>
    %795 = arith.negf %794 : vector<8x8xf32>
    %796 = math.exp %795 : vector<8x8xf32>
    %cst_122 = arith.constant 1.000000e+00 : f32
    %797 = vector.broadcast %cst_122 : f32 to vector<8x8xf32>
    %798 = arith.addf %797, %796 : vector<8x8xf32>
    %799 = arith.divf %797, %798 : vector<8x8xf32>
    %800 = arith.truncf %799 : vector<8x8xf32> to vector<8x8xbf16>
    %801 = vector.extract_strided_slice %434 {offsets = [0, 0], sizes = [8, 128], strides = [1, 1]} : vector<16x128xf32> to vector<8x128xf32>
    %802 = arith.truncf %801 : vector<8x128xf32> to vector<8x128xbf16>
    %803 = vector.extract_strided_slice %434 {offsets = [8, 0], sizes = [8, 128], strides = [1, 1]} : vector<16x128xf32> to vector<8x128xf32>
    %804 = arith.truncf %803 : vector<8x128xf32> to vector<8x128xbf16>
    %cst_123 = arith.constant dense<0.000000e+00> : vector<8xf32>
    %805 = vector.multi_reduction <add>, %799, %cst_123 [1] : vector<8x8xf32> to vector<8xf32>
    %806 = vector.shape_cast %805 : vector<8xf32> to vector<8x1xf32>
    %cst_124 = arith.constant dense<0.000000e+00> : vector<8x128xf32>
    %807 = tpu.matmul %800, %804, %cst_124 {dimension_numbers = #tpu.dot_dimension_numbers<[1], [0], [0], [1], [0, 0, 1, 1], [], []>} : vector<8x8xbf16>, vector<8x128xbf16>, vector<8x128xf32> -> vector<8x128xf32>
    %808 = tpu.concatenate %802, %6 in 1 : vector<8x128xbf16>, vector<8x1xbf16> -> vector<8x129xbf16>
    %cst_125 = arith.constant dense<0.000000e+00> : vector<8x129xf32>
    %809 = tpu.matmul %800, %808, %cst_125 {dimension_numbers = #tpu.dot_dimension_numbers<[0], [0], [1], [1], [0, 1, 1, 1], [], []>} : vector<8x8xbf16>, vector<8x129xbf16>, vector<8x129xf32> -> vector<8x129xf32>
    %810 = vector.extract_strided_slice %809 {offsets = [0, 0], sizes = [8, 128], strides = [1, 1]} : vector<8x129xf32> to vector<8x128xf32>
    %811 = vector.extract_strided_slice %809 {offsets = [0, 128], sizes = [8, 1], strides = [1, 1]} : vector<8x129xf32> to vector<8x1xf32>
    %812 = vector.extract_strided_slice %435 {offsets = [0, 0], sizes = [8, 128], strides = [1, 1]} : vector<16x128xf32> to vector<8x128xf32>
    %813 = arith.addf %812, %807 : vector<8x128xf32>
    %814 = vector.extract_strided_slice %434 {offsets = [0, 0], sizes = [8, 128], strides = [1, 1]} : vector<16x128xf32> to vector<8x128xf32>
    %815 = vector.broadcast %806 : vector<8x1xf32> to vector<8x128xf32>
    %816 = arith.mulf %815, %814 : vector<8x128xf32>
    %817 = arith.subf %813, %816 : vector<8x128xf32>
    %818 = vector.extract_strided_slice %435 {offsets = [8, 0], sizes = [8, 128], strides = [1, 1]} : vector<16x128xf32> to vector<8x128xf32>
    %819 = arith.addf %818, %810 : vector<8x128xf32>
    %820 = vector.extract_strided_slice %434 {offsets = [8, 0], sizes = [8, 128], strides = [1, 1]} : vector<16x128xf32> to vector<8x128xf32>
    %821 = vector.broadcast %811 : vector<8x1xf32> to vector<8x128xf32>
    %822 = arith.mulf %821, %820 : vector<8x128xf32>
    %823 = arith.subf %819, %822 : vector<8x128xf32>
    %824 = tpu.concatenate %817, %823 in 0 : vector<8x128xf32>, vector<8x128xf32> -> vector<16x128xf32>
    %825 = arith.truncf %824 : vector<16x128xf32> to vector<16x128xbf16>
    %c3_126 = arith.constant 3 : index
    %c0_127 = arith.constant 0 : index
    %c0_128 = arith.constant 0 : index
    %826 = vector.load %arg2[%c3_126, %c0_127, %c0_128] : memref<4x128x288xbf16, #tpu.memory_space<vmem>>, vector<1x128x288xbf16>
    %827 = vector.shape_cast %826 : vector<1x128x288xbf16> to vector<128x288xbf16>
    %cst_129 = arith.constant dense<0.000000e+00> : vector<16x288xf32>
    %828 = tpu.matmul %825, %827, %cst_129 {dimension_numbers = #tpu.dot_dimension_numbers<[1], [0], [0], [1], [0, 0, 1, 1], [], []>} : vector<16x128xbf16>, vector<128x288xbf16>, vector<16x288xf32> -> vector<16x288xf32>
    %829 = vector.extract_strided_slice %828 {offsets = [0, 0], sizes = [16, 128], strides = [1, 1]} : vector<16x288xf32> to vector<16x128xf32>
    %830 = vector.extract_strided_slice %828 {offsets = [0, 128], sizes = [16, 128], strides = [1, 1]} : vector<16x288xf32> to vector<16x128xf32>
    %831 = vector.extract_strided_slice %828 {offsets = [0, 256], sizes = [16, 32], strides = [1, 1]} : vector<16x288xf32> to vector<16x32xf32>
    %832 = vector.extract_strided_slice %831 {offsets = [0, 0], sizes = [8, 32], strides = [1, 1]} : vector<16x32xf32> to vector<8x32xf32>
    %833 = vector.extract_strided_slice %831 {offsets = [8, 0], sizes = [8, 32], strides = [1, 1]} : vector<16x32xf32> to vector<8x32xf32>
    %cst_130 = arith.constant dense<0.000000e+00> : vector<32x8xf32>
    %834 = tpu.matmul %833, %5, %cst_130 {dimension_numbers = #tpu.dot_dimension_numbers<[0], [0], [1], [1], [0, 1, 1, 1], [], []>} : vector<8x32xf32>, vector<8x8xf32>, vector<32x8xf32> -> vector<32x8xf32>
    %835 = vector.broadcast %0 : vector<32x1xf32> to vector<32x8xf32>
    %836 = arith.addf %834, %835 : vector<32x8xf32>
    %837 = vector.broadcast %7 : f32 to vector<8x8xf32>
    %838 = vector.extract_strided_slice %836 {offsets = [0, 0], sizes = [1, 8], strides = [1, 1]} : vector<32x8xf32> to vector<1x8xf32>
    %839 = vector.extract_strided_slice %832 {offsets = [0, 0], sizes = [8, 1], strides = [1, 1]} : vector<8x32xf32> to vector<8x1xf32>
    %840 = vector.broadcast %838 : vector<1x8xf32> to vector<8x8xf32>
    %841 = vector.broadcast %839 : vector<8x1xf32> to vector<8x8xf32>
    %842 = arith.subf %840, %841 : vector<8x8xf32>
    %c0_131 = arith.constant 0 : index
    %843 = memref.load %arg4[%c0_131] : memref<33xf32, #tpu.memory_space<smem>>
    %cst_132 = arith.constant 0.000000e+00 : f32
    %844 = vector.broadcast %cst_132 : f32 to vector<8x8xf32>
    %845 = arith.maximumf %842, %844 : vector<8x8xf32>
    %846 = vector.broadcast %843 : f32 to vector<8x8xf32>
    %847 = arith.mulf %846, %845 : vector<8x8xf32>
    %848 = arith.addf %837, %847 : vector<8x8xf32>
    %849 = vector.extract_strided_slice %836 {offsets = [1, 0], sizes = [1, 8], strides = [1, 1]} : vector<32x8xf32> to vector<1x8xf32>
    %850 = vector.extract_strided_slice %832 {offsets = [0, 1], sizes = [8, 1], strides = [1, 1]} : vector<8x32xf32> to vector<8x1xf32>
    %851 = vector.broadcast %849 : vector<1x8xf32> to vector<8x8xf32>
    %852 = vector.broadcast %850 : vector<8x1xf32> to vector<8x8xf32>
    %853 = arith.subf %851, %852 : vector<8x8xf32>
    %c1_133 = arith.constant 1 : index
    %854 = memref.load %arg4[%c1_133] : memref<33xf32, #tpu.memory_space<smem>>
    %cst_134 = arith.constant 0.000000e+00 : f32
    %855 = vector.broadcast %cst_134 : f32 to vector<8x8xf32>
    %856 = arith.maximumf %853, %855 : vector<8x8xf32>
    %857 = vector.broadcast %854 : f32 to vector<8x8xf32>
    %858 = arith.mulf %857, %856 : vector<8x8xf32>
    %859 = arith.addf %848, %858 : vector<8x8xf32>
    %860 = vector.extract_strided_slice %836 {offsets = [2, 0], sizes = [1, 8], strides = [1, 1]} : vector<32x8xf32> to vector<1x8xf32>
    %861 = vector.extract_strided_slice %832 {offsets = [0, 2], sizes = [8, 1], strides = [1, 1]} : vector<8x32xf32> to vector<8x1xf32>
    %862 = vector.broadcast %860 : vector<1x8xf32> to vector<8x8xf32>
    %863 = vector.broadcast %861 : vector<8x1xf32> to vector<8x8xf32>
    %864 = arith.subf %862, %863 : vector<8x8xf32>
    %c2_135 = arith.constant 2 : index
    %865 = memref.load %arg4[%c2_135] : memref<33xf32, #tpu.memory_space<smem>>
    %cst_136 = arith.constant 0.000000e+00 : f32
    %866 = vector.broadcast %cst_136 : f32 to vector<8x8xf32>
    %867 = arith.maximumf %864, %866 : vector<8x8xf32>
    %868 = vector.broadcast %865 : f32 to vector<8x8xf32>
    %869 = arith.mulf %868, %867 : vector<8x8xf32>
    %870 = arith.addf %859, %869 : vector<8x8xf32>
    %871 = vector.extract_strided_slice %836 {offsets = [3, 0], sizes = [1, 8], strides = [1, 1]} : vector<32x8xf32> to vector<1x8xf32>
    %872 = vector.extract_strided_slice %832 {offsets = [0, 3], sizes = [8, 1], strides = [1, 1]} : vector<8x32xf32> to vector<8x1xf32>
    %873 = vector.broadcast %871 : vector<1x8xf32> to vector<8x8xf32>
    %874 = vector.broadcast %872 : vector<8x1xf32> to vector<8x8xf32>
    %875 = arith.subf %873, %874 : vector<8x8xf32>
    %c3_137 = arith.constant 3 : index
    %876 = memref.load %arg4[%c3_137] : memref<33xf32, #tpu.memory_space<smem>>
    %cst_138 = arith.constant 0.000000e+00 : f32
    %877 = vector.broadcast %cst_138 : f32 to vector<8x8xf32>
    %878 = arith.maximumf %875, %877 : vector<8x8xf32>
    %879 = vector.broadcast %876 : f32 to vector<8x8xf32>
    %880 = arith.mulf %879, %878 : vector<8x8xf32>
    %881 = arith.addf %870, %880 : vector<8x8xf32>
    %882 = vector.extract_strided_slice %836 {offsets = [4, 0], sizes = [1, 8], strides = [1, 1]} : vector<32x8xf32> to vector<1x8xf32>
    %883 = vector.extract_strided_slice %832 {offsets = [0, 4], sizes = [8, 1], strides = [1, 1]} : vector<8x32xf32> to vector<8x1xf32>
    %884 = vector.broadcast %882 : vector<1x8xf32> to vector<8x8xf32>
    %885 = vector.broadcast %883 : vector<8x1xf32> to vector<8x8xf32>
    %886 = arith.subf %884, %885 : vector<8x8xf32>
    %c4_139 = arith.constant 4 : index
    %887 = memref.load %arg4[%c4_139] : memref<33xf32, #tpu.memory_space<smem>>
    %cst_140 = arith.constant 0.000000e+00 : f32
    %888 = vector.broadcast %cst_140 : f32 to vector<8x8xf32>
    %889 = arith.maximumf %886, %888 : vector<8x8xf32>
    %890 = vector.broadcast %887 : f32 to vector<8x8xf32>
    %891 = arith.mulf %890, %889 : vector<8x8xf32>
    %892 = arith.addf %881, %891 : vector<8x8xf32>
    %893 = vector.extract_strided_slice %836 {offsets = [5, 0], sizes = [1, 8], strides = [1, 1]} : vector<32x8xf32> to vector<1x8xf32>
    %894 = vector.extract_strided_slice %832 {offsets = [0, 5], sizes = [8, 1], strides = [1, 1]} : vector<8x32xf32> to vector<8x1xf32>
    %895 = vector.broadcast %893 : vector<1x8xf32> to vector<8x8xf32>
    %896 = vector.broadcast %894 : vector<8x1xf32> to vector<8x8xf32>
    %897 = arith.subf %895, %896 : vector<8x8xf32>
    %c5_141 = arith.constant 5 : index
    %898 = memref.load %arg4[%c5_141] : memref<33xf32, #tpu.memory_space<smem>>
    %cst_142 = arith.constant 0.000000e+00 : f32
    %899 = vector.broadcast %cst_142 : f32 to vector<8x8xf32>
    %900 = arith.maximumf %897, %899 : vector<8x8xf32>
    %901 = vector.broadcast %898 : f32 to vector<8x8xf32>
    %902 = arith.mulf %901, %900 : vector<8x8xf32>
    %903 = arith.addf %892, %902 : vector<8x8xf32>
    %904 = vector.extract_strided_slice %836 {offsets = [6, 0], sizes = [1, 8], strides = [1, 1]} : vector<32x8xf32> to vector<1x8xf32>
    %905 = vector.extract_strided_slice %832 {offsets = [0, 6], sizes = [8, 1], strides = [1, 1]} : vector<8x32xf32> to vector<8x1xf32>
    %906 = vector.broadcast %904 : vector<1x8xf32> to vector<8x8xf32>
    %907 = vector.broadcast %905 : vector<8x1xf32> to vector<8x8xf32>
    %908 = arith.subf %906, %907 : vector<8x8xf32>
    %c6_143 = arith.constant 6 : index
    %909 = memref.load %arg4[%c6_143] : memref<33xf32, #tpu.memory_space<smem>>
    %cst_144 = arith.constant 0.000000e+00 : f32
    %910 = vector.broadcast %cst_144 : f32 to vector<8x8xf32>
    %911 = arith.maximumf %908, %910 : vector<8x8xf32>
    %912 = vector.broadcast %909 : f32 to vector<8x8xf32>
    %913 = arith.mulf %912, %911 : vector<8x8xf32>
    %914 = arith.addf %903, %913 : vector<8x8xf32>
    %915 = vector.extract_strided_slice %836 {offsets = [7, 0], sizes = [1, 8], strides = [1, 1]} : vector<32x8xf32> to vector<1x8xf32>
    %916 = vector.extract_strided_slice %832 {offsets = [0, 7], sizes = [8, 1], strides = [1, 1]} : vector<8x32xf32> to vector<8x1xf32>
    %917 = vector.broadcast %915 : vector<1x8xf32> to vector<8x8xf32>
    %918 = vector.broadcast %916 : vector<8x1xf32> to vector<8x8xf32>
    %919 = arith.subf %917, %918 : vector<8x8xf32>
    %c7_145 = arith.constant 7 : index
    %920 = memref.load %arg4[%c7_145] : memref<33xf32, #tpu.memory_space<smem>>
    %cst_146 = arith.constant 0.000000e+00 : f32
    %921 = vector.broadcast %cst_146 : f32 to vector<8x8xf32>
    %922 = arith.maximumf %919, %921 : vector<8x8xf32>
    %923 = vector.broadcast %920 : f32 to vector<8x8xf32>
    %924 = arith.mulf %923, %922 : vector<8x8xf32>
    %925 = arith.addf %914, %924 : vector<8x8xf32>
    %926 = vector.extract_strided_slice %836 {offsets = [8, 0], sizes = [1, 8], strides = [1, 1]} : vector<32x8xf32> to vector<1x8xf32>
    %927 = vector.extract_strided_slice %832 {offsets = [0, 8], sizes = [8, 1], strides = [1, 1]} : vector<8x32xf32> to vector<8x1xf32>
    %928 = vector.broadcast %926 : vector<1x8xf32> to vector<8x8xf32>
    %929 = vector.broadcast %927 : vector<8x1xf32> to vector<8x8xf32>
    %930 = arith.subf %928, %929 : vector<8x8xf32>
    %c8_147 = arith.constant 8 : index
    %931 = memref.load %arg4[%c8_147] : memref<33xf32, #tpu.memory_space<smem>>
    %cst_148 = arith.constant 0.000000e+00 : f32
    %932 = vector.broadcast %cst_148 : f32 to vector<8x8xf32>
    %933 = arith.maximumf %930, %932 : vector<8x8xf32>
    %934 = vector.broadcast %931 : f32 to vector<8x8xf32>
    %935 = arith.mulf %934, %933 : vector<8x8xf32>
    %936 = arith.addf %925, %935 : vector<8x8xf32>
    %937 = vector.extract_strided_slice %836 {offsets = [9, 0], sizes = [1, 8], strides = [1, 1]} : vector<32x8xf32> to vector<1x8xf32>
    %938 = vector.extract_strided_slice %832 {offsets = [0, 9], sizes = [8, 1], strides = [1, 1]} : vector<8x32xf32> to vector<8x1xf32>
    %939 = vector.broadcast %937 : vector<1x8xf32> to vector<8x8xf32>
    %940 = vector.broadcast %938 : vector<8x1xf32> to vector<8x8xf32>
    %941 = arith.subf %939, %940 : vector<8x8xf32>
    %c9_149 = arith.constant 9 : index
    %942 = memref.load %arg4[%c9_149] : memref<33xf32, #tpu.memory_space<smem>>
    %cst_150 = arith.constant 0.000000e+00 : f32
    %943 = vector.broadcast %cst_150 : f32 to vector<8x8xf32>
    %944 = arith.maximumf %941, %943 : vector<8x8xf32>
    %945 = vector.broadcast %942 : f32 to vector<8x8xf32>
    %946 = arith.mulf %945, %944 : vector<8x8xf32>
    %947 = arith.addf %936, %946 : vector<8x8xf32>
    %948 = vector.extract_strided_slice %836 {offsets = [10, 0], sizes = [1, 8], strides = [1, 1]} : vector<32x8xf32> to vector<1x8xf32>
    %949 = vector.extract_strided_slice %832 {offsets = [0, 10], sizes = [8, 1], strides = [1, 1]} : vector<8x32xf32> to vector<8x1xf32>
    %950 = vector.broadcast %948 : vector<1x8xf32> to vector<8x8xf32>
    %951 = vector.broadcast %949 : vector<8x1xf32> to vector<8x8xf32>
    %952 = arith.subf %950, %951 : vector<8x8xf32>
    %c10_151 = arith.constant 10 : index
    %953 = memref.load %arg4[%c10_151] : memref<33xf32, #tpu.memory_space<smem>>
    %cst_152 = arith.constant 0.000000e+00 : f32
    %954 = vector.broadcast %cst_152 : f32 to vector<8x8xf32>
    %955 = arith.maximumf %952, %954 : vector<8x8xf32>
    %956 = vector.broadcast %953 : f32 to vector<8x8xf32>
    %957 = arith.mulf %956, %955 : vector<8x8xf32>
    %958 = arith.addf %947, %957 : vector<8x8xf32>
    %959 = vector.extract_strided_slice %836 {offsets = [11, 0], sizes = [1, 8], strides = [1, 1]} : vector<32x8xf32> to vector<1x8xf32>
    %960 = vector.extract_strided_slice %832 {offsets = [0, 11], sizes = [8, 1], strides = [1, 1]} : vector<8x32xf32> to vector<8x1xf32>
    %961 = vector.broadcast %959 : vector<1x8xf32> to vector<8x8xf32>
    %962 = vector.broadcast %960 : vector<8x1xf32> to vector<8x8xf32>
    %963 = arith.subf %961, %962 : vector<8x8xf32>
    %c11_153 = arith.constant 11 : index
    %964 = memref.load %arg4[%c11_153] : memref<33xf32, #tpu.memory_space<smem>>
    %cst_154 = arith.constant 0.000000e+00 : f32
    %965 = vector.broadcast %cst_154 : f32 to vector<8x8xf32>
    %966 = arith.maximumf %963, %965 : vector<8x8xf32>
    %967 = vector.broadcast %964 : f32 to vector<8x8xf32>
    %968 = arith.mulf %967, %966 : vector<8x8xf32>
    %969 = arith.addf %958, %968 : vector<8x8xf32>
    %970 = vector.extract_strided_slice %836 {offsets = [12, 0], sizes = [1, 8], strides = [1, 1]} : vector<32x8xf32> to vector<1x8xf32>
    %971 = vector.extract_strided_slice %832 {offsets = [0, 12], sizes = [8, 1], strides = [1, 1]} : vector<8x32xf32> to vector<8x1xf32>
    %972 = vector.broadcast %970 : vector<1x8xf32> to vector<8x8xf32>
    %973 = vector.broadcast %971 : vector<8x1xf32> to vector<8x8xf32>
    %974 = arith.subf %972, %973 : vector<8x8xf32>
    %c12_155 = arith.constant 12 : index
    %975 = memref.load %arg4[%c12_155] : memref<33xf32, #tpu.memory_space<smem>>
    %cst_156 = arith.constant 0.000000e+00 : f32
    %976 = vector.broadcast %cst_156 : f32 to vector<8x8xf32>
    %977 = arith.maximumf %974, %976 : vector<8x8xf32>
    %978 = vector.broadcast %975 : f32 to vector<8x8xf32>
    %979 = arith.mulf %978, %977 : vector<8x8xf32>
    %980 = arith.addf %969, %979 : vector<8x8xf32>
    %981 = vector.extract_strided_slice %836 {offsets = [13, 0], sizes = [1, 8], strides = [1, 1]} : vector<32x8xf32> to vector<1x8xf32>
    %982 = vector.extract_strided_slice %832 {offsets = [0, 13], sizes = [8, 1], strides = [1, 1]} : vector<8x32xf32> to vector<8x1xf32>
    %983 = vector.broadcast %981 : vector<1x8xf32> to vector<8x8xf32>
    %984 = vector.broadcast %982 : vector<8x1xf32> to vector<8x8xf32>
    %985 = arith.subf %983, %984 : vector<8x8xf32>
    %c13_157 = arith.constant 13 : index
    %986 = memref.load %arg4[%c13_157] : memref<33xf32, #tpu.memory_space<smem>>
    %cst_158 = arith.constant 0.000000e+00 : f32
    %987 = vector.broadcast %cst_158 : f32 to vector<8x8xf32>
    %988 = arith.maximumf %985, %987 : vector<8x8xf32>
    %989 = vector.broadcast %986 : f32 to vector<8x8xf32>
    %990 = arith.mulf %989, %988 : vector<8x8xf32>
    %991 = arith.addf %980, %990 : vector<8x8xf32>
    %992 = vector.extract_strided_slice %836 {offsets = [14, 0], sizes = [1, 8], strides = [1, 1]} : vector<32x8xf32> to vector<1x8xf32>
    %993 = vector.extract_strided_slice %832 {offsets = [0, 14], sizes = [8, 1], strides = [1, 1]} : vector<8x32xf32> to vector<8x1xf32>
    %994 = vector.broadcast %992 : vector<1x8xf32> to vector<8x8xf32>
    %995 = vector.broadcast %993 : vector<8x1xf32> to vector<8x8xf32>
    %996 = arith.subf %994, %995 : vector<8x8xf32>
    %c14_159 = arith.constant 14 : index
    %997 = memref.load %arg4[%c14_159] : memref<33xf32, #tpu.memory_space<smem>>
    %cst_160 = arith.constant 0.000000e+00 : f32
    %998 = vector.broadcast %cst_160 : f32 to vector<8x8xf32>
    %999 = arith.maximumf %996, %998 : vector<8x8xf32>
    %1000 = vector.broadcast %997 : f32 to vector<8x8xf32>
    %1001 = arith.mulf %1000, %999 : vector<8x8xf32>
    %1002 = arith.addf %991, %1001 : vector<8x8xf32>
    %1003 = vector.extract_strided_slice %836 {offsets = [15, 0], sizes = [1, 8], strides = [1, 1]} : vector<32x8xf32> to vector<1x8xf32>
    %1004 = vector.extract_strided_slice %832 {offsets = [0, 15], sizes = [8, 1], strides = [1, 1]} : vector<8x32xf32> to vector<8x1xf32>
    %1005 = vector.broadcast %1003 : vector<1x8xf32> to vector<8x8xf32>
    %1006 = vector.broadcast %1004 : vector<8x1xf32> to vector<8x8xf32>
    %1007 = arith.subf %1005, %1006 : vector<8x8xf32>
    %c15_161 = arith.constant 15 : index
    %1008 = memref.load %arg4[%c15_161] : memref<33xf32, #tpu.memory_space<smem>>
    %cst_162 = arith.constant 0.000000e+00 : f32
    %1009 = vector.broadcast %cst_162 : f32 to vector<8x8xf32>
    %1010 = arith.maximumf %1007, %1009 : vector<8x8xf32>
    %1011 = vector.broadcast %1008 : f32 to vector<8x8xf32>
    %1012 = arith.mulf %1011, %1010 : vector<8x8xf32>
    %1013 = arith.addf %1002, %1012 : vector<8x8xf32>
    %1014 = vector.extract_strided_slice %836 {offsets = [16, 0], sizes = [1, 8], strides = [1, 1]} : vector<32x8xf32> to vector<1x8xf32>
    %1015 = vector.extract_strided_slice %832 {offsets = [0, 16], sizes = [8, 1], strides = [1, 1]} : vector<8x32xf32> to vector<8x1xf32>
    %1016 = vector.broadcast %1014 : vector<1x8xf32> to vector<8x8xf32>
    %1017 = vector.broadcast %1015 : vector<8x1xf32> to vector<8x8xf32>
    %1018 = arith.subf %1016, %1017 : vector<8x8xf32>
    %c16_163 = arith.constant 16 : index
    %1019 = memref.load %arg4[%c16_163] : memref<33xf32, #tpu.memory_space<smem>>
    %cst_164 = arith.constant 0.000000e+00 : f32
    %1020 = vector.broadcast %cst_164 : f32 to vector<8x8xf32>
    %1021 = arith.maximumf %1018, %1020 : vector<8x8xf32>
    %1022 = vector.broadcast %1019 : f32 to vector<8x8xf32>
    %1023 = arith.mulf %1022, %1021 : vector<8x8xf32>
    %1024 = arith.addf %1013, %1023 : vector<8x8xf32>
    %1025 = vector.extract_strided_slice %836 {offsets = [17, 0], sizes = [1, 8], strides = [1, 1]} : vector<32x8xf32> to vector<1x8xf32>
    %1026 = vector.extract_strided_slice %832 {offsets = [0, 17], sizes = [8, 1], strides = [1, 1]} : vector<8x32xf32> to vector<8x1xf32>
    %1027 = vector.broadcast %1025 : vector<1x8xf32> to vector<8x8xf32>
    %1028 = vector.broadcast %1026 : vector<8x1xf32> to vector<8x8xf32>
    %1029 = arith.subf %1027, %1028 : vector<8x8xf32>
    %c17_165 = arith.constant 17 : index
    %1030 = memref.load %arg4[%c17_165] : memref<33xf32, #tpu.memory_space<smem>>
    %cst_166 = arith.constant 0.000000e+00 : f32
    %1031 = vector.broadcast %cst_166 : f32 to vector<8x8xf32>
    %1032 = arith.maximumf %1029, %1031 : vector<8x8xf32>
    %1033 = vector.broadcast %1030 : f32 to vector<8x8xf32>
    %1034 = arith.mulf %1033, %1032 : vector<8x8xf32>
    %1035 = arith.addf %1024, %1034 : vector<8x8xf32>
    %1036 = vector.extract_strided_slice %836 {offsets = [18, 0], sizes = [1, 8], strides = [1, 1]} : vector<32x8xf32> to vector<1x8xf32>
    %1037 = vector.extract_strided_slice %832 {offsets = [0, 18], sizes = [8, 1], strides = [1, 1]} : vector<8x32xf32> to vector<8x1xf32>
    %1038 = vector.broadcast %1036 : vector<1x8xf32> to vector<8x8xf32>
    %1039 = vector.broadcast %1037 : vector<8x1xf32> to vector<8x8xf32>
    %1040 = arith.subf %1038, %1039 : vector<8x8xf32>
    %c18_167 = arith.constant 18 : index
    %1041 = memref.load %arg4[%c18_167] : memref<33xf32, #tpu.memory_space<smem>>
    %cst_168 = arith.constant 0.000000e+00 : f32
    %1042 = vector.broadcast %cst_168 : f32 to vector<8x8xf32>
    %1043 = arith.maximumf %1040, %1042 : vector<8x8xf32>
    %1044 = vector.broadcast %1041 : f32 to vector<8x8xf32>
    %1045 = arith.mulf %1044, %1043 : vector<8x8xf32>
    %1046 = arith.addf %1035, %1045 : vector<8x8xf32>
    %1047 = vector.extract_strided_slice %836 {offsets = [19, 0], sizes = [1, 8], strides = [1, 1]} : vector<32x8xf32> to vector<1x8xf32>
    %1048 = vector.extract_strided_slice %832 {offsets = [0, 19], sizes = [8, 1], strides = [1, 1]} : vector<8x32xf32> to vector<8x1xf32>
    %1049 = vector.broadcast %1047 : vector<1x8xf32> to vector<8x8xf32>
    %1050 = vector.broadcast %1048 : vector<8x1xf32> to vector<8x8xf32>
    %1051 = arith.subf %1049, %1050 : vector<8x8xf32>
    %c19_169 = arith.constant 19 : index
    %1052 = memref.load %arg4[%c19_169] : memref<33xf32, #tpu.memory_space<smem>>
    %cst_170 = arith.constant 0.000000e+00 : f32
    %1053 = vector.broadcast %cst_170 : f32 to vector<8x8xf32>
    %1054 = arith.maximumf %1051, %1053 : vector<8x8xf32>
    %1055 = vector.broadcast %1052 : f32 to vector<8x8xf32>
    %1056 = arith.mulf %1055, %1054 : vector<8x8xf32>
    %1057 = arith.addf %1046, %1056 : vector<8x8xf32>
    %1058 = vector.extract_strided_slice %836 {offsets = [20, 0], sizes = [1, 8], strides = [1, 1]} : vector<32x8xf32> to vector<1x8xf32>
    %1059 = vector.extract_strided_slice %832 {offsets = [0, 20], sizes = [8, 1], strides = [1, 1]} : vector<8x32xf32> to vector<8x1xf32>
    %1060 = vector.broadcast %1058 : vector<1x8xf32> to vector<8x8xf32>
    %1061 = vector.broadcast %1059 : vector<8x1xf32> to vector<8x8xf32>
    %1062 = arith.subf %1060, %1061 : vector<8x8xf32>
    %c20_171 = arith.constant 20 : index
    %1063 = memref.load %arg4[%c20_171] : memref<33xf32, #tpu.memory_space<smem>>
    %cst_172 = arith.constant 0.000000e+00 : f32
    %1064 = vector.broadcast %cst_172 : f32 to vector<8x8xf32>
    %1065 = arith.maximumf %1062, %1064 : vector<8x8xf32>
    %1066 = vector.broadcast %1063 : f32 to vector<8x8xf32>
    %1067 = arith.mulf %1066, %1065 : vector<8x8xf32>
    %1068 = arith.addf %1057, %1067 : vector<8x8xf32>
    %1069 = vector.extract_strided_slice %836 {offsets = [21, 0], sizes = [1, 8], strides = [1, 1]} : vector<32x8xf32> to vector<1x8xf32>
    %1070 = vector.extract_strided_slice %832 {offsets = [0, 21], sizes = [8, 1], strides = [1, 1]} : vector<8x32xf32> to vector<8x1xf32>
    %1071 = vector.broadcast %1069 : vector<1x8xf32> to vector<8x8xf32>
    %1072 = vector.broadcast %1070 : vector<8x1xf32> to vector<8x8xf32>
    %1073 = arith.subf %1071, %1072 : vector<8x8xf32>
    %c21_173 = arith.constant 21 : index
    %1074 = memref.load %arg4[%c21_173] : memref<33xf32, #tpu.memory_space<smem>>
    %cst_174 = arith.constant 0.000000e+00 : f32
    %1075 = vector.broadcast %cst_174 : f32 to vector<8x8xf32>
    %1076 = arith.maximumf %1073, %1075 : vector<8x8xf32>
    %1077 = vector.broadcast %1074 : f32 to vector<8x8xf32>
    %1078 = arith.mulf %1077, %1076 : vector<8x8xf32>
    %1079 = arith.addf %1068, %1078 : vector<8x8xf32>
    %1080 = vector.extract_strided_slice %836 {offsets = [22, 0], sizes = [1, 8], strides = [1, 1]} : vector<32x8xf32> to vector<1x8xf32>
    %1081 = vector.extract_strided_slice %832 {offsets = [0, 22], sizes = [8, 1], strides = [1, 1]} : vector<8x32xf32> to vector<8x1xf32>
    %1082 = vector.broadcast %1080 : vector<1x8xf32> to vector<8x8xf32>
    %1083 = vector.broadcast %1081 : vector<8x1xf32> to vector<8x8xf32>
    %1084 = arith.subf %1082, %1083 : vector<8x8xf32>
    %c22_175 = arith.constant 22 : index
    %1085 = memref.load %arg4[%c22_175] : memref<33xf32, #tpu.memory_space<smem>>
    %cst_176 = arith.constant 0.000000e+00 : f32
    %1086 = vector.broadcast %cst_176 : f32 to vector<8x8xf32>
    %1087 = arith.maximumf %1084, %1086 : vector<8x8xf32>
    %1088 = vector.broadcast %1085 : f32 to vector<8x8xf32>
    %1089 = arith.mulf %1088, %1087 : vector<8x8xf32>
    %1090 = arith.addf %1079, %1089 : vector<8x8xf32>
    %1091 = vector.extract_strided_slice %836 {offsets = [23, 0], sizes = [1, 8], strides = [1, 1]} : vector<32x8xf32> to vector<1x8xf32>
    %1092 = vector.extract_strided_slice %832 {offsets = [0, 23], sizes = [8, 1], strides = [1, 1]} : vector<8x32xf32> to vector<8x1xf32>
    %1093 = vector.broadcast %1091 : vector<1x8xf32> to vector<8x8xf32>
    %1094 = vector.broadcast %1092 : vector<8x1xf32> to vector<8x8xf32>
    %1095 = arith.subf %1093, %1094 : vector<8x8xf32>
    %c23_177 = arith.constant 23 : index
    %1096 = memref.load %arg4[%c23_177] : memref<33xf32, #tpu.memory_space<smem>>
    %cst_178 = arith.constant 0.000000e+00 : f32
    %1097 = vector.broadcast %cst_178 : f32 to vector<8x8xf32>
    %1098 = arith.maximumf %1095, %1097 : vector<8x8xf32>
    %1099 = vector.broadcast %1096 : f32 to vector<8x8xf32>
    %1100 = arith.mulf %1099, %1098 : vector<8x8xf32>
    %1101 = arith.addf %1090, %1100 : vector<8x8xf32>
    %1102 = vector.extract_strided_slice %836 {offsets = [24, 0], sizes = [1, 8], strides = [1, 1]} : vector<32x8xf32> to vector<1x8xf32>
    %1103 = vector.extract_strided_slice %832 {offsets = [0, 24], sizes = [8, 1], strides = [1, 1]} : vector<8x32xf32> to vector<8x1xf32>
    %1104 = vector.broadcast %1102 : vector<1x8xf32> to vector<8x8xf32>
    %1105 = vector.broadcast %1103 : vector<8x1xf32> to vector<8x8xf32>
    %1106 = arith.subf %1104, %1105 : vector<8x8xf32>
    %c24_179 = arith.constant 24 : index
    %1107 = memref.load %arg4[%c24_179] : memref<33xf32, #tpu.memory_space<smem>>
    %cst_180 = arith.constant 0.000000e+00 : f32
    %1108 = vector.broadcast %cst_180 : f32 to vector<8x8xf32>
    %1109 = arith.maximumf %1106, %1108 : vector<8x8xf32>
    %1110 = vector.broadcast %1107 : f32 to vector<8x8xf32>
    %1111 = arith.mulf %1110, %1109 : vector<8x8xf32>
    %1112 = arith.addf %1101, %1111 : vector<8x8xf32>
    %1113 = vector.extract_strided_slice %836 {offsets = [25, 0], sizes = [1, 8], strides = [1, 1]} : vector<32x8xf32> to vector<1x8xf32>
    %1114 = vector.extract_strided_slice %832 {offsets = [0, 25], sizes = [8, 1], strides = [1, 1]} : vector<8x32xf32> to vector<8x1xf32>
    %1115 = vector.broadcast %1113 : vector<1x8xf32> to vector<8x8xf32>
    %1116 = vector.broadcast %1114 : vector<8x1xf32> to vector<8x8xf32>
    %1117 = arith.subf %1115, %1116 : vector<8x8xf32>
    %c25_181 = arith.constant 25 : index
    %1118 = memref.load %arg4[%c25_181] : memref<33xf32, #tpu.memory_space<smem>>
    %cst_182 = arith.constant 0.000000e+00 : f32
    %1119 = vector.broadcast %cst_182 : f32 to vector<8x8xf32>
    %1120 = arith.maximumf %1117, %1119 : vector<8x8xf32>
    %1121 = vector.broadcast %1118 : f32 to vector<8x8xf32>
    %1122 = arith.mulf %1121, %1120 : vector<8x8xf32>
    %1123 = arith.addf %1112, %1122 : vector<8x8xf32>
    %1124 = vector.extract_strided_slice %836 {offsets = [26, 0], sizes = [1, 8], strides = [1, 1]} : vector<32x8xf32> to vector<1x8xf32>
    %1125 = vector.extract_strided_slice %832 {offsets = [0, 26], sizes = [8, 1], strides = [1, 1]} : vector<8x32xf32> to vector<8x1xf32>
    %1126 = vector.broadcast %1124 : vector<1x8xf32> to vector<8x8xf32>
    %1127 = vector.broadcast %1125 : vector<8x1xf32> to vector<8x8xf32>
    %1128 = arith.subf %1126, %1127 : vector<8x8xf32>
    %c26_183 = arith.constant 26 : index
    %1129 = memref.load %arg4[%c26_183] : memref<33xf32, #tpu.memory_space<smem>>
    %cst_184 = arith.constant 0.000000e+00 : f32
    %1130 = vector.broadcast %cst_184 : f32 to vector<8x8xf32>
    %1131 = arith.maximumf %1128, %1130 : vector<8x8xf32>
    %1132 = vector.broadcast %1129 : f32 to vector<8x8xf32>
    %1133 = arith.mulf %1132, %1131 : vector<8x8xf32>
    %1134 = arith.addf %1123, %1133 : vector<8x8xf32>
    %1135 = vector.extract_strided_slice %836 {offsets = [27, 0], sizes = [1, 8], strides = [1, 1]} : vector<32x8xf32> to vector<1x8xf32>
    %1136 = vector.extract_strided_slice %832 {offsets = [0, 27], sizes = [8, 1], strides = [1, 1]} : vector<8x32xf32> to vector<8x1xf32>
    %1137 = vector.broadcast %1135 : vector<1x8xf32> to vector<8x8xf32>
    %1138 = vector.broadcast %1136 : vector<8x1xf32> to vector<8x8xf32>
    %1139 = arith.subf %1137, %1138 : vector<8x8xf32>
    %c27_185 = arith.constant 27 : index
    %1140 = memref.load %arg4[%c27_185] : memref<33xf32, #tpu.memory_space<smem>>
    %cst_186 = arith.constant 0.000000e+00 : f32
    %1141 = vector.broadcast %cst_186 : f32 to vector<8x8xf32>
    %1142 = arith.maximumf %1139, %1141 : vector<8x8xf32>
    %1143 = vector.broadcast %1140 : f32 to vector<8x8xf32>
    %1144 = arith.mulf %1143, %1142 : vector<8x8xf32>
    %1145 = arith.addf %1134, %1144 : vector<8x8xf32>
    %1146 = vector.extract_strided_slice %836 {offsets = [28, 0], sizes = [1, 8], strides = [1, 1]} : vector<32x8xf32> to vector<1x8xf32>
    %1147 = vector.extract_strided_slice %832 {offsets = [0, 28], sizes = [8, 1], strides = [1, 1]} : vector<8x32xf32> to vector<8x1xf32>
    %1148 = vector.broadcast %1146 : vector<1x8xf32> to vector<8x8xf32>
    %1149 = vector.broadcast %1147 : vector<8x1xf32> to vector<8x8xf32>
    %1150 = arith.subf %1148, %1149 : vector<8x8xf32>
    %c28_187 = arith.constant 28 : index
    %1151 = memref.load %arg4[%c28_187] : memref<33xf32, #tpu.memory_space<smem>>
    %cst_188 = arith.constant 0.000000e+00 : f32
    %1152 = vector.broadcast %cst_188 : f32 to vector<8x8xf32>
    %1153 = arith.maximumf %1150, %1152 : vector<8x8xf32>
    %1154 = vector.broadcast %1151 : f32 to vector<8x8xf32>
    %1155 = arith.mulf %1154, %1153 : vector<8x8xf32>
    %1156 = arith.addf %1145, %1155 : vector<8x8xf32>
    %1157 = vector.extract_strided_slice %836 {offsets = [29, 0], sizes = [1, 8], strides = [1, 1]} : vector<32x8xf32> to vector<1x8xf32>
    %1158 = vector.extract_strided_slice %832 {offsets = [0, 29], sizes = [8, 1], strides = [1, 1]} : vector<8x32xf32> to vector<8x1xf32>
    %1159 = vector.broadcast %1157 : vector<1x8xf32> to vector<8x8xf32>
    %1160 = vector.broadcast %1158 : vector<8x1xf32> to vector<8x8xf32>
    %1161 = arith.subf %1159, %1160 : vector<8x8xf32>
    %c29_189 = arith.constant 29 : index
    %1162 = memref.load %arg4[%c29_189] : memref<33xf32, #tpu.memory_space<smem>>
    %cst_190 = arith.constant 0.000000e+00 : f32
    %1163 = vector.broadcast %cst_190 : f32 to vector<8x8xf32>
    %1164 = arith.maximumf %1161, %1163 : vector<8x8xf32>
    %1165 = vector.broadcast %1162 : f32 to vector<8x8xf32>
    %1166 = arith.mulf %1165, %1164 : vector<8x8xf32>
    %1167 = arith.addf %1156, %1166 : vector<8x8xf32>
    %1168 = vector.extract_strided_slice %836 {offsets = [30, 0], sizes = [1, 8], strides = [1, 1]} : vector<32x8xf32> to vector<1x8xf32>
    %1169 = vector.extract_strided_slice %832 {offsets = [0, 30], sizes = [8, 1], strides = [1, 1]} : vector<8x32xf32> to vector<8x1xf32>
    %1170 = vector.broadcast %1168 : vector<1x8xf32> to vector<8x8xf32>
    %1171 = vector.broadcast %1169 : vector<8x1xf32> to vector<8x8xf32>
    %1172 = arith.subf %1170, %1171 : vector<8x8xf32>
    %c30_191 = arith.constant 30 : index
    %1173 = memref.load %arg4[%c30_191] : memref<33xf32, #tpu.memory_space<smem>>
    %cst_192 = arith.constant 0.000000e+00 : f32
    %1174 = vector.broadcast %cst_192 : f32 to vector<8x8xf32>
    %1175 = arith.maximumf %1172, %1174 : vector<8x8xf32>
    %1176 = vector.broadcast %1173 : f32 to vector<8x8xf32>
    %1177 = arith.mulf %1176, %1175 : vector<8x8xf32>
    %1178 = arith.addf %1167, %1177 : vector<8x8xf32>
    %1179 = vector.extract_strided_slice %836 {offsets = [31, 0], sizes = [1, 8], strides = [1, 1]} : vector<32x8xf32> to vector<1x8xf32>
    %1180 = vector.extract_strided_slice %832 {offsets = [0, 31], sizes = [8, 1], strides = [1, 1]} : vector<8x32xf32> to vector<8x1xf32>
    %1181 = vector.broadcast %1179 : vector<1x8xf32> to vector<8x8xf32>
    %1182 = vector.broadcast %1180 : vector<8x1xf32> to vector<8x8xf32>
    %1183 = arith.subf %1181, %1182 : vector<8x8xf32>
    %c31_193 = arith.constant 31 : index
    %1184 = memref.load %arg4[%c31_193] : memref<33xf32, #tpu.memory_space<smem>>
    %cst_194 = arith.constant 0.000000e+00 : f32
    %1185 = vector.broadcast %cst_194 : f32 to vector<8x8xf32>
    %1186 = arith.maximumf %1183, %1185 : vector<8x8xf32>
    %1187 = vector.broadcast %1184 : f32 to vector<8x8xf32>
    %1188 = arith.mulf %1187, %1186 : vector<8x8xf32>
    %1189 = arith.addf %1178, %1188 : vector<8x8xf32>
    %1190 = arith.negf %1189 : vector<8x8xf32>
    %1191 = math.exp %1190 : vector<8x8xf32>
    %cst_195 = arith.constant 1.000000e+00 : f32
    %1192 = vector.broadcast %cst_195 : f32 to vector<8x8xf32>
    %1193 = arith.addf %1192, %1191 : vector<8x8xf32>
    %1194 = arith.divf %1192, %1193 : vector<8x8xf32>
    %1195 = arith.truncf %1194 : vector<8x8xf32> to vector<8x8xbf16>
    %1196 = vector.extract_strided_slice %829 {offsets = [0, 0], sizes = [8, 128], strides = [1, 1]} : vector<16x128xf32> to vector<8x128xf32>
    %1197 = arith.truncf %1196 : vector<8x128xf32> to vector<8x128xbf16>
    %1198 = vector.extract_strided_slice %829 {offsets = [8, 0], sizes = [8, 128], strides = [1, 1]} : vector<16x128xf32> to vector<8x128xf32>
    %1199 = arith.truncf %1198 : vector<8x128xf32> to vector<8x128xbf16>
    %cst_196 = arith.constant dense<0.000000e+00> : vector<8xf32>
    %1200 = vector.multi_reduction <add>, %1194, %cst_196 [1] : vector<8x8xf32> to vector<8xf32>
    %1201 = vector.shape_cast %1200 : vector<8xf32> to vector<8x1xf32>
    %cst_197 = arith.constant dense<0.000000e+00> : vector<8x128xf32>
    %1202 = tpu.matmul %1195, %1199, %cst_197 {dimension_numbers = #tpu.dot_dimension_numbers<[1], [0], [0], [1], [0, 0, 1, 1], [], []>} : vector<8x8xbf16>, vector<8x128xbf16>, vector<8x128xf32> -> vector<8x128xf32>
    %1203 = tpu.concatenate %1197, %6 in 1 : vector<8x128xbf16>, vector<8x1xbf16> -> vector<8x129xbf16>
    %cst_198 = arith.constant dense<0.000000e+00> : vector<8x129xf32>
    %1204 = tpu.matmul %1195, %1203, %cst_198 {dimension_numbers = #tpu.dot_dimension_numbers<[0], [0], [1], [1], [0, 1, 1, 1], [], []>} : vector<8x8xbf16>, vector<8x129xbf16>, vector<8x129xf32> -> vector<8x129xf32>
    %1205 = vector.extract_strided_slice %1204 {offsets = [0, 0], sizes = [8, 128], strides = [1, 1]} : vector<8x129xf32> to vector<8x128xf32>
    %1206 = vector.extract_strided_slice %1204 {offsets = [0, 128], sizes = [8, 1], strides = [1, 1]} : vector<8x129xf32> to vector<8x1xf32>
    %1207 = vector.extract_strided_slice %830 {offsets = [0, 0], sizes = [8, 128], strides = [1, 1]} : vector<16x128xf32> to vector<8x128xf32>
    %1208 = arith.addf %1207, %1202 : vector<8x128xf32>
    %1209 = vector.extract_strided_slice %829 {offsets = [0, 0], sizes = [8, 128], strides = [1, 1]} : vector<16x128xf32> to vector<8x128xf32>
    %1210 = vector.broadcast %1201 : vector<8x1xf32> to vector<8x128xf32>
    %1211 = arith.mulf %1210, %1209 : vector<8x128xf32>
    %1212 = arith.subf %1208, %1211 : vector<8x128xf32>
    %1213 = vector.extract_strided_slice %830 {offsets = [8, 0], sizes = [8, 128], strides = [1, 1]} : vector<16x128xf32> to vector<8x128xf32>
    %1214 = arith.addf %1213, %1205 : vector<8x128xf32>
    %1215 = vector.extract_strided_slice %829 {offsets = [8, 0], sizes = [8, 128], strides = [1, 1]} : vector<16x128xf32> to vector<8x128xf32>
    %1216 = vector.broadcast %1206 : vector<8x1xf32> to vector<8x128xf32>
    %1217 = arith.mulf %1216, %1215 : vector<8x128xf32>
    %1218 = arith.subf %1214, %1217 : vector<8x128xf32>
    %1219 = tpu.concatenate %1212, %1218 in 0 : vector<8x128xf32>, vector<8x128xf32> -> vector<16x128xf32>
    %1220 = arith.truncf %1219 : vector<16x128xf32> to vector<16x128xbf16>
    %c3_199 = arith.constant 3 : index
    %c0_200 = arith.constant 0 : index
    %c0_201 = arith.constant 0 : index
    %1221 = vector.load %arg2[%c3_199, %c0_200, %c0_201] : memref<4x128x288xbf16, #tpu.memory_space<vmem>>, vector<1x128x288xbf16>
    %1222 = vector.shape_cast %1221 : vector<1x128x288xbf16> to vector<128x288xbf16>
    %1223 = vector.extract_strided_slice %1222 {offsets = [0, 256], sizes = [128, 32], strides = [1, 1]} : vector<128x288xbf16> to vector<128x32xbf16>
    %cst_202 = arith.constant dense<0.000000e+00> : vector<16x32xf32>
    %1224 = tpu.matmul %1220, %1223, %cst_202 {dimension_numbers = #tpu.dot_dimension_numbers<[1], [0], [0], [1], [0, 0, 1, 1], [], []>} : vector<16x128xbf16>, vector<128x32xbf16>, vector<16x32xf32> -> vector<16x32xf32>
    %1225 = vector.extract_strided_slice %1224 {offsets = [0, 0], sizes = [8, 32], strides = [1, 1]} : vector<16x32xf32> to vector<8x32xf32>
    %1226 = vector.extract_strided_slice %1224 {offsets = [8, 0], sizes = [8, 32], strides = [1, 1]} : vector<16x32xf32> to vector<8x32xf32>
    %cst_203 = arith.constant dense<0.000000e+00> : vector<32x8xf32>
    %1227 = tpu.matmul %1226, %5, %cst_203 {dimension_numbers = #tpu.dot_dimension_numbers<[0], [0], [1], [1], [0, 1, 1, 1], [], []>} : vector<8x32xf32>, vector<8x8xf32>, vector<32x8xf32> -> vector<32x8xf32>
    %1228 = vector.broadcast %0 : vector<32x1xf32> to vector<32x8xf32>
    %1229 = arith.addf %1227, %1228 : vector<32x8xf32>
    %1230 = vector.broadcast %7 : f32 to vector<8x8xf32>
    %1231 = vector.extract_strided_slice %1229 {offsets = [0, 0], sizes = [1, 8], strides = [1, 1]} : vector<32x8xf32> to vector<1x8xf32>
    %1232 = vector.extract_strided_slice %1225 {offsets = [0, 0], sizes = [8, 1], strides = [1, 1]} : vector<8x32xf32> to vector<8x1xf32>
    %1233 = vector.broadcast %1231 : vector<1x8xf32> to vector<8x8xf32>
    %1234 = vector.broadcast %1232 : vector<8x1xf32> to vector<8x8xf32>
    %1235 = arith.subf %1233, %1234 : vector<8x8xf32>
    %c0_204 = arith.constant 0 : index
    %1236 = memref.load %arg4[%c0_204] : memref<33xf32, #tpu.memory_space<smem>>
    %cst_205 = arith.constant 0.000000e+00 : f32
    %1237 = vector.broadcast %cst_205 : f32 to vector<8x8xf32>
    %1238 = arith.maximumf %1235, %1237 : vector<8x8xf32>
    %1239 = vector.broadcast %1236 : f32 to vector<8x8xf32>
    %1240 = arith.mulf %1239, %1238 : vector<8x8xf32>
    %1241 = arith.addf %1230, %1240 : vector<8x8xf32>
    %1242 = vector.extract_strided_slice %1229 {offsets = [1, 0], sizes = [1, 8], strides = [1, 1]} : vector<32x8xf32> to vector<1x8xf32>
    %1243 = vector.extract_strided_slice %1225 {offsets = [0, 1], sizes = [8, 1], strides = [1, 1]} : vector<8x32xf32> to vector<8x1xf32>
    %1244 = vector.broadcast %1242 : vector<1x8xf32> to vector<8x8xf32>
    %1245 = vector.broadcast %1243 : vector<8x1xf32> to vector<8x8xf32>
    %1246 = arith.subf %1244, %1245 : vector<8x8xf32>
    %c1_206 = arith.constant 1 : index
    %1247 = memref.load %arg4[%c1_206] : memref<33xf32, #tpu.memory_space<smem>>
    %cst_207 = arith.constant 0.000000e+00 : f32
    %1248 = vector.broadcast %cst_207 : f32 to vector<8x8xf32>
    %1249 = arith.maximumf %1246, %1248 : vector<8x8xf32>
    %1250 = vector.broadcast %1247 : f32 to vector<8x8xf32>
    %1251 = arith.mulf %1250, %1249 : vector<8x8xf32>
    %1252 = arith.addf %1241, %1251 : vector<8x8xf32>
    %1253 = vector.extract_strided_slice %1229 {offsets = [2, 0], sizes = [1, 8], strides = [1, 1]} : vector<32x8xf32> to vector<1x8xf32>
    %1254 = vector.extract_strided_slice %1225 {offsets = [0, 2], sizes = [8, 1], strides = [1, 1]} : vector<8x32xf32> to vector<8x1xf32>
    %1255 = vector.broadcast %1253 : vector<1x8xf32> to vector<8x8xf32>
    %1256 = vector.broadcast %1254 : vector<8x1xf32> to vector<8x8xf32>
    %1257 = arith.subf %1255, %1256 : vector<8x8xf32>
    %c2_208 = arith.constant 2 : index
    %1258 = memref.load %arg4[%c2_208] : memref<33xf32, #tpu.memory_space<smem>>
    %cst_209 = arith.constant 0.000000e+00 : f32
    %1259 = vector.broadcast %cst_209 : f32 to vector<8x8xf32>
    %1260 = arith.maximumf %1257, %1259 : vector<8x8xf32>
    %1261 = vector.broadcast %1258 : f32 to vector<8x8xf32>
    %1262 = arith.mulf %1261, %1260 : vector<8x8xf32>
    %1263 = arith.addf %1252, %1262 : vector<8x8xf32>
    %1264 = vector.extract_strided_slice %1229 {offsets = [3, 0], sizes = [1, 8], strides = [1, 1]} : vector<32x8xf32> to vector<1x8xf32>
    %1265 = vector.extract_strided_slice %1225 {offsets = [0, 3], sizes = [8, 1], strides = [1, 1]} : vector<8x32xf32> to vector<8x1xf32>
    %1266 = vector.broadcast %1264 : vector<1x8xf32> to vector<8x8xf32>
    %1267 = vector.broadcast %1265 : vector<8x1xf32> to vector<8x8xf32>
    %1268 = arith.subf %1266, %1267 : vector<8x8xf32>
    %c3_210 = arith.constant 3 : index
    %1269 = memref.load %arg4[%c3_210] : memref<33xf32, #tpu.memory_space<smem>>
    %cst_211 = arith.constant 0.000000e+00 : f32
    %1270 = vector.broadcast %cst_211 : f32 to vector<8x8xf32>
    %1271 = arith.maximumf %1268, %1270 : vector<8x8xf32>
    %1272 = vector.broadcast %1269 : f32 to vector<8x8xf32>
    %1273 = arith.mulf %1272, %1271 : vector<8x8xf32>
    %1274 = arith.addf %1263, %1273 : vector<8x8xf32>
    %1275 = vector.extract_strided_slice %1229 {offsets = [4, 0], sizes = [1, 8], strides = [1, 1]} : vector<32x8xf32> to vector<1x8xf32>
    %1276 = vector.extract_strided_slice %1225 {offsets = [0, 4], sizes = [8, 1], strides = [1, 1]} : vector<8x32xf32> to vector<8x1xf32>
    %1277 = vector.broadcast %1275 : vector<1x8xf32> to vector<8x8xf32>
    %1278 = vector.broadcast %1276 : vector<8x1xf32> to vector<8x8xf32>
    %1279 = arith.subf %1277, %1278 : vector<8x8xf32>
    %c4_212 = arith.constant 4 : index
    %1280 = memref.load %arg4[%c4_212] : memref<33xf32, #tpu.memory_space<smem>>
    %cst_213 = arith.constant 0.000000e+00 : f32
    %1281 = vector.broadcast %cst_213 : f32 to vector<8x8xf32>
    %1282 = arith.maximumf %1279, %1281 : vector<8x8xf32>
    %1283 = vector.broadcast %1280 : f32 to vector<8x8xf32>
    %1284 = arith.mulf %1283, %1282 : vector<8x8xf32>
    %1285 = arith.addf %1274, %1284 : vector<8x8xf32>
    %1286 = vector.extract_strided_slice %1229 {offsets = [5, 0], sizes = [1, 8], strides = [1, 1]} : vector<32x8xf32> to vector<1x8xf32>
    %1287 = vector.extract_strided_slice %1225 {offsets = [0, 5], sizes = [8, 1], strides = [1, 1]} : vector<8x32xf32> to vector<8x1xf32>
    %1288 = vector.broadcast %1286 : vector<1x8xf32> to vector<8x8xf32>
    %1289 = vector.broadcast %1287 : vector<8x1xf32> to vector<8x8xf32>
    %1290 = arith.subf %1288, %1289 : vector<8x8xf32>
    %c5_214 = arith.constant 5 : index
    %1291 = memref.load %arg4[%c5_214] : memref<33xf32, #tpu.memory_space<smem>>
    %cst_215 = arith.constant 0.000000e+00 : f32
    %1292 = vector.broadcast %cst_215 : f32 to vector<8x8xf32>
    %1293 = arith.maximumf %1290, %1292 : vector<8x8xf32>
    %1294 = vector.broadcast %1291 : f32 to vector<8x8xf32>
    %1295 = arith.mulf %1294, %1293 : vector<8x8xf32>
    %1296 = arith.addf %1285, %1295 : vector<8x8xf32>
    %1297 = vector.extract_strided_slice %1229 {offsets = [6, 0], sizes = [1, 8], strides = [1, 1]} : vector<32x8xf32> to vector<1x8xf32>
    %1298 = vector.extract_strided_slice %1225 {offsets = [0, 6], sizes = [8, 1], strides = [1, 1]} : vector<8x32xf32> to vector<8x1xf32>
    %1299 = vector.broadcast %1297 : vector<1x8xf32> to vector<8x8xf32>
    %1300 = vector.broadcast %1298 : vector<8x1xf32> to vector<8x8xf32>
    %1301 = arith.subf %1299, %1300 : vector<8x8xf32>
    %c6_216 = arith.constant 6 : index
    %1302 = memref.load %arg4[%c6_216] : memref<33xf32, #tpu.memory_space<smem>>
    %cst_217 = arith.constant 0.000000e+00 : f32
    %1303 = vector.broadcast %cst_217 : f32 to vector<8x8xf32>
    %1304 = arith.maximumf %1301, %1303 : vector<8x8xf32>
    %1305 = vector.broadcast %1302 : f32 to vector<8x8xf32>
    %1306 = arith.mulf %1305, %1304 : vector<8x8xf32>
    %1307 = arith.addf %1296, %1306 : vector<8x8xf32>
    %1308 = vector.extract_strided_slice %1229 {offsets = [7, 0], sizes = [1, 8], strides = [1, 1]} : vector<32x8xf32> to vector<1x8xf32>
    %1309 = vector.extract_strided_slice %1225 {offsets = [0, 7], sizes = [8, 1], strides = [1, 1]} : vector<8x32xf32> to vector<8x1xf32>
    %1310 = vector.broadcast %1308 : vector<1x8xf32> to vector<8x8xf32>
    %1311 = vector.broadcast %1309 : vector<8x1xf32> to vector<8x8xf32>
    %1312 = arith.subf %1310, %1311 : vector<8x8xf32>
    %c7_218 = arith.constant 7 : index
    %1313 = memref.load %arg4[%c7_218] : memref<33xf32, #tpu.memory_space<smem>>
    %cst_219 = arith.constant 0.000000e+00 : f32
    %1314 = vector.broadcast %cst_219 : f32 to vector<8x8xf32>
    %1315 = arith.maximumf %1312, %1314 : vector<8x8xf32>
    %1316 = vector.broadcast %1313 : f32 to vector<8x8xf32>
    %1317 = arith.mulf %1316, %1315 : vector<8x8xf32>
    %1318 = arith.addf %1307, %1317 : vector<8x8xf32>
    %1319 = vector.extract_strided_slice %1229 {offsets = [8, 0], sizes = [1, 8], strides = [1, 1]} : vector<32x8xf32> to vector<1x8xf32>
    %1320 = vector.extract_strided_slice %1225 {offsets = [0, 8], sizes = [8, 1], strides = [1, 1]} : vector<8x32xf32> to vector<8x1xf32>
    %1321 = vector.broadcast %1319 : vector<1x8xf32> to vector<8x8xf32>
    %1322 = vector.broadcast %1320 : vector<8x1xf32> to vector<8x8xf32>
    %1323 = arith.subf %1321, %1322 : vector<8x8xf32>
    %c8_220 = arith.constant 8 : index
    %1324 = memref.load %arg4[%c8_220] : memref<33xf32, #tpu.memory_space<smem>>
    %cst_221 = arith.constant 0.000000e+00 : f32
    %1325 = vector.broadcast %cst_221 : f32 to vector<8x8xf32>
    %1326 = arith.maximumf %1323, %1325 : vector<8x8xf32>
    %1327 = vector.broadcast %1324 : f32 to vector<8x8xf32>
    %1328 = arith.mulf %1327, %1326 : vector<8x8xf32>
    %1329 = arith.addf %1318, %1328 : vector<8x8xf32>
    %1330 = vector.extract_strided_slice %1229 {offsets = [9, 0], sizes = [1, 8], strides = [1, 1]} : vector<32x8xf32> to vector<1x8xf32>
    %1331 = vector.extract_strided_slice %1225 {offsets = [0, 9], sizes = [8, 1], strides = [1, 1]} : vector<8x32xf32> to vector<8x1xf32>
    %1332 = vector.broadcast %1330 : vector<1x8xf32> to vector<8x8xf32>
    %1333 = vector.broadcast %1331 : vector<8x1xf32> to vector<8x8xf32>
    %1334 = arith.subf %1332, %1333 : vector<8x8xf32>
    %c9_222 = arith.constant 9 : index
    %1335 = memref.load %arg4[%c9_222] : memref<33xf32, #tpu.memory_space<smem>>
    %cst_223 = arith.constant 0.000000e+00 : f32
    %1336 = vector.broadcast %cst_223 : f32 to vector<8x8xf32>
    %1337 = arith.maximumf %1334, %1336 : vector<8x8xf32>
    %1338 = vector.broadcast %1335 : f32 to vector<8x8xf32>
    %1339 = arith.mulf %1338, %1337 : vector<8x8xf32>
    %1340 = arith.addf %1329, %1339 : vector<8x8xf32>
    %1341 = vector.extract_strided_slice %1229 {offsets = [10, 0], sizes = [1, 8], strides = [1, 1]} : vector<32x8xf32> to vector<1x8xf32>
    %1342 = vector.extract_strided_slice %1225 {offsets = [0, 10], sizes = [8, 1], strides = [1, 1]} : vector<8x32xf32> to vector<8x1xf32>
    %1343 = vector.broadcast %1341 : vector<1x8xf32> to vector<8x8xf32>
    %1344 = vector.broadcast %1342 : vector<8x1xf32> to vector<8x8xf32>
    %1345 = arith.subf %1343, %1344 : vector<8x8xf32>
    %c10_224 = arith.constant 10 : index
    %1346 = memref.load %arg4[%c10_224] : memref<33xf32, #tpu.memory_space<smem>>
    %cst_225 = arith.constant 0.000000e+00 : f32
    %1347 = vector.broadcast %cst_225 : f32 to vector<8x8xf32>
    %1348 = arith.maximumf %1345, %1347 : vector<8x8xf32>
    %1349 = vector.broadcast %1346 : f32 to vector<8x8xf32>
    %1350 = arith.mulf %1349, %1348 : vector<8x8xf32>
    %1351 = arith.addf %1340, %1350 : vector<8x8xf32>
    %1352 = vector.extract_strided_slice %1229 {offsets = [11, 0], sizes = [1, 8], strides = [1, 1]} : vector<32x8xf32> to vector<1x8xf32>
    %1353 = vector.extract_strided_slice %1225 {offsets = [0, 11], sizes = [8, 1], strides = [1, 1]} : vector<8x32xf32> to vector<8x1xf32>
    %1354 = vector.broadcast %1352 : vector<1x8xf32> to vector<8x8xf32>
    %1355 = vector.broadcast %1353 : vector<8x1xf32> to vector<8x8xf32>
    %1356 = arith.subf %1354, %1355 : vector<8x8xf32>
    %c11_226 = arith.constant 11 : index
    %1357 = memref.load %arg4[%c11_226] : memref<33xf32, #tpu.memory_space<smem>>
    %cst_227 = arith.constant 0.000000e+00 : f32
    %1358 = vector.broadcast %cst_227 : f32 to vector<8x8xf32>
    %1359 = arith.maximumf %1356, %1358 : vector<8x8xf32>
    %1360 = vector.broadcast %1357 : f32 to vector<8x8xf32>
    %1361 = arith.mulf %1360, %1359 : vector<8x8xf32>
    %1362 = arith.addf %1351, %1361 : vector<8x8xf32>
    %1363 = vector.extract_strided_slice %1229 {offsets = [12, 0], sizes = [1, 8], strides = [1, 1]} : vector<32x8xf32> to vector<1x8xf32>
    %1364 = vector.extract_strided_slice %1225 {offsets = [0, 12], sizes = [8, 1], strides = [1, 1]} : vector<8x32xf32> to vector<8x1xf32>
    %1365 = vector.broadcast %1363 : vector<1x8xf32> to vector<8x8xf32>
    %1366 = vector.broadcast %1364 : vector<8x1xf32> to vector<8x8xf32>
    %1367 = arith.subf %1365, %1366 : vector<8x8xf32>
    %c12_228 = arith.constant 12 : index
    %1368 = memref.load %arg4[%c12_228] : memref<33xf32, #tpu.memory_space<smem>>
    %cst_229 = arith.constant 0.000000e+00 : f32
    %1369 = vector.broadcast %cst_229 : f32 to vector<8x8xf32>
    %1370 = arith.maximumf %1367, %1369 : vector<8x8xf32>
    %1371 = vector.broadcast %1368 : f32 to vector<8x8xf32>
    %1372 = arith.mulf %1371, %1370 : vector<8x8xf32>
    %1373 = arith.addf %1362, %1372 : vector<8x8xf32>
    %1374 = vector.extract_strided_slice %1229 {offsets = [13, 0], sizes = [1, 8], strides = [1, 1]} : vector<32x8xf32> to vector<1x8xf32>
    %1375 = vector.extract_strided_slice %1225 {offsets = [0, 13], sizes = [8, 1], strides = [1, 1]} : vector<8x32xf32> to vector<8x1xf32>
    %1376 = vector.broadcast %1374 : vector<1x8xf32> to vector<8x8xf32>
    %1377 = vector.broadcast %1375 : vector<8x1xf32> to vector<8x8xf32>
    %1378 = arith.subf %1376, %1377 : vector<8x8xf32>
    %c13_230 = arith.constant 13 : index
    %1379 = memref.load %arg4[%c13_230] : memref<33xf32, #tpu.memory_space<smem>>
    %cst_231 = arith.constant 0.000000e+00 : f32
    %1380 = vector.broadcast %cst_231 : f32 to vector<8x8xf32>
    %1381 = arith.maximumf %1378, %1380 : vector<8x8xf32>
    %1382 = vector.broadcast %1379 : f32 to vector<8x8xf32>
    %1383 = arith.mulf %1382, %1381 : vector<8x8xf32>
    %1384 = arith.addf %1373, %1383 : vector<8x8xf32>
    %1385 = vector.extract_strided_slice %1229 {offsets = [14, 0], sizes = [1, 8], strides = [1, 1]} : vector<32x8xf32> to vector<1x8xf32>
    %1386 = vector.extract_strided_slice %1225 {offsets = [0, 14], sizes = [8, 1], strides = [1, 1]} : vector<8x32xf32> to vector<8x1xf32>
    %1387 = vector.broadcast %1385 : vector<1x8xf32> to vector<8x8xf32>
    %1388 = vector.broadcast %1386 : vector<8x1xf32> to vector<8x8xf32>
    %1389 = arith.subf %1387, %1388 : vector<8x8xf32>
    %c14_232 = arith.constant 14 : index
    %1390 = memref.load %arg4[%c14_232] : memref<33xf32, #tpu.memory_space<smem>>
    %cst_233 = arith.constant 0.000000e+00 : f32
    %1391 = vector.broadcast %cst_233 : f32 to vector<8x8xf32>
    %1392 = arith.maximumf %1389, %1391 : vector<8x8xf32>
    %1393 = vector.broadcast %1390 : f32 to vector<8x8xf32>
    %1394 = arith.mulf %1393, %1392 : vector<8x8xf32>
    %1395 = arith.addf %1384, %1394 : vector<8x8xf32>
    %1396 = vector.extract_strided_slice %1229 {offsets = [15, 0], sizes = [1, 8], strides = [1, 1]} : vector<32x8xf32> to vector<1x8xf32>
    %1397 = vector.extract_strided_slice %1225 {offsets = [0, 15], sizes = [8, 1], strides = [1, 1]} : vector<8x32xf32> to vector<8x1xf32>
    %1398 = vector.broadcast %1396 : vector<1x8xf32> to vector<8x8xf32>
    %1399 = vector.broadcast %1397 : vector<8x1xf32> to vector<8x8xf32>
    %1400 = arith.subf %1398, %1399 : vector<8x8xf32>
    %c15_234 = arith.constant 15 : index
    %1401 = memref.load %arg4[%c15_234] : memref<33xf32, #tpu.memory_space<smem>>
    %cst_235 = arith.constant 0.000000e+00 : f32
    %1402 = vector.broadcast %cst_235 : f32 to vector<8x8xf32>
    %1403 = arith.maximumf %1400, %1402 : vector<8x8xf32>
    %1404 = vector.broadcast %1401 : f32 to vector<8x8xf32>
    %1405 = arith.mulf %1404, %1403 : vector<8x8xf32>
    %1406 = arith.addf %1395, %1405 : vector<8x8xf32>
    %1407 = vector.extract_strided_slice %1229 {offsets = [16, 0], sizes = [1, 8], strides = [1, 1]} : vector<32x8xf32> to vector<1x8xf32>
    %1408 = vector.extract_strided_slice %1225 {offsets = [0, 16], sizes = [8, 1], strides = [1, 1]} : vector<8x32xf32> to vector<8x1xf32>
    %1409 = vector.broadcast %1407 : vector<1x8xf32> to vector<8x8xf32>
    %1410 = vector.broadcast %1408 : vector<8x1xf32> to vector<8x8xf32>
    %1411 = arith.subf %1409, %1410 : vector<8x8xf32>
    %c16_236 = arith.constant 16 : index
    %1412 = memref.load %arg4[%c16_236] : memref<33xf32, #tpu.memory_space<smem>>
    %cst_237 = arith.constant 0.000000e+00 : f32
    %1413 = vector.broadcast %cst_237 : f32 to vector<8x8xf32>
    %1414 = arith.maximumf %1411, %1413 : vector<8x8xf32>
    %1415 = vector.broadcast %1412 : f32 to vector<8x8xf32>
    %1416 = arith.mulf %1415, %1414 : vector<8x8xf32>
    %1417 = arith.addf %1406, %1416 : vector<8x8xf32>
    %1418 = vector.extract_strided_slice %1229 {offsets = [17, 0], sizes = [1, 8], strides = [1, 1]} : vector<32x8xf32> to vector<1x8xf32>
    %1419 = vector.extract_strided_slice %1225 {offsets = [0, 17], sizes = [8, 1], strides = [1, 1]} : vector<8x32xf32> to vector<8x1xf32>
    %1420 = vector.broadcast %1418 : vector<1x8xf32> to vector<8x8xf32>
    %1421 = vector.broadcast %1419 : vector<8x1xf32> to vector<8x8xf32>
    %1422 = arith.subf %1420, %1421 : vector<8x8xf32>
    %c17_238 = arith.constant 17 : index
    %1423 = memref.load %arg4[%c17_238] : memref<33xf32, #tpu.memory_space<smem>>
    %cst_239 = arith.constant 0.000000e+00 : f32
    %1424 = vector.broadcast %cst_239 : f32 to vector<8x8xf32>
    %1425 = arith.maximumf %1422, %1424 : vector<8x8xf32>
    %1426 = vector.broadcast %1423 : f32 to vector<8x8xf32>
    %1427 = arith.mulf %1426, %1425 : vector<8x8xf32>
    %1428 = arith.addf %1417, %1427 : vector<8x8xf32>
    %1429 = vector.extract_strided_slice %1229 {offsets = [18, 0], sizes = [1, 8], strides = [1, 1]} : vector<32x8xf32> to vector<1x8xf32>
    %1430 = vector.extract_strided_slice %1225 {offsets = [0, 18], sizes = [8, 1], strides = [1, 1]} : vector<8x32xf32> to vector<8x1xf32>
    %1431 = vector.broadcast %1429 : vector<1x8xf32> to vector<8x8xf32>
    %1432 = vector.broadcast %1430 : vector<8x1xf32> to vector<8x8xf32>
    %1433 = arith.subf %1431, %1432 : vector<8x8xf32>
    %c18_240 = arith.constant 18 : index
    %1434 = memref.load %arg4[%c18_240] : memref<33xf32, #tpu.memory_space<smem>>
    %cst_241 = arith.constant 0.000000e+00 : f32
    %1435 = vector.broadcast %cst_241 : f32 to vector<8x8xf32>
    %1436 = arith.maximumf %1433, %1435 : vector<8x8xf32>
    %1437 = vector.broadcast %1434 : f32 to vector<8x8xf32>
    %1438 = arith.mulf %1437, %1436 : vector<8x8xf32>
    %1439 = arith.addf %1428, %1438 : vector<8x8xf32>
    %1440 = vector.extract_strided_slice %1229 {offsets = [19, 0], sizes = [1, 8], strides = [1, 1]} : vector<32x8xf32> to vector<1x8xf32>
    %1441 = vector.extract_strided_slice %1225 {offsets = [0, 19], sizes = [8, 1], strides = [1, 1]} : vector<8x32xf32> to vector<8x1xf32>
    %1442 = vector.broadcast %1440 : vector<1x8xf32> to vector<8x8xf32>
    %1443 = vector.broadcast %1441 : vector<8x1xf32> to vector<8x8xf32>
    %1444 = arith.subf %1442, %1443 : vector<8x8xf32>
    %c19_242 = arith.constant 19 : index
    %1445 = memref.load %arg4[%c19_242] : memref<33xf32, #tpu.memory_space<smem>>
    %cst_243 = arith.constant 0.000000e+00 : f32
    %1446 = vector.broadcast %cst_243 : f32 to vector<8x8xf32>
    %1447 = arith.maximumf %1444, %1446 : vector<8x8xf32>
    %1448 = vector.broadcast %1445 : f32 to vector<8x8xf32>
    %1449 = arith.mulf %1448, %1447 : vector<8x8xf32>
    %1450 = arith.addf %1439, %1449 : vector<8x8xf32>
    %1451 = vector.extract_strided_slice %1229 {offsets = [20, 0], sizes = [1, 8], strides = [1, 1]} : vector<32x8xf32> to vector<1x8xf32>
    %1452 = vector.extract_strided_slice %1225 {offsets = [0, 20], sizes = [8, 1], strides = [1, 1]} : vector<8x32xf32> to vector<8x1xf32>
    %1453 = vector.broadcast %1451 : vector<1x8xf32> to vector<8x8xf32>
    %1454 = vector.broadcast %1452 : vector<8x1xf32> to vector<8x8xf32>
    %1455 = arith.subf %1453, %1454 : vector<8x8xf32>
    %c20_244 = arith.constant 20 : index
    %1456 = memref.load %arg4[%c20_244] : memref<33xf32, #tpu.memory_space<smem>>
    %cst_245 = arith.constant 0.000000e+00 : f32
    %1457 = vector.broadcast %cst_245 : f32 to vector<8x8xf32>
    %1458 = arith.maximumf %1455, %1457 : vector<8x8xf32>
    %1459 = vector.broadcast %1456 : f32 to vector<8x8xf32>
    %1460 = arith.mulf %1459, %1458 : vector<8x8xf32>
    %1461 = arith.addf %1450, %1460 : vector<8x8xf32>
    %1462 = vector.extract_strided_slice %1229 {offsets = [21, 0], sizes = [1, 8], strides = [1, 1]} : vector<32x8xf32> to vector<1x8xf32>
    %1463 = vector.extract_strided_slice %1225 {offsets = [0, 21], sizes = [8, 1], strides = [1, 1]} : vector<8x32xf32> to vector<8x1xf32>
    %1464 = vector.broadcast %1462 : vector<1x8xf32> to vector<8x8xf32>
    %1465 = vector.broadcast %1463 : vector<8x1xf32> to vector<8x8xf32>
    %1466 = arith.subf %1464, %1465 : vector<8x8xf32>
    %c21_246 = arith.constant 21 : index
    %1467 = memref.load %arg4[%c21_246] : memref<33xf32, #tpu.memory_space<smem>>
    %cst_247 = arith.constant 0.000000e+00 : f32
    %1468 = vector.broadcast %cst_247 : f32 to vector<8x8xf32>
    %1469 = arith.maximumf %1466, %1468 : vector<8x8xf32>
    %1470 = vector.broadcast %1467 : f32 to vector<8x8xf32>
    %1471 = arith.mulf %1470, %1469 : vector<8x8xf32>
    %1472 = arith.addf %1461, %1471 : vector<8x8xf32>
    %1473 = vector.extract_strided_slice %1229 {offsets = [22, 0], sizes = [1, 8], strides = [1, 1]} : vector<32x8xf32> to vector<1x8xf32>
    %1474 = vector.extract_strided_slice %1225 {offsets = [0, 22], sizes = [8, 1], strides = [1, 1]} : vector<8x32xf32> to vector<8x1xf32>
    %1475 = vector.broadcast %1473 : vector<1x8xf32> to vector<8x8xf32>
    %1476 = vector.broadcast %1474 : vector<8x1xf32> to vector<8x8xf32>
    %1477 = arith.subf %1475, %1476 : vector<8x8xf32>
    %c22_248 = arith.constant 22 : index
    %1478 = memref.load %arg4[%c22_248] : memref<33xf32, #tpu.memory_space<smem>>
    %cst_249 = arith.constant 0.000000e+00 : f32
    %1479 = vector.broadcast %cst_249 : f32 to vector<8x8xf32>
    %1480 = arith.maximumf %1477, %1479 : vector<8x8xf32>
    %1481 = vector.broadcast %1478 : f32 to vector<8x8xf32>
    %1482 = arith.mulf %1481, %1480 : vector<8x8xf32>
    %1483 = arith.addf %1472, %1482 : vector<8x8xf32>
    %1484 = vector.extract_strided_slice %1229 {offsets = [23, 0], sizes = [1, 8], strides = [1, 1]} : vector<32x8xf32> to vector<1x8xf32>
    %1485 = vector.extract_strided_slice %1225 {offsets = [0, 23], sizes = [8, 1], strides = [1, 1]} : vector<8x32xf32> to vector<8x1xf32>
    %1486 = vector.broadcast %1484 : vector<1x8xf32> to vector<8x8xf32>
    %1487 = vector.broadcast %1485 : vector<8x1xf32> to vector<8x8xf32>
    %1488 = arith.subf %1486, %1487 : vector<8x8xf32>
    %c23_250 = arith.constant 23 : index
    %1489 = memref.load %arg4[%c23_250] : memref<33xf32, #tpu.memory_space<smem>>
    %cst_251 = arith.constant 0.000000e+00 : f32
    %1490 = vector.broadcast %cst_251 : f32 to vector<8x8xf32>
    %1491 = arith.maximumf %1488, %1490 : vector<8x8xf32>
    %1492 = vector.broadcast %1489 : f32 to vector<8x8xf32>
    %1493 = arith.mulf %1492, %1491 : vector<8x8xf32>
    %1494 = arith.addf %1483, %1493 : vector<8x8xf32>
    %1495 = vector.extract_strided_slice %1229 {offsets = [24, 0], sizes = [1, 8], strides = [1, 1]} : vector<32x8xf32> to vector<1x8xf32>
    %1496 = vector.extract_strided_slice %1225 {offsets = [0, 24], sizes = [8, 1], strides = [1, 1]} : vector<8x32xf32> to vector<8x1xf32>
    %1497 = vector.broadcast %1495 : vector<1x8xf32> to vector<8x8xf32>
    %1498 = vector.broadcast %1496 : vector<8x1xf32> to vector<8x8xf32>
    %1499 = arith.subf %1497, %1498 : vector<8x8xf32>
    %c24_252 = arith.constant 24 : index
    %1500 = memref.load %arg4[%c24_252] : memref<33xf32, #tpu.memory_space<smem>>
    %cst_253 = arith.constant 0.000000e+00 : f32
    %1501 = vector.broadcast %cst_253 : f32 to vector<8x8xf32>
    %1502 = arith.maximumf %1499, %1501 : vector<8x8xf32>
    %1503 = vector.broadcast %1500 : f32 to vector<8x8xf32>
    %1504 = arith.mulf %1503, %1502 : vector<8x8xf32>
    %1505 = arith.addf %1494, %1504 : vector<8x8xf32>
    %1506 = vector.extract_strided_slice %1229 {offsets = [25, 0], sizes = [1, 8], strides = [1, 1]} : vector<32x8xf32> to vector<1x8xf32>
    %1507 = vector.extract_strided_slice %1225 {offsets = [0, 25], sizes = [8, 1], strides = [1, 1]} : vector<8x32xf32> to vector<8x1xf32>
    %1508 = vector.broadcast %1506 : vector<1x8xf32> to vector<8x8xf32>
    %1509 = vector.broadcast %1507 : vector<8x1xf32> to vector<8x8xf32>
    %1510 = arith.subf %1508, %1509 : vector<8x8xf32>
    %c25_254 = arith.constant 25 : index
    %1511 = memref.load %arg4[%c25_254] : memref<33xf32, #tpu.memory_space<smem>>
    %cst_255 = arith.constant 0.000000e+00 : f32
    %1512 = vector.broadcast %cst_255 : f32 to vector<8x8xf32>
    %1513 = arith.maximumf %1510, %1512 : vector<8x8xf32>
    %1514 = vector.broadcast %1511 : f32 to vector<8x8xf32>
    %1515 = arith.mulf %1514, %1513 : vector<8x8xf32>
    %1516 = arith.addf %1505, %1515 : vector<8x8xf32>
    %1517 = vector.extract_strided_slice %1229 {offsets = [26, 0], sizes = [1, 8], strides = [1, 1]} : vector<32x8xf32> to vector<1x8xf32>
    %1518 = vector.extract_strided_slice %1225 {offsets = [0, 26], sizes = [8, 1], strides = [1, 1]} : vector<8x32xf32> to vector<8x1xf32>
    %1519 = vector.broadcast %1517 : vector<1x8xf32> to vector<8x8xf32>
    %1520 = vector.broadcast %1518 : vector<8x1xf32> to vector<8x8xf32>
    %1521 = arith.subf %1519, %1520 : vector<8x8xf32>
    %c26_256 = arith.constant 26 : index
    %1522 = memref.load %arg4[%c26_256] : memref<33xf32, #tpu.memory_space<smem>>
    %cst_257 = arith.constant 0.000000e+00 : f32
    %1523 = vector.broadcast %cst_257 : f32 to vector<8x8xf32>
    %1524 = arith.maximumf %1521, %1523 : vector<8x8xf32>
    %1525 = vector.broadcast %1522 : f32 to vector<8x8xf32>
    %1526 = arith.mulf %1525, %1524 : vector<8x8xf32>
    %1527 = arith.addf %1516, %1526 : vector<8x8xf32>
    %1528 = vector.extract_strided_slice %1229 {offsets = [27, 0], sizes = [1, 8], strides = [1, 1]} : vector<32x8xf32> to vector<1x8xf32>
    %1529 = vector.extract_strided_slice %1225 {offsets = [0, 27], sizes = [8, 1], strides = [1, 1]} : vector<8x32xf32> to vector<8x1xf32>
    %1530 = vector.broadcast %1528 : vector<1x8xf32> to vector<8x8xf32>
    %1531 = vector.broadcast %1529 : vector<8x1xf32> to vector<8x8xf32>
    %1532 = arith.subf %1530, %1531 : vector<8x8xf32>
    %c27_258 = arith.constant 27 : index
    %1533 = memref.load %arg4[%c27_258] : memref<33xf32, #tpu.memory_space<smem>>
    %cst_259 = arith.constant 0.000000e+00 : f32
    %1534 = vector.broadcast %cst_259 : f32 to vector<8x8xf32>
    %1535 = arith.maximumf %1532, %1534 : vector<8x8xf32>
    %1536 = vector.broadcast %1533 : f32 to vector<8x8xf32>
    %1537 = arith.mulf %1536, %1535 : vector<8x8xf32>
    %1538 = arith.addf %1527, %1537 : vector<8x8xf32>
    %1539 = vector.extract_strided_slice %1229 {offsets = [28, 0], sizes = [1, 8], strides = [1, 1]} : vector<32x8xf32> to vector<1x8xf32>
    %1540 = vector.extract_strided_slice %1225 {offsets = [0, 28], sizes = [8, 1], strides = [1, 1]} : vector<8x32xf32> to vector<8x1xf32>
    %1541 = vector.broadcast %1539 : vector<1x8xf32> to vector<8x8xf32>
    %1542 = vector.broadcast %1540 : vector<8x1xf32> to vector<8x8xf32>
    %1543 = arith.subf %1541, %1542 : vector<8x8xf32>
    %c28_260 = arith.constant 28 : index
    %1544 = memref.load %arg4[%c28_260] : memref<33xf32, #tpu.memory_space<smem>>
    %cst_261 = arith.constant 0.000000e+00 : f32
    %1545 = vector.broadcast %cst_261 : f32 to vector<8x8xf32>
    %1546 = arith.maximumf %1543, %1545 : vector<8x8xf32>
    %1547 = vector.broadcast %1544 : f32 to vector<8x8xf32>
    %1548 = arith.mulf %1547, %1546 : vector<8x8xf32>
    %1549 = arith.addf %1538, %1548 : vector<8x8xf32>
    %1550 = vector.extract_strided_slice %1229 {offsets = [29, 0], sizes = [1, 8], strides = [1, 1]} : vector<32x8xf32> to vector<1x8xf32>
    %1551 = vector.extract_strided_slice %1225 {offsets = [0, 29], sizes = [8, 1], strides = [1, 1]} : vector<8x32xf32> to vector<8x1xf32>
    %1552 = vector.broadcast %1550 : vector<1x8xf32> to vector<8x8xf32>
    %1553 = vector.broadcast %1551 : vector<8x1xf32> to vector<8x8xf32>
    %1554 = arith.subf %1552, %1553 : vector<8x8xf32>
    %c29_262 = arith.constant 29 : index
    %1555 = memref.load %arg4[%c29_262] : memref<33xf32, #tpu.memory_space<smem>>
    %cst_263 = arith.constant 0.000000e+00 : f32
    %1556 = vector.broadcast %cst_263 : f32 to vector<8x8xf32>
    %1557 = arith.maximumf %1554, %1556 : vector<8x8xf32>
    %1558 = vector.broadcast %1555 : f32 to vector<8x8xf32>
    %1559 = arith.mulf %1558, %1557 : vector<8x8xf32>
    %1560 = arith.addf %1549, %1559 : vector<8x8xf32>
    %1561 = vector.extract_strided_slice %1229 {offsets = [30, 0], sizes = [1, 8], strides = [1, 1]} : vector<32x8xf32> to vector<1x8xf32>
    %1562 = vector.extract_strided_slice %1225 {offsets = [0, 30], sizes = [8, 1], strides = [1, 1]} : vector<8x32xf32> to vector<8x1xf32>
    %1563 = vector.broadcast %1561 : vector<1x8xf32> to vector<8x8xf32>
    %1564 = vector.broadcast %1562 : vector<8x1xf32> to vector<8x8xf32>
    %1565 = arith.subf %1563, %1564 : vector<8x8xf32>
    %c30_264 = arith.constant 30 : index
    %1566 = memref.load %arg4[%c30_264] : memref<33xf32, #tpu.memory_space<smem>>
    %cst_265 = arith.constant 0.000000e+00 : f32
    %1567 = vector.broadcast %cst_265 : f32 to vector<8x8xf32>
    %1568 = arith.maximumf %1565, %1567 : vector<8x8xf32>
    %1569 = vector.broadcast %1566 : f32 to vector<8x8xf32>
    %1570 = arith.mulf %1569, %1568 : vector<8x8xf32>
    %1571 = arith.addf %1560, %1570 : vector<8x8xf32>
    %1572 = vector.extract_strided_slice %1229 {offsets = [31, 0], sizes = [1, 8], strides = [1, 1]} : vector<32x8xf32> to vector<1x8xf32>
    %1573 = vector.extract_strided_slice %1225 {offsets = [0, 31], sizes = [8, 1], strides = [1, 1]} : vector<8x32xf32> to vector<8x1xf32>
    %1574 = vector.broadcast %1572 : vector<1x8xf32> to vector<8x8xf32>
    %1575 = vector.broadcast %1573 : vector<8x1xf32> to vector<8x8xf32>
    %1576 = arith.subf %1574, %1575 : vector<8x8xf32>
    %c31_266 = arith.constant 31 : index
    %1577 = memref.load %arg4[%c31_266] : memref<33xf32, #tpu.memory_space<smem>>
    %cst_267 = arith.constant 0.000000e+00 : f32
    %1578 = vector.broadcast %cst_267 : f32 to vector<8x8xf32>
    %1579 = arith.maximumf %1576, %1578 : vector<8x8xf32>
    %1580 = vector.broadcast %1577 : f32 to vector<8x8xf32>
    %1581 = arith.mulf %1580, %1579 : vector<8x8xf32>
    %1582 = arith.addf %1571, %1581 : vector<8x8xf32>
    %1583 = arith.negf %1582 : vector<8x8xf32>
    %1584 = math.exp %1583 : vector<8x8xf32>
    %cst_268 = arith.constant 1.000000e+00 : f32
    %1585 = vector.broadcast %cst_268 : f32 to vector<8x8xf32>
    %1586 = arith.addf %1585, %1584 : vector<8x8xf32>
    %1587 = arith.divf %1585, %1586 : vector<8x8xf32>
    %c0_269 = arith.constant 0 : index
    %c0_270 = arith.constant 0 : index
    %1588 = vector.load %arg5[%c0_269, %c0_270] : memref<8x8xf32, #tpu.memory_space<vmem>>, vector<8x8xf32>
    tpu.vector_store %arg5[%c0_269, %c0_270], %1587 {strides = array<i32>} : memref<8x8xf32, #tpu.memory_space<vmem>>, vector<8x8xf32>,
    return
  }
  func.func @transform_0(%arg0: i32) -> (i32, i32) {
    %c0_i32 = arith.constant 0 : i32
    %c0_i32_0 = arith.constant 0 : i32
    %c0_i32_1 = arith.constant 0 : i32
    return %c0_i32, %c0_i32_0 : i32, i32
  }
  func.func @transform_1(%arg0: i32) -> (i32, i32, i32) {
    %c0_i32 = arith.constant 0 : i32
    %c0_i32_0 = arith.constant 0 : i32
    %c0_i32_1 = arith.constant 0 : i32
    %c0_i32_2 = arith.constant 0 : i32
    return %c0_i32, %c0_i32_0, %c0_i32_1 : i32, i32, i32
  }
  func.func @transform_2(%arg0: i32) -> (i32, i32) {
    %c0_i32 = arith.constant 0 : i32
    %c0_i32_0 = arith.constant 0 : i32
    %c0_i32_1 = arith.constant 0 : i32
    return %c0_i32, %c0_i32_0 : i32, i32
  }
  func.func @transform_3(%arg0: i32) -> i32 {
    %c0_i32 = arith.constant 0 : i32
    %c0_i32_0 = arith.constant 0 : i32
    return %c0_i32 : i32
  }
  func.func @transform_4(%arg0: i32) -> (i32, i32) {
    %c0_i32 = arith.constant 0 : i32
    %c0_i32_0 = arith.constant 0 : i32
    %c0_i32_1 = arith.constant 0 : i32
    return %c0_i32, %c0_i32_0 : i32, i32
  }
}

</mosaic_0001>

<bundles_post_ra>
// kernel: affinity_attention_op.1
= control target key start
LH: loop header
LB: loop body
LE: loop exit
PB: predicated region body
PF: predicated region fallthrough
CT: control target
= control target key end

     0   :  { %9 = vsyncpa [#allocation4], 0  ;;  %s4952_s0 = inlined_call_operand.vmem [shape: bf16[16,128], index: 0, kind: input, shape index: {}]   ;;  %s4953_s1 = inlined_call_operand.vmem [shape: bf16[4,128,288], index: 1, kind: input, shape index: {}]   ;;  %s4954_s2 = inlined_call_operand.vmem [shape: f32[32,1], index: 2, kind: input, shape index: {}]   ;;  %s4955_s3 = inlined_call_operand.vmem [shape: f32[33], index: 3, kind: input, shape index: {}]   ;;  %s4956_s4 = inlined_call_operand.hbm [shape: f32[8,8], index: 4, kind: output, shape index: {}]  }
   0x1   :  { %10 = vsyncpa [#allocation3], 0  ;;  %s22_s17 = sshll.u32 %s4955_s3, 4  ;;  %s3541_s18 = smov [#allocation2]   ;;  %s23_s17 = int_to_ptr.vmem [resolvable:$true] %s22_s17 }
   0x2   :  { %25 = dma.vmem_to_smem %s23_s17, 16, %s3541_s18, [#allocation4]  }
   0x3   :  { %3537 = dma.done.wait [#allocation4], 16  }
   0x4   :  { %3538 = vsyncadd [#allocation4], 4294967280 }
   0x5   :  { %30 = sfence }
   0x6   :  { %v2770_v0 = vld [vmem:[%s4953_s1 + $0xa8] sm:$0xf]  ;;  %v3240_v1 = vld [vmem:[%s4953_s1 + $0xb0] sm:$0xf0]  ;;  %v2762_v2 = vld [vmem:[%s4953_s1 + $0x90] sm:$0xf] }
   0x7   :  { %v2771_v3 = vor.u32 %v3240_v1, %v2770_v0  ;;  %v3238_v4 = vld [vmem:[%s4953_s1 + $0x98] sm:$0xf0]  ;;  %v3239_v5 = vld [vmem:[%s4953_s1 + $0xac] sm:$0xf]  ;;  %v2772_v6 = vld [vmem:[%s4953_s1 + $0xb4] sm:$0xf0] }
   0x8   :  { %v2775_v7 = vor.u32 %v3239_v5, %v2772_v6  ;;  %v3237_v8 = vld [vmem:[%s4953_s1 + $0x94] sm:$0xf]  ;;  %v2763_v9 = vor.u32 %v3238_v4, %v2762_v2  ;;  %v2764_v10 = vld [vmem:[%s4953_s1 + $0x9c] sm:$0xf0]  ;;  %v2754_v11 = vld [vmem:[%s4953_s1 + $0x78] sm:$0xf] }
   0x9   :  { %149 = vmatpush.bf16.msra.mxu0 %v2771_v3  ;;  %v3236_v12 = vld [vmem:[%s4953_s1 + $0x80] sm:$0xf0]  ;;  %v2767_v13 = vor.u32 %v3237_v8, %v2764_v10  ;;  %v3235_v14 = vld [vmem:[%s4953_s1 + $0x7c] sm:$0xf]  ;;  %v2756_v15 = vld [vmem:[%s4953_s1 + $0x84] sm:$0xf0] }
   0xa   :  { %163 = vmatpush.bf16.msra.mxu1 %v2775_v7  ;;  %v2755_v16 = vor.u32 %v3236_v12, %v2754_v11  ;;  %v2746_v17 = vld [vmem:[%s4953_s1 + $0x60] sm:$0xf]  ;;  %v3234_v18 = vld [vmem:[%s4953_s1 + $0x68] sm:$0xf0]  ;;  %v2759_v19 = vor.u32 %v3235_v14, %v2756_v15  ;;  %v3233_v20 = vld [vmem:[%s4953_s1 + $0x64] sm:$0xf] }
   0xb   :  { %v2748_v21 = vld [vmem:[%s4953_s1 + $0x6c] sm:$0xf0]  ;;  %v2747_v22 = vor.u32 %v3234_v18, %v2746_v17  ;;  %v2894_v23 = vld [vmem:[%s4953_s1 + $0x168] sm:$0xf]  ;;  %v3263_v24 = vld [vmem:[%s4953_s1 + $0x170] sm:$0xf0] }
   0xc   :  { %v3262_v25 = vld [vmem:[%s4953_s1 + $0x16c] sm:$0xf]  ;;  %v2738_v26 = vld [vmem:[%s4953_s1 + $0x48] sm:$0xf]  ;;  %v3232_v27 = vld [vmem:[%s4953_s1 + $0x50] sm:$0xf0]  ;;  %v2751_v28 = vor.u32 %v3233_v20, %v2748_v21  ;;  %v2895_v29 = vor.u32 %v3263_v24, %v2894_v23 }
   0xd   :  { %150 = vmatpush.bf16.msra.mxu0 %v2763_v9  ;;  %v2896_v30 = vld [vmem:[%s4953_s1 + $0x174] sm:$0xf0]  ;;  %v3231_v31 = vld [vmem:[%s4953_s1 + $0x4c] sm:$0xf]  ;;  %v2739_v34 = vor.u32 %v3232_v27, %v2738_v26  ;;  %v2730_v35 = vld [vmem:[%s4953_s1 + $0x30] sm:$0xf] }
   0xe   :  { %164 = vmatpush.bf16.msra.mxu1 %v2767_v13  ;;  %v2740_v32 = vld [vmem:[%s4953_s1 + $0x54] sm:$0xf0]  ;;  %v2899_v33 = vor.u32 %v3262_v25, %v2896_v30  ;;  %357 = vmatpush.bf16.msra.mxu2 %v2895_v29  ;;  %v3230_v36 = vld [vmem:[%s4953_s1 + $0x38] sm:$0xf0]  ;;  %v3229_v38 = vld [vmem:[%s4953_s1 + $0x34] sm:$0xf] }
   0xf   :  { %v2743_v37 = vor.u32 %v3231_v31, %v2740_v32  ;;  %v2732_v39 = vld [vmem:[%s4953_s1 + $0x3c] sm:$0xf0]  ;;  %v2731_v40 = vor.u32 %v3230_v36, %v2730_v35  ;;  %v2722_v41 = vld [vmem:[%s4953_s1 + $0x18] sm:$0xf]  ;;  %v3228_v42 = vld [vmem:[%s4953_s1 + $0x20] sm:$0xf0] }
  0x10   :  { %371 = vmatpush.bf16.msra.mxu3 %v2899_v33  ;;  %v2735_v43 = vor.u32 %v3229_v38, %v2732_v39  ;;  %v3227_v44 = vld [vmem:[%s4953_s1 + $0x1c] sm:$0xf]  ;;  %v2724_v45 = vld [vmem:[%s4953_s1 + $0x24] sm:$0xf0]  ;;  %v2723_v46 = vor.u32 %v3228_v42, %v2722_v41  ;;  %v2714_v47 = vld [vmem:[%s4953_s1] sm:$0xf] }
  0x11   :  { %151 = vmatpush.bf16.msra.mxu0 %v2755_v16  ;;  %v3226_v48 = vld [vmem:[%s4953_s1 + $0x8] sm:$0xf0]  ;;  %v2727_v49 = vor.u32 %v3227_v44, %v2724_v45  ;;  %v3225_v50 = vld [vmem:[%s4953_s1 + $0x4] sm:$0xf]  ;;  %v2716_v51 = vld [vmem:[%s4953_s1 + $0xc] sm:$0xf0] }
  0x12   :  { %165 = vmatpush.bf16.msra.mxu1 %v2759_v19  ;;  %v2902_v52 = vld [vmem:[%s4953_s1 + $0x170] sm:$0xf]  ;;  %v3264_v53 = vld [vmem:[%s4953_s1 + $0x178] sm:$0xf0]  ;;  %v2715_v54 = vor.u32 %v3226_v48, %v2714_v47  ;;  %v2719_v55 = vor.u32 %v3225_v50, %v2716_v51  ;;  %v3224_v57 = vld [vmem:[%s4952_s0] sm:$0xff]  ;;  %vm875_vm0 = vcmask 1043456  }
  0x13   :  { %v2903_v56 = vor.u32 %v3264_v53, %v2902_v52  ;;  %v2882_v58 = vld [vmem:[%s4953_s1 + $0x150] sm:$0xf]  ;;  %v3260_v59 = vld [vmem:[%s4953_s1 + $0x158] sm:$0xf0]  ;;  %v3259_v60 = vld [vmem:[%s4953_s1 + $0x154] sm:$0xf] }
  0x14   :  { %v2883_v61 = vor.u32 %v3260_v59, %v2882_v58  ;;  %v2884_v62 = vld [vmem:[%s4953_s1 + $0x15c] sm:$0xf0]  ;;  %v2890_v63 = vld [vmem:[%s4953_s1 + $0x158] sm:$0xf]  ;;  %v3261_v0 = vld [vmem:[%s4953_s1 + $0x160] sm:$0xf0] }
  0x15   :  { %152 = vmatpush.bf16.msra.mxu0 %v2747_v22  ;;  %v2887_v1 = vor.u32 %v3259_v60, %v2884_v62  ;;  %v2891_v2 = vor.u32 %v3261_v0, %v2890_v63  ;;  %v2870_v3 = vld [vmem:[%s4953_s1 + $0x138] sm:$0xf]  ;;  %v3257_v4 = vld [vmem:[%s4953_s1 + $0x140] sm:$0xf0]  ;;  %v3256_v5 = vld [vmem:[%s4953_s1 + $0x13c] sm:$0xf] }
  0x16   :  { %166 = vmatpush.bf16.msra.mxu1 %v2751_v28  ;;  %358 = vmatpush.bf16.msra.mxu2 %v2883_v61  ;;  %v2871_v6 = vor.u32 %v3257_v4, %v2870_v3  ;;  %v2872_v7 = vld [vmem:[%s4953_s1 + $0x144] sm:$0xf0]  ;;  %v2878_v8 = vld [vmem:[%s4953_s1 + $0x140] sm:$0xf]  ;;  %v3258_v9 = vld [vmem:[%s4953_s1 + $0x148] sm:$0xf0] }
  0x17   :  { %372 = vmatpush.bf16.msra.mxu3 %v2887_v1  ;;  %v2875_v10 = vor.u32 %v3256_v5, %v2872_v7  ;;  %v2879_v11 = vor.u32 %v3258_v9, %v2878_v8  ;;  %v2858_v12 = vld [vmem:[%s4953_s1 + $0x120] sm:$0xf]  ;;  %v3254_v13 = vld [vmem:[%s4953_s1 + $0x128] sm:$0xf0]  ;;  %v3253_v14 = vld [vmem:[%s4953_s1 + $0x124] sm:$0xf] }
  0x18   :  { %v2859_v15 = vor.u32 %v3254_v13, %v2858_v12  ;;  %v2860_v16 = vld [vmem:[%s4953_s1 + $0x12c] sm:$0xf0]  ;;  %v2866_v17 = vld [vmem:[%s4953_s1 + $0x128] sm:$0xf]  ;;  %v3255_v18 = vld [vmem:[%s4953_s1 + $0x130] sm:$0xf0] }
  0x19   :  { %153 = vmatpush.bf16.msra.mxu0 %v2739_v34  ;;  %v2863_v19 = vor.u32 %v3253_v14, %v2860_v16  ;;  %v2867_v20 = vor.u32 %v3255_v18, %v2866_v17  ;;  %v2846_v21 = vld [vmem:[%s4953_s1 + $0x108] sm:$0xf]  ;;  %v3251_v22 = vld [vmem:[%s4953_s1 + $0x110] sm:$0xf0]  ;;  %v3250_v23 = vld [vmem:[%s4953_s1 + $0x10c] sm:$0xf] }
  0x1a   :  { %167 = vmatpush.bf16.msra.mxu1 %v2743_v37  ;;  %359 = vmatpush.bf16.msra.mxu2 %v2871_v6  ;;  %v2847_v24 = vor.u32 %v3251_v22, %v2846_v21  ;;  %v2848_v25 = vld [vmem:[%s4953_s1 + $0x114] sm:$0xf0]  ;;  %v2854_v26 = vld [vmem:[%s4953_s1 + $0x110] sm:$0xf]  ;;  %v3252_v27 = vld [vmem:[%s4953_s1 + $0x118] sm:$0xf0] }
  0x1b   :  { %373 = vmatpush.bf16.msra.mxu3 %v2875_v10  ;;  %v2851_v28 = vor.u32 %v3250_v23, %v2848_v25  ;;  %v2855_v29 = vor.u32 %v3252_v27, %v2854_v26  ;;  %v2834_v30 = vld [vmem:[%s4953_s1 + $0xf0] sm:$0xf]  ;;  %v3248_v31 = vld [vmem:[%s4953_s1 + $0xf8] sm:$0xf0]  ;;  %v3247_v32 = vld [vmem:[%s4953_s1 + $0xf4] sm:$0xf] }
  0x1c   :  { %v2835_v33 = vor.u32 %v3248_v31, %v2834_v30  ;;  %v2836_v34 = vld [vmem:[%s4953_s1 + $0xfc] sm:$0xf0]  ;;  %v2842_v35 = vld [vmem:[%s4953_s1 + $0xf8] sm:$0xf]  ;;  %v3249_v36 = vld [vmem:[%s4953_s1 + $0x100] sm:$0xf0] }
  0x1d   :  { %154 = vmatpush.bf16.msra.mxu0 %v2731_v40  ;;  %v2839_v37 = vor.u32 %v3247_v32, %v2836_v34  ;;  %v2843_v38 = vor.u32 %v3249_v36, %v2842_v35  ;;  %v2822_v39 = vld [vmem:[%s4953_s1 + $0xd8] sm:$0xf]  ;;  %v3245_v40 = vld [vmem:[%s4953_s1 + $0xe0] sm:$0xf0]  ;;  %v3244_v41 = vld [vmem:[%s4953_s1 + $0xdc] sm:$0xf] }
  0x1e   :  { %168 = vmatpush.bf16.msra.mxu1 %v2735_v43  ;;  %360 = vmatpush.bf16.msra.mxu2 %v2859_v15  ;;  %v2823_v42 = vor.u32 %v3245_v40, %v2822_v39  ;;  %v2824_v43 = vld [vmem:[%s4953_s1 + $0xe4] sm:$0xf0]  ;;  %v2830_v44 = vld [vmem:[%s4953_s1 + $0xe0] sm:$0xf]  ;;  %v3246_v45 = vld [vmem:[%s4953_s1 + $0xe8] sm:$0xf0] }
  0x1f   :  { %374 = vmatpush.bf16.msra.mxu3 %v2863_v19  ;;  %v2831_v47 = vor.u32 %v3246_v45, %v2830_v44  ;;  %v2810_v48 = vld [vmem:[%s4953_s1 + $0xc0] sm:$0xf]  ;;  %v3241_v50 = vld [vmem:[%s4953_s1 + $0xc4] sm:$0xf]  ;;  %v2812_v52 = vld [vmem:[%s4953_s1 + $0xcc] sm:$0xf0] }
  0x20   :  { %v2818_v53 = vld [vmem:[%s4953_s1 + $0xc8] sm:$0xf]  ;;  %v5017_v58 = vmov 0   ;;  %v5019_v23 = vmov 3   ;;  %v5005_v31 = vmov 6   ;;  %v5011_v32 = vmov 8  }
  0x21   :  { %155 = vmatpush.bf16.msra.mxu0 %v2723_v46  ;;  %v2827_v46 = vor.u32 %v3244_v41, %v2824_v43  ;;  %3350 = vset.pattern.permute.xlu1 %v5017_v58  ;;  %v34_v30 = vld [vmem:[%s4954_s2 + $0x8] sm:$0xff]  ;;  %v5007_v34 = vmov 10   ;;  %v5001_v35 = vmov 9   ;;  %v4997_v36 = vmov 12   ;;  %s2707_s23 = sld [smem:[#allocation2 + $0x20]] }
  0x22   :  { %169 = vmatpush.bf16.msra.mxu1 %v2727_v49  ;;  %361 = vmatpush.bf16.msra.mxu2 %v2847_v24  ;;  %v3242_v49 = vld [vmem:[%s4953_s1 + $0xc8] sm:$0xf0]  ;;  %v4957_v24 = vmov 1   ;;  %v4999_v39 = vmov 13   ;;  %v4995_v40 = vmov 15   ;;  %v4971_v41 = vmov 14  }
  0x23   :  { %375 = vmatpush.bf16.msra.mxu3 %v2851_v28  ;;  %v2811_v51 = vor.u32 %v3242_v49, %v2810_v48  ;;  %v5009_v28 = vmov 5   ;;  %v4993_v43 = vmov 16   ;;  %v4967_v44 = vmov 19   ;;  %v36_v48 = vld [vmem:[%s4954_s2 + $0x18] sm:$0xff]  ;;  %s2909_s24 = sld [smem:[#allocation2 + $0x1]] }
  0x24   :  { %v4991_v45 = vmov 18   ;;  %v4965_v49 = vmov 22   ;;  %vm451_vm2 = vcmask 64512   ;;  %s2910_s3 = sld [smem:[#allocation2 + $0x2]] }
  0x25   :  { %156 = vmatpush.bf16.msra.mxu0 %v2715_v54  ;;  %v3243_v54 = vld [vmem:[%s4953_s1 + $0xd0] sm:$0xf0]  ;;  %s2911_s25 = sld [smem:[#allocation2 + $0x3]] }
  0x26   :  { %170 = vmatpush.bf16.msra.mxu1 %v2719_v55  ;;  %362 = vmatpush.bf16.msra.mxu2 %v2835_v33  ;;  %v2815_v55 = vor.u32 %v3241_v50, %v2812_v52  ;;  %v5015_v33 = vmov 7   ;;  %v4963_v50 = vmov 24   ;;  %v37_v52 = vlaneseq  ;;  %s2912_s26 = sld [smem:[#allocation2 + $0x4]] }
  0x27   :  { %376 = vmatpush.bf16.msra.mxu3 %v2839_v37  ;;  %v5003_v37 = vmov 11   ;;  %s2913_s27 = sld [smem:[#allocation2 + $0x5]] }
  0x28   :  { %157 = vmatmul.bf16.vlgmr.msra.gmra.mxu0 %v3224_v57  ;;  %s2914_s28 = sld [smem:[#allocation2 + $0x6]] }
  0x29   :  { %385 = vmatpush.bf16.msrb.mxu0 %v2903_v56  ;;  %171 = vmatmul.bf16.vlgmr.msra.gmra.mxu1 %v3224_v57  ;;  %v2819_v56 = vor.u32 %v3243_v54, %v2818_v53  ;;  %v4977_v57 = vmov 2   ;;  %v3922_v53 = vshrl.u32 %v37_v52, 7  ;;  %v3924_v54 = vand.u32 127, %v37_v52  ;;  %s2915_s29 = sld [smem:[#allocation2 + $0x7]] }
  0x2a   :  { %363 = vmatpush.bf16.msra.mxu2 %v2823_v42  ;;  %3352 = vset.pattern.permute.xlu2 %v4977_v57  ;;  %v4969_v42 = vmov 17   ;;  %s2916_s30 = sld [smem:[#allocation2 + $0x8]] }
  0x2b   :  { %377 = vmatpush.bf16.msra.mxu3 %v2827_v46  ;;  %v4989_v46 = vmov 21   ;;  %5057 = vst [vmem:[#allocation8_spill] sm:$0xff] %v3922_v53  ;;  %vm41_vm1 = vcmp.eq.s32.totalorder %v3922_v53, %v3924_v54  ;;  %s2917_s5 = sld [smem:[#allocation2 + $0x9]] }
  0x2c   :  { %5058 = vst [vmem:[#allocation9_spill] sm:$0xff] %v3924_v54  ;;  %s2918_s6 = sld [smem:[#allocation2 + $0xa]] }
  0x2d   :  { %386 = vmatpush.bf16.msrb.mxu0 %v2891_v2  ;;  %s2919_s7 = sld [smem:[#allocation2 + $0xb]] }
  0x2e   :  { %364 = vmatpush.bf16.msra.mxu2 %v2811_v51  ;;  %v4983_v51 = vmov 23   ;;  %s4034_s8 = sld [smem:[#allocation2 + $0xc]] }
  0x2f   :  { %378 = vmatpush.bf16.msra.mxu3 %v2815_v55  ;;  %v4985_v55 = vmov 26   ;;  %s2921_s9 = sld [smem:[#allocation2 + $0xd]] }
  0x30   :  { %s2922_s10 = sld [smem:[#allocation2 + $0xe]] }
  0x31   :  { %387 = vmatpush.bf16.msrb.mxu0 %v2879_v11  ;;  %s2923_s11 = sld [smem:[#allocation2 + $0xf]] }
  0x32   :  { %s2924_s12 = sld [smem:[#allocation2 + $0x10]] }
  0x33   :  { %s2925_s13 = sld [smem:[#allocation2 + $0x11]] }
  0x34   :  { %s2926_s14 = sld [smem:[#allocation2 + $0x12]] }
  0x35   :  { %388 = vmatpush.bf16.msrb.mxu0 %v2867_v20  ;;  %s4081_s15 = sld [smem:[#allocation2 + $0x13]] }
  0x36   :  { %s2928_s16 = sld [smem:[#allocation2 + $0x14]] }
  0x37   :  { %s2929_s17 = sld [smem:[#allocation2 + $0x15]] }
  0x38   :  { %s2930_s18 = sld [smem:[#allocation2 + $0x16]] }
  0x39   :  { %389 = vmatpush.bf16.msrb.mxu0 %v2855_v29  ;;  %v5013_v29 = vmov 4   ;;  %s2931_s19 = sld [smem:[#allocation2 + $0x17]] }
  0x3a   :  { %s2932_s20 = sld [smem:[#allocation2 + $0x18]] }
  0x3b   :  { %s2933_s21 = sld [smem:[#allocation2 + $0x19]] }
  0x3c   :  { %s2934_s22 = sld [smem:[#allocation2 + $0x1a]] }
  0x3d   :  { %390 = vmatpush.bf16.msrb.mxu0 %v2843_v38  ;;  %v35_v38 = vld [vmem:[%s4954_s2 + $0x10] sm:$0xff]  ;;  %s2935_s0 = sld [smem:[#allocation2 + $0x1b]] }
  0x41   :  { %391 = vmatpush.bf16.msrb.mxu0 %v2831_v47  ;;  %v4987_v47 = vmov 20  }
  0x45   :  { %392 = vmatpush.bf16.msrb.mxu0 %v2819_v56  ;;  %v4979_v56 = vmov 25  }
  0xa5   :  { %v158_v59 = vpop.f32.mrf.mxu0 }
  0xa6   :  { %v183_v60 = vrot.slane %v158_v59, 4  ;;  %v172_v63 = vpop.f32.mrf.mxu1  ;;  %v190_v12 = vmul.f32 8.0, %v158_v59 }
  0xa8   :  { %v184_v61 = vadd.f32 %v183_v60, %v158_v59  ;;  %v5021_v59 = vmov 1.0   ;;  %v4975_v60 = vmov 28  }
  0xa9   :  { %2904 = vmatpush.msk.msrb.mxu1 %vm41_vm1, %v5021_v59 }
  0xaa   :  { %v185_v62 = vrot.slane %v184_v61, 2 }
  0xac   :  { %v186_v0 = vadd.f32 %v185_v62, %v184_v61  ;;  %v4961_v61 = vmov 27   ;;  %v4973_v62 = vmov 30  }
  0xad   :  { %v160_v1 = vpop.f32.mrf.mxu0 }
  0xae   :  { %v177_v2 = vrot.slane %v160_v1, 4  ;;  %v187_v4 = vrot.slane %v186_v0, 1  ;;  %v174_v8 = vpop.f32.mrf.mxu1  ;;  %v193_v13 = vmul.f32 8.0, %v160_v1 }
  0xb0   :  { %v178_v3 = vadd.f32 %v177_v2, %v160_v1  ;;  %v188_v7 = vadd.f32 %v187_v4, %v186_v0  ;;  %v33_v0 = vld [vmem:[%s4954_s2] sm:$0xff]  ;;  %v4981_v1 = vmov 31   ;;  %s501_s2 = sld [smem:[#allocation2]] }
  0xb2   :  { %v179_v5 = vrot.slane %v178_v3, 2  ;;  %v192_v11 = vadd.f32 %v188_v7, %v174_v8 }
  0xb4   :  { %v180_v6 = vadd.f32 %v179_v5, %v178_v3  ;;  %v194_v15 = vsub.f32 %v192_v11, %v193_v13 }
  0xb6   :  { %v181_v9 = vrot.slane %v180_v6, 1 }
  0xb8   :  { %v182_v10 = vadd.f32 %v181_v9, %v180_v6 }
  0xba   :  { %v189_v14 = vadd.f32 %v182_v10, %v172_v63  ;;  %v4959_v63 = vmov 29  }
  0xbc   :  { %v191_v16 = vsub.f32 %v189_v14, %v190_v12 }
  0xbe   :  { %v195_v17 = vpack.c.bf16 %v194_v15, %v191_v16 }
  0xc0   :  { %365 = vmatmul.bf16.vlgmr.msra.gmra.mxu2 %v195_v17  ;;  %379 = vmatmul.bf16.vlgmr.msra.gmra.mxu3 %v195_v17 }
  0xc1   :  { %393 = vmatmul.bf16.vlgmr.msrb.gmra.mxu0 %v195_v17 }
 0x13e   :  { %v3849_v18 = vpop.f32.mrf.mxu0 }
 0x13f   :  { %519 = vperm.xlu2 %3352, %v3849_v18   ;;  %497 = vperm.xlu1 %3350, %v3849_v18  }
 0x143   :  { %v3853_v19 = vpop.f32.mrf.mxu2 }
 0x144   :  { %v867_v20 = vpack.c.bf16 %v3853_v19, %v3853_v19 }
 0x146   :  { %v396_v21 = vpop.f32.mrf.mxu0  ;;  %v912_v22 = vsel %vm875_vm0, %v867_v20, 0 }
 0x147   :  { %3353 = vset.pattern.permute.xlu2 %v5019_v23  ;;  %3351 = vset.pattern.permute.xlu1 %v4957_v24  ;;  %v2978_v23 = vld [vmem:[%s4953_s1 + $0x180] sm:$0xf] }
 0x148   :  { %419 = vxpose.xlu0.b32.start.end [1/1] (short) (narrow) %v396_v21, 32  ;;  %530 = vperm.xlu2 %3353, %v3849_v18  }
 0x149   :  { %508 = vperm.xlu1 %3351, %v3849_v18   ;;  %924 = vmatpush.bf16.msrb.mxu3 %v912_v22 }
 0x14b   :  { %v3862_v25 = vpop.f32.mrf.mxu2 }
 0x14c   :  { %v868_v26 = vpack.c.bf16 %v3862_v25, %v3862_v25 }
 0x14e   :  { %v877_v27 = vsel %vm875_vm0, %v868_v26, 0 }
 0x14f   :  { %886 = vmatpush.bf16.msrb.mxu2 %v877_v27 }
 0x150   :  { %3355 = vset.pattern.permute.xlu2 %v5009_v28  ;;  %v4131_v28 = vstv %s2932_s20  ;;  %s2696_s20 = sshll.u32 %s4956_s4, 4  ;;  %s2697_s20 = int_to_ptr.hbm [resolvable:$true] %s2696_s20 }
 0x151   :  { %3354 = vset.pattern.permute.xlu1 %v5013_v29  ;;  %552 = vperm.xlu2 %3355, %v3849_v18   ;;  %5065 = vst [vmem:[#allocation16_spill] sm:$0xff] %v4131_v28 }
 0x152   :  { %541 = vperm.xlu1 %3354, %v3849_v18  }
 0x159   :  { %3357 = vset.pattern.permute.xlu2 %v5005_v31 }
 0x15a   :  { %3356 = vset.pattern.permute.xlu1 %v5017_v58  ;;  %563 = vperm.xlu2 %3357, %v3849_v18  }
 0x15b   :  { %406 = vperm.xlu1 %3356, %v34_v30  }
 0x162   :  { %3359 = vset.pattern.permute.xlu2 %v5011_v32 }
 0x163   :  { %3358 = vset.pattern.permute.xlu1 %v5015_v33  ;;  %585 = vperm.xlu2 %3359, %v3849_v18  }
 0x164   :  { %574 = vperm.xlu1 %3358, %v3849_v18  }
 0x16b   :  { %3361 = vset.pattern.permute.xlu2 %v5007_v34  ;;  %v4127_v34 = vstv %s2931_s19 }
 0x16c   :  { %3360 = vset.pattern.permute.xlu1 %v5001_v35  ;;  %607 = vperm.xlu2 %3361, %v3849_v18   ;;  %v4051_v35 = vstv %s2918_s6  ;;  %5064 = vst [vmem:[#allocation15_spill] sm:$0xff] %v4127_v34 }
 0x16d   :  { %596 = vperm.xlu1 %3360, %v3849_v18  }
 0x174   :  { %3363 = vset.pattern.permute.xlu2 %v4997_v36 }
 0x175   :  { %3362 = vset.pattern.permute.xlu1 %v5003_v37  ;;  %629 = vperm.xlu2 %3363, %v3849_v18  }
 0x176   :  { %618 = vperm.xlu1 %3362, %v3849_v18  }
 0x17d   :  { %3365 = vset.pattern.permute.xlu2 %v5017_v58 }
 0x17e   :  { %3364 = vset.pattern.permute.xlu1 %v4999_v39  ;;  %411 = vperm.xlu2 %3365, %v35_v38  }
 0x17f   :  { %640 = vperm.xlu1 %3364, %v3849_v18  }
 0x186   :  { %3367 = vset.pattern.permute.xlu2 %v4995_v40 }
 0x187   :  { %3366 = vset.pattern.permute.xlu1 %v4971_v41  ;;  %662 = vperm.xlu2 %3367, %v3849_v18   ;;  %v3990_v41 = vstv %s501_s2  ;;  %s2936_s2 = sld [smem:[#allocation2 + $0x1c]] }
 0x188   :  { %651 = vperm.xlu1 %3366, %v3849_v18  }
 0x18f   :  { %3369 = vset.pattern.permute.xlu2 %v4969_v42 }
 0x190   :  { %3368 = vset.pattern.permute.xlu1 %v4993_v43  ;;  %684 = vperm.xlu2 %3369, %v3849_v18   ;;  %v4017_v43 = vstv %s2913_s27 }
 0x191   :  { %673 = vperm.xlu1 %3368, %v3849_v18  }
 0x198   :  { %3371 = vset.pattern.permute.xlu2 %v4967_v44 }
 0x199   :  { %3370 = vset.pattern.permute.xlu1 %v4991_v45  ;;  %706 = vperm.xlu2 %3371, %v3849_v18   ;;  %v520_v7 = vpop.permute.xlu2 %519 }
 0x19a   :  { %695 = vperm.xlu1 %3370, %v3849_v18  }
 0x1a1   :  { %3373 = vset.pattern.permute.xlu2 %v4989_v46 }
 0x1a2   :  { %3372 = vset.pattern.permute.xlu1 %v4987_v47  ;;  %728 = vperm.xlu2 %3373, %v3849_v18   ;;  %v531_v9 = vpop.permute.xlu2 %530 }
 0x1a3   :  { %717 = vperm.xlu1 %3372, %v3849_v18  }
 0x1aa   :  { %3375 = vset.pattern.permute.xlu2 %v4965_v49 }
 0x1ab   :  { %3374 = vset.pattern.permute.xlu1 %v5017_v58  ;;  %739 = vperm.xlu2 %3375, %v3849_v18   ;;  %v553_v11 = vpop.permute.xlu2 %552 }
 0x1ac   :  { %416 = vperm.xlu1 %3374, %v36_v48  }
 0x1af   :  { %3349 = vset.pattern.permute.xlu0 %v5017_v58 }
 0x1b1   :  { %v498_v5 = vpop.permute.xlu1 %497 }
 0x1b3   :  { %3377 = vset.pattern.permute.xlu2 %v4963_v50 }
 0x1b4   :  { %3376 = vset.pattern.permute.xlu1 %v4983_v51  ;;  %761 = vperm.xlu2 %3377, %v3849_v18   ;;  %v564_v13 = vpop.permute.xlu2 %563 }
 0x1b5   :  { %750 = vperm.xlu1 %3376, %v3849_v18  }
 0x1bb   :  { %v509_v8 = vpop.permute.xlu1 %508 }
 0x1bc   :  { %3379 = vset.pattern.permute.xlu2 %v4985_v55 }
 0x1bd   :  { %3378 = vset.pattern.permute.xlu1 %v4979_v56  ;;  %783 = vperm.xlu2 %3379, %v3849_v18   ;;  %v3959_v15 = vpop.permute.xlu2 %585 }
 0x1be   :  { %772 = vperm.xlu1 %3378, %v3849_v18  }
 0x1c4   :  { %v542_v10 = vpop.permute.xlu1 %541 }
 0x1c5   :  { %3381 = vset.pattern.permute.xlu2 %v4975_v60 }
 0x1c6   :  { %3380 = vset.pattern.permute.xlu1 %v4961_v61  ;;  %805 = vperm.xlu2 %3381, %v3849_v18   ;;  %v3963_v17 = vpop.permute.xlu2 %607 }
 0x1c7   :  { %794 = vperm.xlu1 %3380, %v3849_v18  }
 0x1cd   :  { %v3955_v12 = vpop.permute.xlu1 %406 }
 0x1ce   :  { %3383 = vset.pattern.permute.xlu2 %v4973_v62  ;;  %401 = vperm.xlu0 %3349, %v33_v0  }
 0x1cf   :  { %3382 = vset.pattern.permute.xlu1 %v4959_v63  ;;  %827 = vperm.xlu2 %3383, %v3849_v18   ;;  %v3967_v20 = vpop.permute.xlu2 %629 }
 0x1d0   :  { %816 = vperm.xlu1 %3382, %v3849_v18  }
 0x1d6   :  { %3387 = vset.pattern.permute.xlu0 %v4957_v24  ;;  %v3957_v14 = vpop.permute.xlu1 %574 }
 0x1d8   :  { %3384 = vset.pattern.permute.xlu1 %v4981_v1  ;;  %v3971_v22 = vpop.permute.xlu2 %411  ;;  %v3994_v1 = vstv %s2909_s24  ;;  %s2938_s24 = sld [smem:[#allocation2 + $0x1e]] }
 0x1d9   :  { %838 = vperm.xlu1 %3384, %v3849_v18   ;;  %5060 = vst [vmem:[#allocation11_spill] sm:$0xff] %v3994_v1 }
 0x1de   :  { %v4152_v33 = vstv %s2938_s24 }
 0x1df   :  { %v3961_v16 = vpop.permute.xlu1 %596  ;;  %5071 = vst [vmem:[#allocation22_spill] sm:$0xff] %v4152_v33 }
 0x1e1   :  { %3385 = vset.pattern.permute.xlu1 %v5017_v58  ;;  %v3975_v27 = vpop.permute.xlu2 %662 }
 0x1e8   :  { %v3965_v18 = vpop.permute.xlu1 %618 }
 0x1ea   :  { %v3979_v38 = vpop.permute.xlu2 %684 }
 0x1ec   :  { %v435_v2 = vpop.trf.xlu0 }
 0x1ed   :  { %2905 = vmatmul.msk.f32.vlgmr.msrb.gmra.mxu1 %vm451_vm2, %v435_v2 }
 0x1f1   :  { %v3969_v21 = vpop.permute.xlu1 %640 }
 0x1f3   :  { %v3985_v0 = vpop.permute.xlu2 %706 }
 0x1f4   :  { %v436_v3 = vpop.trf.xlu0 }
 0x1f5   :  { %2906 = vmatmul.msk.f32.gmra.mxu1 %vm451_vm2, %v436_v3 }
 0x1fa   :  { %v3973_v26 = vpop.permute.xlu1 %651 }
 0x1fc   :  { %v437_v4 = vpop.trf.xlu0 }
 0x1fd   :  { %2907 = vmatmul.msk.f32.gmra.mxu1 %vm451_vm2, %v437_v4 }
 0x203   :  { %v3977_v30 = vpop.permute.xlu1 %673 }
 0x204   :  { %v438_v6 = vpop.trf.xlu0 }
 0x205   :  { %2908 = vmatmul.msk.f32.gmra.mxu1 %vm451_vm2, %v438_v6 }
 0x20c   :  { %v3981_v48 = vpop.permute.xlu1 %695 }
 0x215   :  { %v3988_v61 = vpop.permute.xlu1 %717 }
 0x21e   :  { %v4006_v46 = vpop.permute.xlu1 %416 }
 0x240   :  { %v3983_v52 = vpop.permute.xlu0 %401 }
 0x241   :  { %5059 = vst [vmem:[#allocation10_spill] sm:$0xff] %v3983_v52 }
 0x26a   :  { %v481_v2 = vpop.f32.mrf.mxu1 }
 0x26b   :  { %v482_v3 = vadd.f32 %v481_v2, %v3983_v52  ;;  %v3992_v2 = vstv %s2707_s23  ;;  %s2937_s23 = sld [smem:[#allocation2 + $0x1d]] }
 0x26d   :  { %v494_v4 = vperm.slane %v482_v3, 0  ;;  %v506_v6 = vperm.slane %v482_v3, 1  ;;  %v517_v24 = vperm.slane %v482_v3, 2  ;;  %v528_v63 = vperm.slane %v482_v3, 3 }
 0x26e   :  { %v539_v42 = vperm.slane %v482_v3, 4  ;;  %v550_v62 = vperm.slane %v482_v3, 5  ;;  %v561_v51 = vperm.slane %v482_v3, 6 }
 0x26f   :  { %v500_v50 = vsub.f32 %v494_v4, %v498_v5  ;;  %v511_v49 = vsub.f32 %v506_v6, %v509_v8  ;;  %v522_v44 = vsub.f32 %v517_v24, %v520_v7  ;;  %v533_v56 = vsub.f32 %v528_v63, %v531_v9  ;;  %v3997_v24 = vpop.permute.xlu2 %728 }
 0x270   :  { %v544_v8 = vsub.f32 %v539_v42, %v542_v10  ;;  %v3999_v7 = vstv %s2910_s3  ;;  %v555_v4 = vsub.f32 %v550_v62, %v553_v11  ;;  %v566_v42 = vsub.f32 %v561_v51, %v564_v13  ;;  %s2939_s3 = sld [smem:[#allocation2 + $0x1f]] }
 0x271   :  { %v502_v60 = vmax.f32 %v500_v50, 0.0  ;;  %v513_v57 = vmax.f32 %v511_v49, 0.0  ;;  %v524_v5 = vmax.f32 %v522_v44, 0.0  ;;  %v572_v50 = vperm.slane %v482_v3, 7 }
 0x272   :  { %v484_v55 = vpop.f32.mrf.mxu1  ;;  %v535_v9 = vmax.f32 %v533_v56, 0.0  ;;  %v546_v45 = vmax.f32 %v544_v8, 0.0  ;;  %v4012_v11 = vstv %s2912_s26  ;;  %v557_v56 = vmax.f32 %v555_v4, 0.0 }
 0x273   :  { %v504_v47 = vmul.f32 %v3990_v41, %v502_v60  ;;  %v515_v63 = vmul.f32 %v3994_v1, %v513_v57  ;;  %v4004_v6 = vadd.f32 %v484_v55, %v3955_v12  ;;  %v4008_v60 = vstv %s2911_s25 }
 0x274   :  { %v526_v10 = vmul.f32 %v3999_v7, %v524_v5  ;;  %v577_v57 = vsub.f32 %v572_v50, %v3957_v14  ;;  %v537_v55 = vmul.f32 %v4008_v60, %v535_v9  ;;  %v568_v51 = vmax.f32 %v566_v42, 0.0 }
 0x275   :  { %v505_v49 = vadd.f32 %v504_v47, %v3992_v2  ;;  %v583_v62 = vperm.slane %v4004_v6, 0  ;;  %v594_v3 = vperm.slane %v4004_v6, 1  ;;  %v548_v5 = vmul.f32 %v4012_v11, %v546_v45 }
 0x276   :  { %v579_v14 = vmax.f32 %v577_v57, 0.0  ;;  %v559_v4 = vmul.f32 %v4017_v43, %v557_v56  ;;  %v627_v45 = vperm.slane %v4004_v6, 4  ;;  %v638_v56 = vperm.slane %v4004_v6, 5 }
 0x277   :  { %v516_v44 = vadd.f32 %v515_v63, %v505_v49  ;;  %v588_v8 = vsub.f32 %v583_v62, %v3959_v15  ;;  %v605_v49 = vperm.slane %v4004_v6, 2  ;;  %v4022_v63 = vstv %s2914_s28  ;;  %v4027_v42 = vpop.permute.xlu2 %739 }
 0x278   :  { %v599_v9 = vsub.f32 %v594_v3, %v3961_v16  ;;  %v570_v62 = vmul.f32 %v4022_v63, %v568_v51  ;;  %v4038_v16 = vstv %s2916_s30  ;;  %v4043_v51 = vstv %s2917_s5 }
 0x279   :  { %v527_v47 = vadd.f32 %v526_v10, %v516_v44  ;;  %v616_v44 = vperm.slane %v4004_v6, 3  ;;  %v4029_v10 = vstv %s2915_s29  ;;  %v610_v57 = vsub.f32 %v605_v49, %v3963_v17 }
 0x27a   :  { %v487_v3 = vpop.f32.mrf.mxu1  ;;  %v601_v40 = vmax.f32 %v599_v9, 0.0  ;;  %v632_v17 = vsub.f32 %v627_v45, %v3967_v20  ;;  %v660_v20 = vperm.slane %v4004_v6, 7  ;;  %v4056_v45 = vstv %s2919_s7 }
 0x27b   :  { %v538_v13 = vadd.f32 %v537_v55, %v527_v47  ;;  %v590_v47 = vmax.f32 %v588_v8, 0.0  ;;  %v4036_v55 = vpop.permute.xlu1 %750  ;;  %v649_v8 = vperm.slane %v4004_v6, 6  ;;  %v612_v36 = vmax.f32 %v610_v57, 0.0 }
 0x27c   :  { %v4049_v39 = vadd.f32 %v487_v3, %v3971_v22  ;;  %v603_v9 = vmul.f32 %v4043_v51, %v601_v40  ;;  %v634_v57 = vmax.f32 %v632_v17, 0.0  ;;  %v4066_v40 = vstv %s2921_s9 }
 0x27d   :  { %v549_v50 = vadd.f32 %v548_v5, %v538_v13  ;;  %v581_v13 = vmul.f32 %v4029_v10, %v579_v14  ;;  %v643_v14 = vsub.f32 %v638_v56, %v3969_v21  ;;  %v4064_v21 = vstv %s4034_s8 }
 0x27e   :  { %v671_v3 = vperm.slane %v4049_v39, 0 }
 0x27f   :  { %v560_v15 = vadd.f32 %v559_v4, %v549_v50  ;;  %v621_v50 = vsub.f32 %v616_v44, %v3965_v18  ;;  %v592_v4 = vmul.f32 %v4038_v16, %v590_v47  ;;  %v614_v47 = vmul.f32 %v4051_v35, %v612_v36 }
 0x280   :  { %v645_v56 = vmax.f32 %v643_v14, 0.0  ;;  %v693_v36 = vperm.slane %v4049_v39, 2  ;;  %v676_v14 = vsub.f32 %v671_v3, %v3977_v30 }
 0x281   :  { %v571_v5 = vadd.f32 %v570_v62, %v560_v15  ;;  %v623_v44 = vmax.f32 %v621_v50, 0.0  ;;  %v654_v15 = vsub.f32 %v649_v8, %v3973_v26  ;;  %v665_v26 = vsub.f32 %v660_v20, %v3975_v27 }
 0x282   :  { %v682_v50 = vperm.slane %v4049_v39, 1 }
 0x283   :  { %v582_v49 = vadd.f32 %v581_v13, %v571_v5  ;;  %v4061_v13 = vpop.permute.xlu2 %761  ;;  %v625_v5 = vmul.f32 %v4056_v45, %v623_v44  ;;  %v4071_v8 = vpop.permute.xlu1 %772  ;;  %v667_v27 = vmax.f32 %v665_v26, 0.0 }
 0x284   :  { %v687_v20 = vsub.f32 %v682_v50, %v3979_v38  ;;  %v490_v38 = vpop.f32.mrf.mxu1 }
 0x285   :  { %v593_v18 = vadd.f32 %v592_v4, %v582_v49  ;;  %v636_v49 = vmul.f32 %v4064_v21, %v634_v57  ;;  %v656_v4 = vmax.f32 %v654_v15, 0.0  ;;  %v698_v57 = vsub.f32 %v693_v36, %v3981_v48 }
 0x286   :  { %v715_v15 = vperm.slane %v4049_v39, 4  ;;  %v4093_v48 = vstv %s2925_s13 }
 0x287   :  { %v604_v62 = vadd.f32 %v603_v9, %v593_v18  ;;  %v647_v18 = vmul.f32 %v4066_v40, %v645_v56  ;;  %v4077_v9 = vstv %s2922_s10  ;;  %v678_v56 = vmax.f32 %v676_v14, 0.0 }
 0x288   :  { %v658_v3 = vmul.f32 %v4077_v9, %v656_v4  ;;  %v700_v36 = vmax.f32 %v698_v57, 0.0 }
 0x289   :  { %v615_v6 = vadd.f32 %v614_v47, %v604_v62  ;;  %v704_v62 = vperm.slane %v4049_v39, 3  ;;  %v4083_v47 = vstv %s2923_s11 }
 0x28a   :  { %v669_v50 = vmul.f32 %v4083_v47, %v667_v27 }
 0x28b   :  { %v626_v17 = vadd.f32 %v625_v5, %v615_v6  ;;  %v4088_v6 = vstv %s2924_s12  ;;  %v726_v5 = vperm.slane %v4049_v39, 5  ;;  %v784_v37 = vpop.permute.xlu2 %783  ;;  %v795_v27 = vpop.permute.xlu1 %794 }
 0x28c   :  { %v680_v14 = vmul.f32 %v4088_v6, %v678_v56 }
 0x28d   :  { %v637_v44 = vadd.f32 %v636_v49, %v626_v17  ;;  %v689_v17 = vmax.f32 %v687_v20, 0.0  ;;  %v709_v49 = vsub.f32 %v704_v62, %v3985_v0  ;;  %v4101_v20 = vstv %s2926_s14 }
 0x28e   :  { %v731_v0 = vsub.f32 %v726_v5, %v3997_v24 }
 0x28f   :  { %v648_v30 = vadd.f32 %v647_v18, %v637_v44  ;;  %v720_v18 = vsub.f32 %v715_v15, %v3988_v61  ;;  %v737_v44 = vperm.slane %v4049_v39, 6  ;;  %v691_v57 = vmul.f32 %v4093_v48, %v689_v17 }
 0x290   :  { %v748_v61 = vperm.slane %v4049_v39, 7  ;;  %v4107_v15 = vstv %s4081_s15  ;;  %v733_v5 = vmax.f32 %v731_v0, 0.0 }
 0x291   :  { %v659_v26 = vadd.f32 %v658_v3, %v648_v30  ;;  %v4099_v30 = vadd.f32 %v490_v38, %v4006_v46  ;;  %v711_v3 = vmax.f32 %v709_v49, 0.0  ;;  %v722_v56 = vmax.f32 %v720_v18, 0.0 }
 0x292   :  { %v742_v31 = vsub.f32 %v737_v44, %v4027_v42  ;;  %v753_v39 = vsub.f32 %v748_v61, %v4036_v55 }
 0x293   :  { %v670_v4 = vadd.f32 %v669_v50, %v659_v26  ;;  %v4109_v26 = vstv %s2928_s16  ;;  %v702_v50 = vmul.f32 %v4101_v20, %v700_v36  ;;  %v759_v24 = vperm.slane %v4099_v30, 0  ;;  %v806_v0 = vpop.permute.xlu2 %805 }
 0x294   :  { %5061 = vst [vmem:[#allocation12_spill] sm:$0xff] %v4109_v26  ;;  %v713_v17 = vmul.f32 %v4107_v15, %v711_v3  ;;  %v770_v49 = vperm.slane %v4099_v30, 1  ;;  %v724_v18 = vmul.f32 %v4109_v26, %v722_v56  ;;  %v744_v36 = vmax.f32 %v742_v31, 0.0 }
 0x295   :  { %v681_v62 = vadd.f32 %v680_v14, %v670_v4  ;;  %v4118_v14 = vstv %s2929_s17  ;;  %v764_v42 = vsub.f32 %v759_v24, %v4061_v13  ;;  %v781_v44 = vperm.slane %v4099_v30, 2 }
 0x296   :  { %5062 = vst [vmem:[#allocation13_spill] sm:$0xff] %v4118_v14  ;;  %v792_v3 = vperm.slane %v4099_v30, 3  ;;  %v735_v61 = vmul.f32 %v4118_v14, %v733_v5  ;;  %v775_v56 = vsub.f32 %v770_v49, %v4071_v8  ;;  %v803_v31 = vperm.slane %v4099_v30, 4 }
 0x297   :  { %v692_v38 = vadd.f32 %v691_v57, %v681_v62  ;;  %v4122_v57 = vstv %s2930_s18  ;;  %v814_v8 = vperm.slane %v4099_v30, 5  ;;  %v4135_v49 = vstv %s2933_s21 }
 0x298   :  { %5063 = vst [vmem:[#allocation14_spill] sm:$0xff] %v4122_v57  ;;  %v746_v24 = vmul.f32 %v4122_v57, %v744_v36  ;;  %v797_v32 = vsub.f32 %v792_v3, %v795_v27 }
 0x299   :  { %v703_v4 = vadd.f32 %v702_v50, %v692_v38  ;;  %v755_v38 = vmax.f32 %v753_v39, 0.0  ;;  %v817_v50 = vpop.permute.xlu1 %816  ;;  %v777_v39 = vmax.f32 %v775_v56, 0.0  ;;  %5066 = vst [vmem:[#allocation17_spill] sm:$0xff] %v4135_v49 }
 0x29a   :  { %v799_v27 = vmax.f32 %v797_v32, 0.0 }
 0x29b   :  { %v714_v62 = vadd.f32 %v713_v17, %v703_v4  ;;  %v766_v4 = vmax.f32 %v764_v42, 0.0  ;;  %v786_v17 = vsub.f32 %v781_v44, %v784_v37  ;;  %v757_v5 = vmul.f32 %v4127_v34, %v755_v38  ;;  %v828_v56 = vpop.permute.xlu2 %827 }
 0x29c   :  { %v825_v37 = vperm.slane %v4099_v30, 6  ;;  %v4139_v42 = vstv %s2934_s22  ;;  %v779_v3 = vmul.f32 %v4135_v49, %v777_v39  ;;  %v836_v38 = vperm.slane %v4099_v30, 7 }
 0x29d   :  { %v725_v55 = vadd.f32 %v724_v18, %v714_v62  ;;  %v808_v62 = vsub.f32 %v803_v31, %v806_v0  ;;  %v788_v36 = vmax.f32 %v786_v17, 0.0  ;;  %5067 = vst [vmem:[#allocation18_spill] sm:$0xff] %v4139_v42 }
 0x29f   :  { %v736_v13 = vadd.f32 %v735_v61, %v725_v55  ;;  %v768_v55 = vmul.f32 %v4131_v28, %v766_v4  ;;  %v819_v61 = vsub.f32 %v814_v8, %v817_v50  ;;  %v790_v31 = vmul.f32 %v4139_v42, %v788_v36 }
 0x2a0   :  { %v830_v4 = vsub.f32 %v825_v37, %v828_v56  ;;  %v4149_v50 = vstv %s2937_s23  ;;  %v4155_v37 = vstv %s2939_s3 }
 0x2a1   :  { %v747_v18 = vadd.f32 %v746_v24, %v736_v13  ;;  %v4143_v13 = vstv %s2935_s0  ;;  %v810_v24 = vmax.f32 %v808_v62, 0.0  ;;  %v839_v17 = vpop.permute.xlu1 %838  ;;  %5070 = vst [vmem:[#allocation21_spill] sm:$0xff] %v4149_v50 }
 0x2a2   :  { %5068 = vst [vmem:[#allocation19_spill] sm:$0xff] %v4143_v13  ;;  %v841_v39 = vsub.f32 %v836_v38, %v839_v17 }
 0x2a3   :  { %v758_v29 = vadd.f32 %v757_v5, %v747_v18  ;;  %v4146_v5 = vstv %s2936_s2  ;;  %v821_v18 = vmax.f32 %v819_v61, 0.0  ;;  %5072 = vst [vmem:[#allocation23_spill] sm:$0xff] %v4155_v37 }
 0x2a4   :  { %5069 = vst [vmem:[#allocation20_spill] sm:$0xff] %v4146_v5  ;;  %v812_v8 = vmul.f32 %v4146_v5, %v810_v24  ;;  %v843_v36 = vmax.f32 %v841_v39, 0.0 }
 0x2a5   :  { %v769_v44 = vadd.f32 %v768_v55, %v758_v29  ;;  %v801_v29 = vmul.f32 %v4143_v13, %v799_v27  ;;  %v832_v55 = vmax.f32 %v830_v4, 0.0  ;;  %v823_v62 = vmul.f32 %v4149_v50, %v821_v18 }
 0x2a6   :  { %v845_v61 = vmul.f32 %v4155_v37, %v843_v36 }
 0x2a7   :  { %v780_v0 = vadd.f32 %v779_v3, %v769_v44  ;;  %v834_v56 = vmul.f32 %v4152_v33, %v832_v55 }
 0x2a9   :  { %v791_v32 = vadd.f32 %v790_v31, %v780_v0 }
 0x2ab   :  { %v802_v30 = vadd.f32 %v801_v29, %v791_v32 }
 0x2ad   :  { %v813_v44 = vadd.f32 %v812_v8, %v802_v30 }
 0x2af   :  { %v824_v3 = vadd.f32 %v823_v62, %v813_v44 }
 0x2b1   :  { %v835_v27 = vadd.f32 %v834_v56, %v824_v3  ;;  %v4164_v3 = vsel %vm875_vm0, 1065369472, %v5017_v58 }
 0x2b2   :  { %5073 = vst [vmem:[#allocation24_spill] sm:$0xff] %v4164_v3  ;;  %937 = vmatpush.bf16.msra.mxu2 %v4164_v3 }
 0x2b3   :  { %v846_v38 = vadd.f32 %v845_v61, %v835_v27 }
 0x2b5   :  { %v2940_v0 = vmul.f32 -1.442695, %v846_v38  ;;  %v3062_v38 = vld [vmem:[%s4953_s1 + $0x228] sm:$0xf] }
 0x2b7   :  { %3485 = vpow2.f32 %v2940_v0  ;;  %v3287_v0 = vld [vmem:[%s4953_s1 + $0x230] sm:$0xf0] }
 0x2bd   :  { %v3486_v31 = vpop.eup %3485 }
 0x2be   :  { %v850_v24 = vadd.f32 1.0, %v3486_v31  ;;  %v3286_v31 = vld [vmem:[%s4953_s1 + $0x22c] sm:$0xf] }
 0x2c0   :  { %3487 = vrcp.f32 %v850_v24  ;;  %v862_v29 = vand.u32 2147483648, %v850_v24  ;;  %v860_v39 = vand.u32 2147483647, %v850_v24  ;;  %vm856_vm4 = vweird.f32 %v850_v24 }
 0x2c2   :  { %v863_v8 = vor.u32 1.1754944e-38, %v862_v29  ;;  %vm861_vm6 = vcmp.eq.f32.partialorder %v860_v39, 8.507059e+37  ;;  %v3050_v39 = vld [vmem:[%s4953_s1 + $0x210] sm:$0xf] }
 0x2c6   :  { %v3488_v4 = vpop.eup %3487 }
 0x2c7   :  { %v852_v17 = vmul.f32 %v3488_v4, %v850_v24  ;;  %vm857_vm3 = vweird.f32 %v3488_v4  ;;  %v3063_v24 = vor.u32 %v3287_v0, %v3062_v38  ;;  %v3038_v38 = vld [vmem:[%s4953_s1 + $0x1f8] sm:$0xf]  ;;  %v3281_v0 = vld [vmem:[%s4953_s1 + $0x200] sm:$0xf0] }
 0x2c8   :  { %vm858_vm5 = vmor %vm856_vm4, %vm857_vm3 }
 0x2c9   :  { %v853_v32 = vsub.f32 1.0, %v852_v17  ;;  %v3070_v17 = vld [vmem:[%s4953_s1 + $0x230] sm:$0xf]  ;;  %1116 = vmatpush.bf16.msra.mxu1 %v3063_v24  ;;  %v3040_v24 = vld [vmem:[%s4953_s1 + $0x204] sm:$0xf0] }
 0x2cb   :  { %v854_v18 = vmul.f32 %v3488_v4, %v853_v32  ;;  %v3288_v32 = vld [vmem:[%s4953_s1 + $0x238] sm:$0xf0] }
 0x2cd   :  { %v855_v30 = vadd.f32 %v3488_v4, %v854_v18  ;;  %v3071_v18 = vor.u32 %v3288_v32, %v3070_v17  ;;  %v3282_v17 = vld [vmem:[%s4953_s1 + $0x208] sm:$0xf0]  ;;  %v4229_v32 = vpop.f32.mrf.mxu3 }
 0x2cf   :  { %v859_v55 = vsel %vm858_vm5, %v3488_v4, %v855_v30  ;;  %v3064_v4 = vld [vmem:[%s4953_s1 + $0x234] sm:$0xf0]  ;;  %v3284_v30 = vld [vmem:[%s4953_s1 + $0x218] sm:$0xf0]  ;;  %1144 = vmatpush.bf16.msra.mxu0 %v3071_v18 }
 0x2d0   :  { %v864_v44 = vsel %vm861_vm6, %v863_v8, %v859_v55  ;;  %v3067_v29 = vor.u32 %v3286_v31, %v3064_v4  ;;  %v3283_v8 = vld [vmem:[%s4953_s1 + $0x214] sm:$0xf]  ;;  %v3051_v55 = vor.u32 %v3284_v30, %v3050_v39  ;;  %v3280_v31 = vld [vmem:[%s4953_s1 + $0x1fc] sm:$0xf]  ;;  %v3046_v4 = vld [vmem:[%s4953_s1 + $0x200] sm:$0xf] }
 0x2d1   :  { %v869_v62 = vsel %vm451_vm2, %v864_v44, 0.0  ;;  %v866_v36 = vpack.c.bf16 %v864_v44, %v864_v44  ;;  %v3052_v44 = vld [vmem:[%s4953_s1 + $0x21c] sm:$0xf0]  ;;  %v3043_v18 = vor.u32 %v3280_v31, %v3040_v24  ;;  %v3047_v39 = vor.u32 %v3282_v17, %v3046_v4  ;;  %v3275_v31 = vld [vmem:[%s4953_s1 + $0x1d0] sm:$0xf0] }
 0x2d2   :  { %870 = vadd.xlane.f32.xlu0 %v869_v62  ;;  %v3058_v62 = vld [vmem:[%s4953_s1 + $0x218] sm:$0xf]  ;;  %1130 = vmatpush.bf16.msra.mxu3 %v3067_v29  ;;  %v3039_v29 = vor.u32 %v3281_v0, %v3038_v38  ;;  %v3026_v30 = vld [vmem:[%s4953_s1 + $0x1e0] sm:$0xf]  ;;  %v3014_v0 = vld [vmem:[%s4953_s1 + $0x1c8] sm:$0xf] }
 0x2d3   :  { %892 = vxpose.xlu2.c.b16.start.end [1/1] (short) (narrow) %v866_v36, 16  ;;  %2941 = vmatmul.msk.bf16.vlgmr.msrb.gmra.mxu2 %vm451_vm2, %v866_v36  ;;  %v3285_v36 = vld [vmem:[%s4953_s1 + $0x220] sm:$0xf0]  ;;  %v3274_v24 = vld [vmem:[%s4953_s1 + $0x1cc] sm:$0xf] }
 0x2d4   :  { %3072 = vmatpush.msk.msrb.mxu2 %vm41_vm1, %v5021_v59  ;;  %1117 = vmatpush.bf16.msra.mxu1 %v3051_v55  ;;  %v3028_v55 = vld [vmem:[%s4953_s1 + $0x1ec] sm:$0xf0]  ;;  %v3016_v4 = vld [vmem:[%s4953_s1 + $0x1d4] sm:$0xf0] }
 0x2d5   :  { %v3022_v17 = vld [vmem:[%s4953_s1 + $0x1d0] sm:$0xf] }
 0x2d8   :  { %1118 = vmatpush.bf16.msra.mxu1 %v3039_v29  ;;  %v3276_v29 = vld [vmem:[%s4953_s1 + $0x1d8] sm:$0xf0] }
 0x335   :  { %3386 = vset.pattern.permute.xlu2 %v5017_v58 }
 0x356   :  { %v4171_v56 = vpop.f32.mrf.mxu2 }
 0x35e   :  { %v890_v27 = vpop.f32.mrf.mxu2 }
 0x35f   :  { %v3055_v27 = vor.u32 %v3283_v8, %v3052_v44  ;;  %v3278_v8 = vld [vmem:[%s4953_s1 + $0x1e8] sm:$0xf0]  ;;  %v3277_v44 = vld [vmem:[%s4953_s1 + $0x1e4] sm:$0xf] }
 0x361   :  { %1131 = vmatpush.bf16.msra.mxu3 %v3055_v27  ;;  %v3027_v27 = vor.u32 %v3278_v8, %v3026_v30  ;;  %v3019_v30 = vor.u32 %v3274_v24, %v3016_v4  ;;  %v3023_v8 = vor.u32 %v3276_v29, %v3022_v17  ;;  %v2990_v24 = vld [vmem:[%s4953_s1 + $0x198] sm:$0xf]  ;;  %v3269_v4 = vld [vmem:[%s4953_s1 + $0x1a0] sm:$0xf0]  ;;  %v3268_v17 = vld [vmem:[%s4953_s1 + $0x19c] sm:$0xf] }
 0x362   :  { %v2992_v29 = vld [vmem:[%s4953_s1 + $0x1a4] sm:$0xf0] }
 0x363   :  { %1119 = vmatpush.bf16.msra.mxu1 %v3027_v27  ;;  %v3010_v27 = vld [vmem:[%s4953_s1 + $0x1b8] sm:$0xf] }
 0x365   :  { %1132 = vmatpush.bf16.msra.mxu3 %v3043_v18  ;;  %v3015_v18 = vor.u32 %v3275_v31, %v3014_v0 }
 0x367   :  { %1120 = vmatpush.bf16.msra.mxu1 %v3015_v18  ;;  %v2998_v18 = vld [vmem:[%s4953_s1 + $0x1a0] sm:$0xf] }
 0x374   :  { %v900_v61 = vpop.trf.xlu2 }
 0x375   :  { %2942 = vmatmul.msk.bf16.vlgmr.msrb.gmra.mxu3 %vm451_vm2, %v900_v61  ;;  %2943 = vmatmul.msk.bf16.vlgmr.msra.gmra.mxu2 %vm451_vm2, %v900_v61  ;;  %v3059_v61 = vor.u32 %v3285_v36, %v3058_v62  ;;  %v3034_v62 = vld [vmem:[%s4953_s1 + $0x1e8] sm:$0xf]  ;;  %v3279_v36 = vld [vmem:[%s4953_s1 + $0x1f0] sm:$0xf0] }
 0x376   :  { %v3035_v38 = vor.u32 %v3279_v36, %v3034_v62  ;;  %v3271_v62 = vld [vmem:[%s4953_s1 + $0x1b4] sm:$0xf]  ;;  %v3004_v36 = vld [vmem:[%s4953_s1 + $0x1bc] sm:$0xf0] }
 0x377   :  { %1145 = vmatpush.bf16.msra.mxu0 %v3059_v61  ;;  %v3031_v61 = vor.u32 %v3277_v44, %v3028_v55  ;;  %v3002_v44 = vld [vmem:[%s4953_s1 + $0x1b0] sm:$0xf]  ;;  %v3272_v55 = vld [vmem:[%s4953_s1 + $0x1b8] sm:$0xf0]  ;;  %v3007_v0 = vor.u32 %v3271_v62, %v3004_v36  ;;  %v2995_v62 = vor.u32 %v3268_v17, %v2992_v29  ;;  %v943_v29 = vadd.f32 %v4171_v56, %v4229_v32 }
 0x379   :  { %1133 = vmatpush.bf16.msra.mxu3 %v3031_v61  ;;  %v3273_v61 = vld [vmem:[%s4953_s1 + $0x1c0] sm:$0xf0] }
 0x37a   :  { %v3011_v31 = vor.u32 %v3273_v61, %v3010_v27 }
 0x37b   :  { %1146 = vmatpush.bf16.msra.mxu0 %v3047_v39  ;;  %v382_v39 = vpop.f32.mrf.mxu3 }
 0x37d   :  { %1134 = vmatpush.bf16.msra.mxu3 %v3019_v30  ;;  %v3270_v30 = vld [vmem:[%s4953_s1 + $0x1a8] sm:$0xf0] }
 0x37e   :  { %v2999_v36 = vor.u32 %v3270_v30, %v2998_v18 }
 0x37f   :  { %1147 = vmatpush.bf16.msra.mxu0 %v3035_v38  ;;  %v3003_v38 = vor.u32 %v3272_v55, %v3002_v44 }
 0x381   :  { %1121 = vmatpush.bf16.msra.mxu1 %v3003_v38  ;;  %1135 = vmatpush.bf16.msra.mxu3 %v3007_v0  ;;  %v3266_v38 = vld [vmem:[%s4953_s1 + $0x188] sm:$0xf0]  ;;  %v3265_v0 = vld [vmem:[%s4953_s1 + $0x184] sm:$0xf] }
 0x383   :  { %1148 = vmatpush.bf16.msra.mxu0 %v3023_v8  ;;  %v2991_v8 = vor.u32 %v3269_v4, %v2990_v24  ;;  %v3267_v24 = vld [vmem:[%s4953_s1 + $0x190] sm:$0xf0] }
 0x385   :  { %1122 = vmatpush.bf16.msra.mxu1 %v2991_v8  ;;  %1136 = vmatpush.bf16.msra.mxu3 %v2995_v62 }
 0x387   :  { %1149 = vmatpush.bf16.msra.mxu0 %v3011_v31  ;;  %v2979_v31 = vor.u32 %v3266_v38, %v2978_v23  ;;  %v871_v23 = vpop.xlane.xlu0 %870  ;;  %v5076_v38 = vmov 3  }
 0x388   :  { %v944_v30 = vmul.f32 %v871_v23, %v3853_v19  ;;  %v5083_v23 = vmov 11  }
 0x389   :  { %1123 = vmatpush.bf16.msra.mxu1 %v2979_v31 }
 0x38b   :  { %1150 = vmatpush.bf16.msra.mxu0 %v2999_v36 }
 0x3f8   :  { %v926_v44 = vpop.f32.mrf.mxu3  ;;  %v939_v55 = vpop.f32.mrf.mxu2 }
 0x3f9   :  { %v946_v27 = vadd.f32 %v926_v44, %v382_v39  ;;  %949 = vperm.xlu1 %3385, %v939_v55   ;;  %v2980_v39 = vld [vmem:[%s4953_s1 + $0x18c] sm:$0xf0]  ;;  %v945_v44 = vsub.f32 %v943_v29, %v944_v30  ;;  %v5084_v29 = vmov 9   ;;  %v5086_v30 = vmov 12  }
 0x3fa   :  { %v2983_v4 = vor.u32 %v3265_v0, %v2980_v39  ;;  %v5077_v0 = vmov 7   ;;  %v5078_v39 = vmov 4  }
 0x3fc   :  { %1137 = vmatpush.bf16.msra.mxu3 %v2983_v4  ;;  %v5081_v4 = vmov 10  }
 0x400   :  { %v928_v61 = vpop.f32.mrf.mxu3  ;;  %v941_v58 = vpop.f32.mrf.mxu2 }
 0x401   :  { %v2986_v58 = vld [vmem:[%s4953_s1 + $0x188] sm:$0xf] }
 0x402   :  { %v2987_v17 = vor.u32 %v3267_v24, %v2986_v58  ;;  %v5079_v58 = vmov 8   ;;  %v5080_v24 = vmov 5  }
 0x404   :  { %1151 = vmatpush.bf16.msra.mxu0 %v2987_v17  ;;  %v5082_v17 = vmov 6  }
 0x408   :  { %1606 = vmatpush.bf16.msrb.mxu0 %v4164_v3 }
 0x46b   :  { %v950_v18 = vpop.permute.xlu1 %949 }
 0x46c   :  { %v952_v8 = vmul.f32 %v950_v18, %v3862_v25  ;;  %v5085_v18 = vmov 13  }
 0x46e   :  { %v953_v55 = vsub.f32 %v946_v27, %v952_v8  ;;  %v5087_v8 = vmov 15  }
 0x470   :  { %v954_v62 = vpack.c.bf16 %v953_v55, %v945_v44  ;;  %v5088_v44 = vmov 16   ;;  %v5089_v55 = vmov 18  }
 0x472   :  { %1124 = vmatmul.bf16.vlgmr.msra.gmra.mxu1 %v954_v62  ;;  %1138 = vmatmul.bf16.vlgmr.msra.gmra.mxu3 %v954_v62 }
 0x473   :  { %1152 = vmatmul.bf16.vlgmr.msra.gmra.mxu0 %v954_v62  ;;  %v5090_v62 = vmov 21  }
 0x474   :  { %3209 = vmatpush.msk.msra.mxu0 %vm41_vm1, %v5021_v59  ;;  %v5096_v59 = vmov 2  }
 0x4ef   :  { %v4330_v36 = vpop.f32.mrf.mxu1 }
 0x4f0   :  { %5074 = vst [vmem:[#allocation25_spill] sm:$0xff] %v4330_v36  ;;  %v1540_v56 = vpack.c.bf16 %v4330_v36, %v4330_v36  ;;  %v4334_v32 = vpop.f32.mrf.mxu0 }
 0x4f1   :  { %1243 = vperm.xlu0 %3387, %v4334_v32   ;;  %1234 = vperm.xlu2 %3386, %v4334_v32  }
 0x4f2   :  { %v1584_v19 = vsel %vm875_vm0, %v1540_v56, 0  ;;  %v5091_v56 = vmov 20  }
 0x4f3   :  { %1593 = vmatpush.bf16.msrb.mxu3 %v1584_v19  ;;  %v5092_v19 = vmov 26  }
 0x4f7   :  { %v4339_v25 = vpop.f32.mrf.mxu1 }
 0x4f8   :  { %5075 = vst [vmem:[#allocation26_spill] sm:$0xff] %v4339_v25  ;;  %v1541_v27 = vpack.c.bf16 %v4339_v25, %v4339_v25  ;;  %v1155_v61 = vpop.f32.mrf.mxu0 }
 0x4f9   :  { %3389 = vset.pattern.permute.xlu0 %v5076_v38  ;;  %3393 = vset.pattern.permute.xlu2 %v5077_v0 }
 0x4fa   :  { %1158 = vxpose.xlu1.b32.start.end [1/1] (short) (narrow) %v1155_v61, 32  ;;  %1261 = vperm.xlu0 %3389, %v4334_v32   ;;  %v1549_v31 = vsel %vm875_vm0, %v1541_v27, 0  ;;  %v5093_v27 = vmov 23   ;;  %v5094_v61 = vmov 31  }
 0x4fb   :  { %1297 = vperm.xlu2 %3393, %v4334_v32   ;;  %1558 = vmatpush.bf16.msrb.mxu1 %v1549_v31  ;;  %v5095_v31 = vmov 25  }
 0x502   :  { %3390 = vset.pattern.permute.xlu0 %v5078_v39 }
 0x503   :  { %3394 = vset.pattern.permute.xlu2 %v5079_v58  ;;  %1270 = vperm.xlu0 %3390, %v4334_v32  }
 0x504   :  { %1306 = vperm.xlu2 %3394, %v4334_v32  }
 0x50b   :  { %3391 = vset.pattern.permute.xlu0 %v5080_v24 }
 0x50c   :  { %3396 = vset.pattern.permute.xlu2 %v5081_v4  ;;  %1279 = vperm.xlu0 %3391, %v4334_v32   ;;  %v5106_v4 = vmov 29  }
 0x50d   :  { %1324 = vperm.xlu2 %3396, %v4334_v32  }
 0x514   :  { %3392 = vset.pattern.permute.xlu0 %v5082_v17 }
 0x515   :  { %3397 = vset.pattern.permute.xlu2 %v5083_v23  ;;  %1288 = vperm.xlu0 %3392, %v4334_v32   ;;  %v5104_v23 = vmov 24  }
 0x516   :  { %1333 = vperm.xlu2 %3397, %v4334_v32  }
 0x51d   :  { %3395 = vset.pattern.permute.xlu0 %v5084_v29 }
 0x51e   :  { %3399 = vset.pattern.permute.xlu2 %v5085_v18  ;;  %1315 = vperm.xlu0 %3395, %v4334_v32  }
 0x51f   :  { %1351 = vperm.xlu2 %3399, %v4334_v32  }
 0x526   :  { %3398 = vset.pattern.permute.xlu0 %v5086_v30  ;;  %v5103_v30 = vmov 22  }
 0x527   :  { %3401 = vset.pattern.permute.xlu2 %v5087_v8  ;;  %1342 = vperm.xlu0 %3398, %v4334_v32  }
 0x528   :  { %1369 = vperm.xlu2 %3401, %v4334_v32  }
 0x52f   :  { %3402 = vset.pattern.permute.xlu0 %v5088_v44  ;;  %v5101_v44 = vmov 17  }
 0x530   :  { %3404 = vset.pattern.permute.xlu2 %v5089_v55  ;;  %1378 = vperm.xlu0 %3402, %v4334_v32   ;;  %v5098_v55 = vmov 28  }
 0x531   :  { %1396 = vperm.xlu2 %3404, %v4334_v32  }
 0x538   :  { %3407 = vset.pattern.permute.xlu0 %v5090_v62 }
 0x539   :  { %3406 = vset.pattern.permute.xlu2 %v5091_v56  ;;  %1423 = vperm.xlu0 %3407, %v4334_v32   ;;  %v5097_v56 = vmov 0  }
 0x53a   :  { %1414 = vperm.xlu2 %3406, %v4334_v32  }
 0x541   :  { %3412 = vset.pattern.permute.xlu0 %v5092_v19  ;;  %v5099_v19 = vmov 30  }
 0x542   :  { %3409 = vset.pattern.permute.xlu2 %v5093_v27  ;;  %1468 = vperm.xlu0 %3412, %v4334_v32  }
 0x543   :  { %1441 = vperm.xlu2 %3409, %v4334_v32  }
 0x54a   :  { %3417 = vset.pattern.permute.xlu0 %v5094_v61  ;;  %v5100_v61 = vmov 14  }
 0x54b   :  { %3411 = vset.pattern.permute.xlu2 %v5095_v31  ;;  %1513 = vperm.xlu0 %3417, %v4334_v32  }
 0x54c   :  { %1459 = vperm.xlu2 %3411, %v4334_v32  }
 0x54d   :  { %3388 = vset.pattern.permute.xlu1 %v5096_v59  ;;  %v5102_v59 = vmov 19  }
 0x553   :  { %3418 = vset.pattern.permute.xlu0 %v5097_v56 }
 0x554   :  { %3414 = vset.pattern.permute.xlu2 %v5098_v55  ;;  %v1235_v55 = vpop.permute.xlu2 %1234 }
 0x555   :  { %1486 = vperm.xlu2 %3414, %v4334_v32  }
 0x55c   :  { %v1298_v29 = vpop.permute.xlu2 %1297 }
 0x55d   :  { %3416 = vset.pattern.permute.xlu2 %v5099_v19 }
 0x55e   :  { %1504 = vperm.xlu2 %3416, %v4334_v32  }
 0x563   :  { %v1244_v31 = vpop.permute.xlu0 %1243 }
 0x566   :  { %3419 = vset.pattern.permute.xlu2 %v5097_v56 }
 0x56c   :  { %1252 = vperm.xlu1 %3388, %v4334_v32   ;;  %v1262_v58 = vpop.permute.xlu0 %1261 }
 0x574   :  { %3400 = vset.pattern.permute.xlu1 %v5100_v61  ;;  %v5105_v61 = vmov 27  }
 0x575   :  { %1360 = vperm.xlu1 %3400, %v4334_v32  }
 0x57d   :  { %3403 = vset.pattern.permute.xlu1 %v5101_v44 }
 0x57e   :  { %1387 = vperm.xlu1 %3403, %v4334_v32  }
 0x586   :  { %3405 = vset.pattern.permute.xlu1 %v5102_v59 }
 0x587   :  { %1405 = vperm.xlu1 %3405, %v4334_v32  }
 0x58f   :  { %3408 = vset.pattern.permute.xlu1 %v5103_v30 }
 0x590   :  { %1432 = vperm.xlu1 %3408, %v4334_v32  }
 0x598   :  { %3410 = vset.pattern.permute.xlu1 %v5104_v23 }
 0x599   :  { %1450 = vperm.xlu1 %3410, %v4334_v32  }
 0x59e   :  { %v1174_v56 = vpop.trf.xlu1 }
 0x59f   :  { %3073 = vmatmul.msk.f32.vlgmr.msrb.gmra.mxu2 %vm451_vm2, %v1174_v56  ;;  %v1307_v56 = vpop.permute.xlu2 %1306 }
 0x5a1   :  { %3413 = vset.pattern.permute.xlu1 %v5105_v61 }
 0x5a2   :  { %1477 = vperm.xlu1 %3413, %v4334_v32  }
 0x5a6   :  { %v1175_v19 = vpop.trf.xlu1 }
 0x5a7   :  { %3074 = vmatmul.msk.f32.gmra.mxu2 %vm451_vm2, %v1175_v19  ;;  %v4410_v61 = vpop.permute.xlu2 %1324  ;;  %v1271_v19 = vpop.permute.xlu0 %1270 }
 0x5aa   :  { %3415 = vset.pattern.permute.xlu1 %v5106_v4 }
 0x5ab   :  { %1495 = vperm.xlu1 %3415, %v4334_v32  }
 0x5ae   :  { %v1176_v30 = vpop.trf.xlu1 }
 0x5af   :  { %3075 = vmatmul.msk.f32.gmra.mxu2 %vm451_vm2, %v1176_v30  ;;  %v4412_v27 = vpop.permute.xlu2 %1333  ;;  %v1280_v32 = vpop.permute.xlu0 %1279 }
 0x5b6   :  { %v1177_v23 = vpop.trf.xlu1 }
 0x5b7   :  { %3076 = vmatmul.msk.f32.gmra.mxu2 %vm451_vm2, %v1177_v23  ;;  %v4414_v4 = vpop.permute.xlu2 %1351  ;;  %v1289_v23 = vpop.permute.xlu0 %1288 }
 0x5bf   :  { %v4418_v30 = vpop.permute.xlu2 %1369 }
 0x5de   :  { %v1253_v0 = vpop.permute.xlu1 %1252 }
 0x5e7   :  { %v4416_v62 = vpop.permute.xlu1 %1360 }
 0x5f0   :  { %v4421_v33 = vpop.permute.xlu1 %1387 }
 0x622   :  { %v1219_v17 = vpop.f32.mrf.mxu2 }
 0x623   :  { %v1220_v59 = vadd.f32 %v1219_v17, %v3983_v52  ;;  %v4424_v52 = vpop.permute.xlu2 %1396 }
 0x625   :  { %v1231_v24 = vperm.slane %v1220_v59, 0  ;;  %v1241_v44 = vperm.slane %v1220_v59, 1  ;;  %v1250_v39 = vperm.slane %v1220_v59, 2  ;;  %v1259_v8 = vperm.slane %v1220_v59, 3 }
 0x626   :  { %v1268_v25 = vperm.slane %v1220_v59, 4  ;;  %v1277_v36 = vperm.slane %v1220_v59, 5  ;;  %v1286_v50 = vperm.slane %v1220_v59, 6  ;;  %v1295_v28 = vperm.slane %v1220_v59, 7 }
 0x627   :  { %v1237_v3 = vsub.f32 %v1231_v24, %v1235_v55  ;;  %v1246_v38 = vsub.f32 %v1241_v44, %v1244_v31  ;;  %v1255_v18 = vsub.f32 %v1250_v39, %v1253_v0  ;;  %v1264_v37 = vsub.f32 %v1259_v8, %v1262_v58  ;;  %v1316_v24 = vpop.permute.xlu0 %1315 }
 0x628   :  { %v1273_v17 = vsub.f32 %v1268_v25, %v1271_v19  ;;  %v1282_v49 = vsub.f32 %v1277_v36, %v1280_v32  ;;  %v1291_v58 = vsub.f32 %v1286_v50, %v1289_v23 }
 0x629   :  { %v1238_v54 = vmax.f32 %v1237_v3, 0.0  ;;  %v1247_v53 = vmax.f32 %v1246_v38, 0.0  ;;  %v1256_v42 = vmax.f32 %v1255_v18, 0.0  ;;  %v1265_v3 = vmax.f32 %v1264_v37, 0.0 }
 0x62a   :  { %v1222_v5 = vpop.f32.mrf.mxu2  ;;  %v1274_v55 = vmax.f32 %v1273_v17, 0.0  ;;  %v1300_v18 = vsub.f32 %v1295_v28, %v1298_v29  ;;  %v1283_v36 = vmax.f32 %v1282_v49, 0.0  ;;  %v1292_v19 = vmax.f32 %v1291_v58, 0.0 }
 0x62b   :  { %v1239_v13 = vmul.f32 %v1238_v54, %v3990_v41  ;;  %v1248_v39 = vmul.f32 %v1247_v53, %v3994_v1  ;;  %v1223_v38 = vadd.f32 %v1222_v5, %v3955_v12  ;;  %v1257_v44 = vmul.f32 %v1256_v42, %v3999_v7  ;;  %v4432_v1 = vpop.permute.xlu1 %1405  ;;  %v1415_v28 = vpop.permute.xlu2 %1414 }
 0x62c   :  { %v1266_v31 = vmul.f32 %v1265_v3, %v4008_v60  ;;  %v1301_v5 = vmax.f32 %v1300_v18, 0.0  ;;  %v1284_v42 = vmul.f32 %v1283_v36, %v4017_v43  ;;  %v1293_v49 = vmul.f32 %v1292_v19, %v4022_v63 }
 0x62d   :  { %v1240_v0 = vadd.f32 %v1239_v13, %v3992_v2  ;;  %v1304_v54 = vperm.slane %v1223_v38, 0  ;;  %v1313_v59 = vperm.slane %v1223_v38, 1  ;;  %v1275_v13 = vmul.f32 %v1274_v55, %v4012_v11 }
 0x62e   :  { %v1322_v37 = vperm.slane %v1223_v38, 2  ;;  %v1331_v17 = vperm.slane %v1223_v38, 3  ;;  %v1340_v29 = vperm.slane %v1223_v38, 4  ;;  %v1302_v55 = vmul.f32 %v1301_v5, %v4029_v10 }
 0x62f   :  { %v1249_v8 = vadd.f32 %v1248_v39, %v1240_v0  ;;  %v1309_v53 = vsub.f32 %v1304_v54, %v1307_v56  ;;  %v1318_v23 = vsub.f32 %v1313_v59, %v1316_v24  ;;  %v1343_v0 = vpop.permute.xlu0 %1342  ;;  %v1358_v24 = vperm.slane %v1223_v38, 6 }
 0x630   :  { %v1327_v58 = vsub.f32 %v1322_v37, %v4410_v61  ;;  %v1336_v18 = vsub.f32 %v1331_v17, %v4412_v27  ;;  %v1367_v37 = vperm.slane %v1223_v38, 7 }
 0x631   :  { %v1258_v25 = vadd.f32 %v1257_v44, %v1249_v8  ;;  %v1310_v3 = vmax.f32 %v1309_v53, 0.0  ;;  %v1349_v8 = vperm.slane %v1223_v38, 5  ;;  %v1319_v54 = vmax.f32 %v1318_v23, 0.0 }
 0x632   :  { %v1225_v56 = vpop.f32.mrf.mxu2  ;;  %v1328_v59 = vmax.f32 %v1327_v58, 0.0  ;;  %v1337_v53 = vmax.f32 %v1336_v18, 0.0 }
 0x633   :  { %v1267_v32 = vadd.f32 %v1266_v31, %v1258_v25  ;;  %v1345_v25 = vsub.f32 %v1340_v29, %v1343_v0  ;;  %v1311_v36 = vmul.f32 %v1310_v3, %v4038_v16  ;;  %v1354_v19 = vsub.f32 %v1349_v8, %v4414_v4  ;;  %v1433_v5 = vpop.permute.xlu1 %1432  ;;  %v1442_v29 = vpop.permute.xlu2 %1441 }
 0x634   :  { %v1338_v4 = vmul.f32 %v1337_v53, %v4056_v45  ;;  %v1372_v3 = vsub.f32 %v1367_v37, %v4418_v30 }
 0x635   :  { %v1276_v50 = vadd.f32 %v1275_v13, %v1267_v32  ;;  %v4441_v32 = vadd.f32 %v1225_v56, %v3971_v22  ;;  %v1320_v13 = vmul.f32 %v1319_v54, %v4043_v51  ;;  %v1346_v23 = vmax.f32 %v1345_v25, 0.0 }
 0x636   :  { %v1355_v0 = vmax.f32 %v1354_v19, 0.0  ;;  %v1373_v18 = vmax.f32 %v1372_v3, 0.0 }
 0x637   :  { %v1285_v39 = vadd.f32 %v1284_v42, %v1276_v50  ;;  %v1363_v50 = vsub.f32 %v1358_v24, %v4416_v62  ;;  %v1329_v42 = vmul.f32 %v1328_v59, %v4051_v35  ;;  %v1376_v17 = vperm.slane %v4441_v32, 0 }
 0x638   :  { %v1385_v58 = vperm.slane %v4441_v32, 1  ;;  %v1394_v38 = vperm.slane %v4441_v32, 2  ;;  %v1347_v62 = vmul.f32 %v1346_v23, %v4064_v21  ;;  %v1403_v24 = vperm.slane %v4441_v32, 3 }
 0x639   :  { %v1294_v44 = vadd.f32 %v1293_v49, %v1285_v39  ;;  %v1379_v39 = vpop.permute.xlu0 %1378  ;;  %v1364_v56 = vmax.f32 %v1363_v50, 0.0  ;;  %v1412_v30 = vperm.slane %v4441_v32, 4  ;;  %v1374_v50 = vmul.f32 %v1373_v18, %v4083_v47 }
 0x63a   :  { %v1390_v25 = vsub.f32 %v1385_v58, %v4421_v33  ;;  %v1228_v53 = vpop.f32.mrf.mxu2  ;;  %v1408_v33 = vsub.f32 %v1403_v24, %v4432_v1 }
 0x63b   :  { %v1303_v31 = vadd.f32 %v1302_v55, %v1294_v44  ;;  %v1381_v44 = vsub.f32 %v1376_v17, %v1379_v39  ;;  %v1356_v55 = vmul.f32 %v1355_v0, %v4066_v40  ;;  %v1365_v59 = vmul.f32 %v1364_v56, %v4077_v9 }
 0x63c   :  { %v1417_v17 = vsub.f32 %v1412_v30, %v1415_v28 }
 0x63d   :  { %v1312_v61 = vadd.f32 %v1311_v36, %v1303_v31  ;;  %v1399_v31 = vsub.f32 %v1394_v38, %v4424_v52  ;;  %v1382_v19 = vmax.f32 %v1381_v44, 0.0 }
 0x63e   :  { %v1418_v56 = vmax.f32 %v1417_v17, 0.0 }
 0x63f   :  { %v1321_v27 = vadd.f32 %v1320_v13, %v1312_v61  ;;  %v1451_v61 = vpop.permute.xlu1 %1450  ;;  %v1421_v13 = vperm.slane %v4441_v32, 5  ;;  %v1400_v23 = vmax.f32 %v1399_v31, 0.0  ;;  %v1383_v39 = vmul.f32 %v1382_v19, %v4088_v6 }
 0x641   :  { %v1330_v49 = vadd.f32 %v1329_v42, %v1321_v27  ;;  %v1391_v27 = vmax.f32 %v1390_v25, 0.0  ;;  %v1460_v42 = vpop.permute.xlu2 %1459  ;;  %v1424_v52 = vpop.permute.xlu0 %1423  ;;  %v1401_v44 = vmul.f32 %v1400_v23, %v4101_v20 }
 0x642   :  { %v1426_v3 = vsub.f32 %v1421_v13, %v1424_v52 }
 0x643   :  { %v1339_v8 = vadd.f32 %v1338_v4, %v1330_v49  ;;  %v1430_v49 = vperm.slane %v4441_v32, 6  ;;  %v1229_v4 = vadd.f32 %v1228_v53, %v4006_v46  ;;  %v1392_v38 = vmul.f32 %v1391_v27, %v4093_v48 }
 0x645   :  { %v1348_v54 = vadd.f32 %v1347_v62, %v1339_v8  ;;  %v1409_v8 = vmax.f32 %v1408_v33, 0.0  ;;  %v1439_v62 = vperm.slane %v4441_v32, 7  ;;  %v1435_v28 = vsub.f32 %v1430_v49, %v1433_v5 }
 0x646   :  { %v1457_v31 = vperm.slane %v1229_v4, 1  ;;  %v1466_v53 = vperm.slane %v1229_v4, 2  ;;  %v1484_v17 = vperm.slane %v1229_v4, 4 }
 0x647   :  { %v1357_v36 = vadd.f32 %v1356_v55, %v1348_v54  ;;  %v1448_v55 = vperm.slane %v1229_v4, 0  ;;  %v1427_v54 = vmax.f32 %v1426_v3, 0.0  ;;  %v1410_v25 = vmul.f32 %v1409_v8, %v4107_v15  ;;  %v1478_v30 = vpop.permute.xlu1 %1477 }
 0x648   :  { %v1444_v24 = vsub.f32 %v1439_v62, %v1442_v29  ;;  %v1436_v19 = vmax.f32 %v1435_v28, 0.0  ;;  %v1462_v33 = vsub.f32 %v1457_v31, %v1460_v42  ;;  %v1502_v28 = vperm.slane %v1229_v4, 6 }
 0x649   :  { %v1366_v37 = vadd.f32 %v1365_v59, %v1357_v36  ;;  %v1419_v36 = vmul.f32 %v1418_v56, %v4109_v26  ;;  %v1453_v13 = vsub.f32 %v1448_v55, %v1451_v61  ;;  %v1487_v32 = vpop.permute.xlu2 %1486  ;;  %v1428_v27 = vmul.f32 %v1427_v54, %v4118_v14  ;;  %v1469_v23 = vpop.permute.xlu0 %1468  ;;  %v5107_v56 = vld [vmem:[#allocation16_spill] sm:$0xff] }
 0x64a   :  { %v1445_v5 = vmax.f32 %v1444_v24, 0.0  ;;  %v1437_v29 = vmul.f32 %v1436_v19, %v4122_v57  ;;  %v1489_v8 = vsub.f32 %v1484_v17, %v1487_v32  ;;  %v1511_v31 = vperm.slane %v1229_v4, 7  ;;  %v5111_v17 = vld [vmem:[#allocation20_spill] sm:$0xff] }
 0x64b   :  { %v1375_v0 = vadd.f32 %v1374_v50, %v1366_v37  ;;  %v1475_v37 = vperm.slane %v1229_v4, 3 }
 0x64c   :  { %v1446_v3 = vmul.f32 %v1445_v5, %v4127_v34 }
 0x64d   :  { %v1384_v58 = vadd.f32 %v1383_v39, %v1375_v0  ;;  %v1454_v0 = vmax.f32 %v1453_v13, 0.0  ;;  %v1471_v39 = vsub.f32 %v1466_v53, %v1469_v23  ;;  %v1480_v49 = vsub.f32 %v1475_v37, %v1478_v30 }
 0x64e   :  { %v1490_v13 = vmax.f32 %v1489_v8, 0.0  ;;  %v5114_v8 = vld [vmem:[#allocation23_spill] sm:$0xff] }
 0x64f   :  { %v1393_v1 = vadd.f32 %v1392_v38, %v1384_v58  ;;  %v1463_v58 = vmax.f32 %v1462_v33, 0.0  ;;  %v1493_v38 = vperm.slane %v1229_v4, 5  ;;  %v1496_v42 = vpop.permute.xlu1 %1495  ;;  %v1481_v55 = vmax.f32 %v1480_v49, 0.0 }
 0x651   :  { %v1402_v18 = vadd.f32 %v1401_v44, %v1393_v1  ;;  %v1455_v1 = vmul.f32 %v1454_v0, %v5107_v56  ;;  %v1472_v44 = vmax.f32 %v1471_v39, 0.0  ;;  %v1498_v24 = vsub.f32 %v1493_v38, %v1496_v42  ;;  %v1514_v37 = vpop.permute.xlu0 %1513  ;;  %v5112_v39 = vld [vmem:[#allocation21_spill] sm:$0xff] }
 0x652   :  { %v1516_v33 = vsub.f32 %v1511_v31, %v1514_v37 }
 0x653   :  { %v1411_v59 = vadd.f32 %v1410_v25, %v1402_v18  ;;  %v5108_v18 = vld [vmem:[#allocation17_spill] sm:$0xff]  ;;  %v1499_v5 = vmax.f32 %v1498_v24, 0.0 }
 0x654   :  { %v1464_v25 = vmul.f32 %v1463_v58, %v5108_v18  ;;  %v1517_v4 = vmax.f32 %v1516_v33, 0.0  ;;  %v5113_v58 = vld [vmem:[#allocation22_spill] sm:$0xff] }
 0x655   :  { %v1420_v50 = vadd.f32 %v1419_v36, %v1411_v59  ;;  %v1505_v36 = vpop.permute.xlu2 %1504  ;;  %v5109_v59 = vld [vmem:[#allocation18_spill] sm:$0xff]  ;;  %v1500_v49 = vmul.f32 %v1499_v5, %v5112_v39 }
 0x656   :  { %v1473_v19 = vmul.f32 %v1472_v44, %v5109_v59  ;;  %v1507_v53 = vsub.f32 %v1502_v28, %v1505_v36 }
 0x657   :  { %v1429_v52 = vadd.f32 %v1428_v27, %v1420_v50  ;;  %v5110_v50 = vld [vmem:[#allocation19_spill] sm:$0xff] }
 0x658   :  { %v1482_v27 = vmul.f32 %v1481_v55, %v5110_v50 }
 0x659   :  { %v1438_v61 = vadd.f32 %v1437_v29, %v1429_v52  ;;  %v1491_v52 = vmul.f32 %v1490_v13, %v5111_v17  ;;  %v1508_v29 = vmax.f32 %v1507_v53, 0.0 }
 0x65b   :  { %v1447_v62 = vadd.f32 %v1446_v3, %v1438_v61  ;;  %v1509_v61 = vmul.f32 %v1508_v29, %v5113_v58  ;;  %v3311_v29 = vld [vmem:[%s4953_s1 + $0x2f0] sm:$0xf0] }
 0x65d   :  { %v1456_v54 = vadd.f32 %v1455_v1, %v1447_v62  ;;  %v1518_v62 = vmul.f32 %v1517_v4, %v5114_v8  ;;  %v3201_v4 = vld [vmem:[%s4953_s1 + $0x2f4] sm:$0xf0] }
 0x65f   :  { %v1465_v30 = vadd.f32 %v1464_v25, %v1456_v54 }
 0x661   :  { %v1474_v32 = vadd.f32 %v1473_v19, %v1465_v30 }
 0x663   :  { %v1483_v23 = vadd.f32 %v1482_v27, %v1474_v32  ;;  %v5115_v27 = vmov 1  }
 0x665   :  { %v1492_v0 = vadd.f32 %v1491_v52, %v1483_v23  ;;  %v3199_v52 = vld [vmem:[%s4953_s1 + $0x2e8] sm:$0xf] }
 0x667   :  { %v1501_v3 = vadd.f32 %v1500_v49, %v1492_v0  ;;  %v3310_v0 = vld [vmem:[%s4953_s1 + $0x2ec] sm:$0xf]  ;;  %v3200_v49 = vor.u32 %v3311_v29, %v3199_v52  ;;  %v3163_v29 = vld [vmem:[%s4953_s1 + $0x2a0] sm:$0xf] }
 0x669   :  { %v1510_v38 = vadd.f32 %v1509_v61, %v1501_v3  ;;  %v3207_v3 = vld [vmem:[%s4953_s1 + $0x2f0] sm:$0xf]  ;;  %v3312_v61 = vld [vmem:[%s4953_s1 + $0x2f8] sm:$0xf0]  ;;  %1785 = vmatpush.bf16.msra.mxu2 %v3200_v49  ;;  %v3301_v49 = vld [vmem:[%s4953_s1 + $0x2a4] sm:$0xf] }
 0x66b   :  { %v1519_v1 = vadd.f32 %v1518_v62, %v1510_v38  ;;  %v3204_v38 = vor.u32 %v3310_v0, %v3201_v4  ;;  %v3208_v62 = vor.u32 %v3312_v61, %v3207_v3  ;;  %v3302_v0 = vld [vmem:[%s4953_s1 + $0x2a8] sm:$0xf0]  ;;  %v3165_v4 = vld [vmem:[%s4953_s1 + $0x2ac] sm:$0xf0]  ;;  %v3171_v3 = vld [vmem:[%s4953_s1 + $0x2a8] sm:$0xf] }
 0x66c   :  { %v3303_v61 = vld [vmem:[%s4953_s1 + $0x2b0] sm:$0xf0] }
 0x66d   :  { %v3077_v44 = vmul.f32 -1.442695, %v1519_v1  ;;  %v3187_v1 = vld [vmem:[%s4953_s1 + $0x2d0] sm:$0xf]  ;;  %1799 = vmatpush.bf16.msra.mxu1 %v3204_v38  ;;  %1813 = vmatpush.bf16.msra.mxu3 %v3208_v62  ;;  %v3164_v38 = vor.u32 %v3302_v0, %v3163_v29 }
 0x66f   :  { %3489 = vpow2.f32 %v3077_v44  ;;  %v3308_v44 = vld [vmem:[%s4953_s1 + $0x2d8] sm:$0xf0] }
 0x675   :  { %v3490_v28 = vpop.eup %3489 }
 0x676   :  { %v1523_v42 = vadd.f32 1.0, %v3490_v28  ;;  %v3307_v28 = vld [vmem:[%s4953_s1 + $0x2d4] sm:$0xf] }
 0x678   :  { %3491 = vrcp.f32 %v1523_v42  ;;  %v1535_v24 = vand.u32 2147483648, %v1523_v42  ;;  %v1533_v36 = vand.u32 2147483647, %v1523_v42  ;;  %vm1529_vm8 = vweird.f32 %v1523_v42 }
 0x67a   :  { %v1536_v19 = vor.u32 1.1754944e-38, %v1535_v24  ;;  %vm1534_vm10 = vcmp.eq.f32.partialorder %v1533_v36, 8.507059e+37  ;;  %v3175_v36 = vld [vmem:[%s4953_s1 + $0x2b8] sm:$0xf] }
 0x67e   :  { %v3492_v55 = vpop.eup %3491 }
 0x67f   :  { %v1525_v54 = vmul.f32 %v3492_v55, %v1523_v42  ;;  %vm1530_vm7 = vweird.f32 %v3492_v55  ;;  %v3188_v42 = vor.u32 %v3308_v44, %v3187_v1  ;;  %v3172_v1 = vor.u32 %v3303_v61, %v3171_v3  ;;  %v3151_v44 = vld [vmem:[%s4953_s1 + $0x288] sm:$0xf]  ;;  %v3293_v3 = vld [vmem:[%s4953_s1 + $0x260] sm:$0xf0]  ;;  %v3292_v61 = vld [vmem:[%s4953_s1 + $0x25c] sm:$0xf] }
 0x680   :  { %vm1531_vm9 = vmor %vm1529_vm8, %vm1530_vm7 }
 0x681   :  { %v1526_v25 = vsub.f32 1.0, %v1525_v54  ;;  %v3195_v54 = vld [vmem:[%s4953_s1 + $0x2d8] sm:$0xf]  ;;  %1786 = vmatpush.bf16.msra.mxu2 %v3188_v42  ;;  %v3298_v42 = vld [vmem:[%s4953_s1 + $0x28c] sm:$0xf] }
 0x683   :  { %v1527_v31 = vmul.f32 %v3492_v55, %v1526_v25  ;;  %v3309_v25 = vld [vmem:[%s4953_s1 + $0x2e0] sm:$0xf0] }
 0x685   :  { %v1528_v30 = vadd.f32 %v3492_v55, %v1527_v31  ;;  %v3196_v31 = vor.u32 %v3309_v25, %v3195_v54  ;;  %v3159_v54 = vld [vmem:[%s4953_s1 + $0x290] sm:$0xf]  ;;  %v3300_v25 = vld [vmem:[%s4953_s1 + $0x298] sm:$0xf0] }
 0x687   :  { %v1532_v13 = vsel %vm1531_vm9, %v3492_v55, %v1528_v30  ;;  %v3189_v55 = vld [vmem:[%s4953_s1 + $0x2dc] sm:$0xf0]  ;;  %v3305_v30 = vld [vmem:[%s4953_s1 + $0x2c0] sm:$0xf0]  ;;  %1814 = vmatpush.bf16.msra.mxu3 %v3196_v31 }
 0x688   :  { %v1537_v53 = vsel %vm1534_vm10, %v1536_v19, %v1532_v13  ;;  %v3192_v24 = vor.u32 %v3307_v28, %v3189_v55  ;;  %v3304_v19 = vld [vmem:[%s4953_s1 + $0x2bc] sm:$0xf]  ;;  %v3177_v13 = vld [vmem:[%s4953_s1 + $0x2c4] sm:$0xf0]  ;;  %v3299_v28 = vld [vmem:[%s4953_s1 + $0x290] sm:$0xf0] }
 0x689   :  { %v1542_v37 = vsel %vm451_vm2, %v1537_v53, 0.0  ;;  %v1539_v32 = vpack.c.bf16 %v1537_v53, %v1537_v53  ;;  %v3183_v53 = vld [vmem:[%s4953_s1 + $0x2c0] sm:$0xf]  ;;  %v3153_v55 = vld [vmem:[%s4953_s1 + $0x294] sm:$0xf0] }
 0x68a   :  { %1543 = vadd.xlane.f32.xlu2 %v1542_v37  ;;  %v3306_v37 = vld [vmem:[%s4953_s1 + $0x2c8] sm:$0xf0]  ;;  %1800 = vmatpush.bf16.msra.mxu1 %v3192_v24  ;;  %v3152_v24 = vor.u32 %v3299_v28, %v3151_v44 }
 0x68b   :  { %1564 = vxpose.xlu1.c.b16.start.end [1/1] (short) (narrow) %v1539_v32, 16  ;;  %3078 = vmatmul.msk.bf16.vlgmr.msrb.gmra.mxu1 %vm451_vm2, %v1539_v32  ;;  %v4542_v32 = vpop.f32.mrf.mxu3  ;;  %v3184_v52 = vor.u32 %v3306_v37, %v3183_v53  ;;  %v3295_v53 = vld [vmem:[%s4953_s1 + $0x274] sm:$0xf]  ;;  %v3141_v37 = vld [vmem:[%s4953_s1 + $0x27c] sm:$0xf0] }
 0x68c   :  { %v3144_v0 = vor.u32 %v3295_v53, %v3141_v37  ;;  %v3123_v53 = vld [vmem:[%s4953_s1 + $0x248] sm:$0xf]  ;;  %v3291_v37 = vld [vmem:[%s4953_s1 + $0x250] sm:$0xf0] }
 0x68d   :  { %1815 = vmatpush.bf16.msra.mxu3 %v3184_v52 }
 0x691   :  { %1816 = vmatpush.bf16.msra.mxu3 %v3172_v1 }
 0x6de   :  { %3420 = vset.pattern.permute.xlu1 %v5115_v27 }
 0x708   :  { %v4484_v5 = vpop.f32.mrf.mxu1 }
 0x710   :  { %v1562_v33 = vpop.f32.mrf.mxu1 }
 0x711   :  { %v3176_v33 = vor.u32 %v3305_v30, %v3175_v36  ;;  %v3156_v36 = vor.u32 %v3298_v42, %v3153_v55  ;;  %v3160_v30 = vor.u32 %v3300_v25, %v3159_v54 }
 0x713   :  { %1787 = vmatpush.bf16.msra.mxu2 %v3176_v33  ;;  %v3147_v33 = vld [vmem:[%s4953_s1 + $0x278] sm:$0xf]  ;;  %1817 = vmatpush.bf16.msra.mxu3 %v3160_v30 }
 0x717   :  { %1788 = vmatpush.bf16.msra.mxu2 %v3164_v38  ;;  %v3129_v38 = vld [vmem:[%s4953_s1 + $0x264] sm:$0xf0] }
 0x718   :  { %v3132_v42 = vor.u32 %v3292_v61, %v3129_v38  ;;  %v5119_v61 = vld [vmem:[#allocation25_spill] sm:$0xff] }
 0x71b   :  { %1789 = vmatpush.bf16.msra.mxu2 %v3152_v24 }
 0x737   :  { %v1572_v23 = vpop.trf.xlu1 }
 0x738   :  { %3079 = vmatmul.msk.bf16.vlgmr.msrb.gmra.mxu3 %vm451_vm2, %v1572_v23  ;;  %3080 = vmatmul.msk.bf16.vlgmr.msrb.gmra.mxu0 %vm451_vm2, %v1572_v23  ;;  %v3180_v23 = vor.u32 %v3304_v19, %v3177_v13  ;;  %v3139_v19 = vld [vmem:[%s4953_s1 + $0x270] sm:$0xf]  ;;  %v3296_v13 = vld [vmem:[%s4953_s1 + $0x278] sm:$0xf0] }
 0x739   :  { %2293 = vmatpush.bf16.msrb.mxu0 %v3208_v62  ;;  %v3168_v62 = vor.u32 %v3301_v49, %v3165_v4  ;;  %v3140_v29 = vor.u32 %v3296_v13, %v3139_v19  ;;  %v3127_v4 = vld [vmem:[%s4953_s1 + $0x258] sm:$0xf]  ;;  %v3289_v19 = vld [vmem:[%s4953_s1 + $0x244] sm:$0xf]  ;;  %v3117_v13 = vld [vmem:[%s4953_s1 + $0x24c] sm:$0xf0] }
 0x73a   :  { %1801 = vmatpush.bf16.msra.mxu1 %v3180_v23  ;;  %v3297_v23 = vld [vmem:[%s4953_s1 + $0x280] sm:$0xf0]  ;;  %v3128_v44 = vor.u32 %v3293_v3, %v3127_v4  ;;  %v1612_v4 = vadd.f32 %v4484_v5, %v4542_v32 }
 0x73b   :  { %v3148_v49 = vor.u32 %v3297_v23, %v3147_v33  ;;  %1790 = vmatpush.bf16.msra.mxu2 %v3140_v29  ;;  %v3120_v33 = vor.u32 %v3289_v19, %v3117_v13  ;;  %v3124_v23 = vor.u32 %v3291_v37, %v3123_v53  ;;  %v5124_v19 = vmov 3   ;;  %v5125_v13 = vld [vmem:[#allocation24_spill] sm:$0xff] }
 0x73c   :  { %v5126_v53 = vmov 15   ;;  %v5127_v37 = vmov 4   ;;  %v5131_v29 = vmov 6  }
 0x73d   :  { %2294 = vmatpush.bf16.msrb.mxu0 %v3196_v31  ;;  %v1141_v31 = vpop.f32.mrf.mxu3  ;;  %1818 = vmatpush.bf16.msra.mxu3 %v3148_v49 }
 0x73e   :  { %1802 = vmatpush.bf16.msra.mxu1 %v3168_v62  ;;  %v3135_v62 = vld [vmem:[%s4953_s1 + $0x260] sm:$0xf] }
 0x73f   :  { %1791 = vmatpush.bf16.msra.mxu2 %v3128_v44 }
 0x741   :  { %2295 = vmatpush.bf16.msrb.mxu0 %v3184_v52 }
 0x742   :  { %1803 = vmatpush.bf16.msra.mxu1 %v3156_v36  ;;  %v3115_v36 = vld [vmem:[%s4953_s1 + $0x240] sm:$0xf] }
 0x745   :  { %2296 = vmatpush.bf16.msrb.mxu0 %v3172_v1  ;;  %v3294_v1 = vld [vmem:[%s4953_s1 + $0x268] sm:$0xf0] }
 0x746   :  { %1804 = vmatpush.bf16.msra.mxu1 %v3144_v0  ;;  %v3136_v55 = vor.u32 %v3294_v1, %v3135_v62  ;;  %v5120_v62 = vld [vmem:[#allocation26_spill] sm:$0xff]  ;;  %v5132_v0 = vmov 21  }
 0x748   :  { %1819 = vmatpush.bf16.msra.mxu3 %v3136_v55 }
 0x749   :  { %2297 = vmatpush.bf16.msrb.mxu0 %v3160_v30  ;;  %v3290_v30 = vld [vmem:[%s4953_s1 + $0x248] sm:$0xf0]  ;;  %s3575_s1 = smov [#allocation5]  }
 0x74a   :  { %1805 = vmatpush.bf16.msra.mxu1 %v3132_v42  ;;  %s2694_s17 = sshll.u32 %s3575_s1, 4  ;;  %s2695_s17 = int_to_ptr.vmem [resolvable:$true] %s2694_s17 }
 0x74c   :  { %1820 = vmatpush.bf16.msra.mxu3 %v3124_v23 }
 0x74d   :  { %2298 = vmatpush.bf16.msrb.mxu0 %v3148_v49  ;;  %v1544_v49 = vpop.xlane.xlu2 %1543 }
 0x74e   :  { %1806 = vmatpush.bf16.msra.mxu1 %v3120_v33  ;;  %v1613_v38 = vmul.f32 %v1544_v49, %v5119_v61  ;;  %v5128_v33 = vmov 17   ;;  %v5133_v49 = vmov 7   ;;  %v5136_v61 = vmov 25  }
 0x750   :  { %v1614_v44 = vsub.f32 %v1612_v4, %v1613_v38  ;;  %v5134_v4 = vmov 23   ;;  %v5137_v38 = vmov 9  }
 0x751   :  { %2299 = vmatpush.bf16.msrb.mxu0 %v3136_v55 }
 0x755   :  { %2300 = vmatpush.bf16.msrb.mxu0 %v3124_v23  ;;  %v5129_v23 = vmov 5  }
 0x7b5   :  { %v1608_v52 = vpop.f32.mrf.mxu0 }
 0x7b6   :  { %1618 = vperm.xlu0 %3418, %v1608_v52   ;;  %v5116_v52 = vmov 1.0  }
 0x7b7   :  { %3218 = vmatpush.msk.msrb.mxu3 %vm41_vm1, %v5116_v52  ;;  %v5130_v52 = vmov 19  }
 0x7bb   :  { %v1595_v28 = vpop.f32.mrf.mxu3 }
 0x7bc   :  { %v1615_v54 = vadd.f32 %v1595_v28, %v1141_v31  ;;  %v3116_v31 = vor.u32 %v3290_v30, %v3115_v36  ;;  %v5123_v30 = vmov 13  }
 0x7bd   :  { %v1610_v25 = vpop.f32.mrf.mxu0 }
 0x7be   :  { %1792 = vmatpush.bf16.msra.mxu2 %v3116_v31 }
 0x7c3   :  { %v1597_v24 = vpop.f32.mrf.mxu3 }
 0x828   :  { %v1619_v3 = vpop.permute.xlu0 %1618 }
 0x829   :  { %v1621_v1 = vmul.f32 %v1619_v3, %v5120_v62  ;;  %v5135_v3 = vmov 8   ;;  %v5138_v62 = vmov 28  }
 0x82b   :  { %v1622_v28 = vsub.f32 %v1615_v54, %v1621_v1  ;;  %v5139_v1 = vmov 10  }
 0x82d   :  { %v1623_v42 = vpack.c.bf16 %v1622_v28, %v1614_v44  ;;  %v5140_v44 = vmov 30   ;;  %v5141_v28 = vmov 11  }
 0x82f   :  { %1793 = vmatmul.bf16.vlgmr.msra.gmra.mxu2 %v1623_v42  ;;  %1807 = vmatmul.bf16.vlgmr.msra.gmra.mxu1 %v1623_v42 }
 0x830   :  { %1821 = vmatmul.bf16.vlgmr.msra.gmra.mxu3 %v1623_v42  ;;  %v5142_v42 = vmov 12  }
 0x8b2   :  { %v4642_v55 = vpop.f32.mrf.mxu2 }
 0x8b3   :  { %5121 = vst [vmem:[#allocation8_spill] sm:$0xff] %v4642_v55  ;;  %v2209_v25 = vpack.c.bf16 %v4642_v55, %v4642_v55  ;;  %v4646_v24 = vpop.f32.mrf.mxu3 }
 0x8b4   :  { %1912 = vperm.xlu1 %3420, %v4646_v24   ;;  %1903 = vperm.xlu2 %3419, %v4646_v24  }
 0x8b5   :  { %v2253_v5 = vsel %vm875_vm0, %v2209_v25, 0  ;;  %v5143_v25 = vmov 14  }
 0x8b6   :  { %2262 = vmatpush.bf16.msrb.mxu1 %v2253_v5  ;;  %v5144_v5 = vmov 16  }
 0x8ba   :  { %v4651_v32 = vpop.f32.mrf.mxu2 }
 0x8bb   :  { %5122 = vst [vmem:[#allocation9_spill] sm:$0xff] %v4651_v32  ;;  %v2210_v54 = vpack.c.bf16 %v4651_v32, %v4651_v32  ;;  %v1824_v36 = vpop.f32.mrf.mxu3 }
 0x8bc   :  { %3432 = vset.pattern.permute.xlu1 %v5123_v30  ;;  %3422 = vset.pattern.permute.xlu2 %v5124_v19 }
 0x8bd   :  { %1827 = vxpose.xlu0.b32.start.end [1/1] (short) (narrow) %v1824_v36, 32  ;;  %2020 = vperm.xlu1 %3432, %v4646_v24   ;;  %v2218_v31 = vsel %vm875_vm0, %v2210_v54, 0  ;;  %v5145_v54 = vmov 2   ;;  %v5146_v36 = vmov 18  }
 0x8be   :  { %1930 = vperm.xlu2 %3422, %v4646_v24   ;;  %2227 = vmatpush.bf16.msrb.mxu2 %v2218_v31  ;;  %v5147_v31 = vmov 20  }
 0x8c2   :  { %2275 = vmatpush.bf16.msra.mxu2 %v5125_v13  ;;  %v5149_v13 = vmov 24  }
 0x8c5   :  { %3434 = vset.pattern.permute.xlu1 %v5126_v53 }
 0x8c6   :  { %3423 = vset.pattern.permute.xlu2 %v5127_v37  ;;  %2038 = vperm.xlu1 %3434, %v4646_v24  }
 0x8c7   :  { %1939 = vperm.xlu2 %3423, %v4646_v24  }
 0x8ce   :  { %3436 = vset.pattern.permute.xlu1 %v5128_v33 }
 0x8cf   :  { %3424 = vset.pattern.permute.xlu2 %v5129_v23  ;;  %2056 = vperm.xlu1 %3436, %v4646_v24  }
 0x8d0   :  { %1948 = vperm.xlu2 %3424, %v4646_v24  }
 0x8d7   :  { %3438 = vset.pattern.permute.xlu1 %v5130_v52 }
 0x8d8   :  { %3425 = vset.pattern.permute.xlu2 %v5131_v29  ;;  %2074 = vperm.xlu1 %3438, %v4646_v24  }
 0x8d9   :  { %1957 = vperm.xlu2 %3425, %v4646_v24  }
 0x8e0   :  { %3440 = vset.pattern.permute.xlu1 %v5132_v0  ;;  %v5154_v0 = vmov 0  }
 0x8e1   :  { %3426 = vset.pattern.permute.xlu2 %v5133_v49  ;;  %2092 = vperm.xlu1 %3440, %v4646_v24  }
 0x8e2   :  { %1966 = vperm.xlu2 %3426, %v4646_v24  }
 0x8e9   :  { %3442 = vset.pattern.permute.xlu1 %v5134_v4  ;;  %v5153_v4 = vmov 29  }
 0x8ea   :  { %3427 = vset.pattern.permute.xlu2 %v5135_v3  ;;  %2110 = vperm.xlu1 %3442, %v4646_v24  }
 0x8eb   :  { %1975 = vperm.xlu2 %3427, %v4646_v24  }
 0x8f2   :  { %3444 = vset.pattern.permute.xlu1 %v5136_v61  ;;  %v5152_v61 = vmov 31  }
 0x8f3   :  { %3428 = vset.pattern.permute.xlu2 %v5137_v38  ;;  %2128 = vperm.xlu1 %3444, %v4646_v24  }
 0x8f4   :  { %1984 = vperm.xlu2 %3428, %v4646_v24  }
 0x8fb   :  { %3447 = vset.pattern.permute.xlu1 %v5138_v62  ;;  %v5151_v62 = vmov 27  }
 0x8fc   :  { %3429 = vset.pattern.permute.xlu2 %v5139_v1  ;;  %2155 = vperm.xlu1 %3447, %v4646_v24  }
 0x8fd   :  { %1993 = vperm.xlu2 %3429, %v4646_v24  }
 0x904   :  { %3449 = vset.pattern.permute.xlu1 %v5140_v44  ;;  %v5150_v44 = vmov 26  }
 0x905   :  { %3430 = vset.pattern.permute.xlu2 %v5141_v28  ;;  %2173 = vperm.xlu1 %3449, %v4646_v24  }
 0x906   :  { %2002 = vperm.xlu2 %3430, %v4646_v24  }
 0x90d   :  { %3453 = vset.pattern.permute.xlu1 %v5115_v27  ;;  %v5148_v27 = vmov 22  }
 0x90e   :  { %3431 = vset.pattern.permute.xlu2 %v5142_v42 }
 0x90f   :  { %2011 = vperm.xlu2 %3431, %v4646_v24  }
 0x917   :  { %3433 = vset.pattern.permute.xlu2 %v5143_v25 }
 0x918   :  { %2029 = vperm.xlu2 %3433, %v4646_v24  }
 0x920   :  { %3435 = vset.pattern.permute.xlu2 %v5144_v5 }
 0x921   :  { %2047 = vperm.xlu2 %3435, %v4646_v24  }
 0x924   :  { %3421 = vset.pattern.permute.xlu0 %v5145_v54  ;;  %v1904_v54 = vpop.permute.xlu2 %1903 }
 0x926   :  { %v1913_v38 = vpop.permute.xlu1 %1912 }
 0x929   :  { %3437 = vset.pattern.permute.xlu2 %v5146_v36  ;;  %v5155_v36 = vld [vmem:[#allocation10_spill] sm:$0xff] }
 0x92a   :  { %2065 = vperm.xlu2 %3437, %v4646_v24  }
 0x932   :  { %3439 = vset.pattern.permute.xlu2 %v5147_v31 }
 0x933   :  { %2083 = vperm.xlu2 %3439, %v4646_v24  }
 0x93b   :  { %3441 = vset.pattern.permute.xlu2 %v5148_v27 }
 0x93c   :  { %2101 = vperm.xlu2 %3441, %v4646_v24  }
 0x943   :  { %1921 = vperm.xlu0 %3421, %v4646_v24  }
 0x944   :  { %3443 = vset.pattern.permute.xlu2 %v5149_v13 }
 0x945   :  { %2119 = vperm.xlu2 %3443, %v4646_v24  }
 0x94b   :  { %3445 = vset.pattern.permute.xlu0 %v5150_v44 }
 0x94c   :  { %2137 = vperm.xlu0 %3445, %v4646_v24  }
 0x94d   :  { %3446 = vset.pattern.permute.xlu2 %v5151_v62  ;;  %v1931_v62 = vpop.permute.xlu2 %1930 }
 0x94e   :  { %2146 = vperm.xlu2 %3446, %v4646_v24  }
 0x954   :  { %3450 = vset.pattern.permute.xlu0 %v5152_v61 }
 0x955   :  { %2182 = vperm.xlu0 %3450, %v4646_v24   ;;  %v1940_v61 = vpop.permute.xlu2 %1939 }
 0x956   :  { %3448 = vset.pattern.permute.xlu2 %v5153_v4 }
 0x957   :  { %2164 = vperm.xlu2 %3448, %v4646_v24  }
 0x95d   :  { %3451 = vset.pattern.permute.xlu0 %v5154_v0  ;;  %v1949_v4 = vpop.permute.xlu2 %1948 }
 0x961   :  { %v1843_v52 = vpop.trf.xlu0 }
 0x962   :  { %3210 = vmatmul.msk.f32.vlgmr.msra.gmra.mxu0 %vm451_vm2, %v1843_v52 }
 0x965   :  { %v1958_v28 = vpop.permute.xlu2 %1957 }
 0x969   :  { %v1844_v33 = vpop.trf.xlu0 }
 0x96a   :  { %3211 = vmatmul.msk.f32.gmra.mxu0 %vm451_vm2, %v1844_v33  ;;  %v4729_v33 = vpop.permute.xlu1 %2020 }
 0x96d   :  { %v1967_v24 = vpop.permute.xlu2 %1966 }
 0x971   :  { %v1845_v53 = vpop.trf.xlu0 }
 0x972   :  { %3212 = vmatmul.msk.f32.gmra.mxu0 %vm451_vm2, %v1845_v53  ;;  %v4733_v53 = vpop.permute.xlu1 %2038 }
 0x975   :  { %v1976_v44 = vpop.permute.xlu2 %1975 }
 0x979   :  { %v1846_v30 = vpop.trf.xlu0 }
 0x97a   :  { %3213 = vmatmul.msk.f32.gmra.mxu0 %vm451_vm2, %v1846_v30  ;;  %v4737_v30 = vpop.permute.xlu1 %2056 }
 0x97d   :  { %v1985_v1 = vpop.permute.xlu2 %1984 }
 0x982   :  { %v4743_v34 = vpop.permute.xlu1 %2074 }
 0x985   :  { %v4723_v13 = vpop.permute.xlu2 %1993 }
 0x98d   :  { %v4725_v52 = vpop.permute.xlu2 %2002 }
 0x995   :  { %v4727_v27 = vpop.permute.xlu2 %2011 }
 0x99d   :  { %v4731_v3 = vpop.permute.xlu2 %2029 }
 0x9a5   :  { %v4735_v31 = vpop.permute.xlu2 %2047 }
 0x9ad   :  { %v4740_v50 = vpop.permute.xlu2 %2065 }
 0x9b5   :  { %v1922_v42 = vpop.permute.xlu0 %1921 }
 0x9df   :  { %v1888_v49 = vpop.f32.mrf.mxu0 }
 0x9e0   :  { %v1889_v29 = vadd.f32 %v1888_v49, %v5155_v36 }
 0x9e2   :  { %v1900_v5 = vperm.slane %v1889_v29, 0  ;;  %v1910_v23 = vperm.slane %v1889_v29, 1  ;;  %v1919_v25 = vperm.slane %v1889_v29, 2  ;;  %v1928_v37 = vperm.slane %v1889_v29, 3 }
 0x9e3   :  { %v1937_v0 = vperm.slane %v1889_v29, 4  ;;  %v1946_v8 = vperm.slane %v1889_v29, 5  ;;  %v1955_v59 = vperm.slane %v1889_v29, 6  ;;  %v1964_v14 = vperm.slane %v1889_v29, 7 }
 0x9e4   :  { %v1906_v19 = vsub.f32 %v1900_v5, %v1904_v54  ;;  %v1915_v32 = vsub.f32 %v1910_v23, %v1913_v38  ;;  %v1924_v55 = vsub.f32 %v1919_v25, %v1922_v42  ;;  %v1933_v17 = vsub.f32 %v1928_v37, %v1931_v62  ;;  %v5156_v38 = vld [vmem:[#allocation11_spill] sm:$0xff] }
 0x9e5   :  { %v1942_v36 = vsub.f32 %v1937_v0, %v1940_v61  ;;  %v1951_v57 = vsub.f32 %v1946_v8, %v1949_v4 }
 0x9e6   :  { %v1907_v58 = vmax.f32 %v1906_v19, 0.0  ;;  %v1916_v39 = vmax.f32 %v1915_v32, 0.0  ;;  %v1925_v49 = vmax.f32 %v1924_v55, 0.0  ;;  %v1934_v25 = vmax.f32 %v1933_v17, 0.0 }
 0x9e7   :  { %v1891_v18 = vpop.f32.mrf.mxu0  ;;  %v1960_v19 = vsub.f32 %v1955_v59, %v1958_v28  ;;  %v1943_v5 = vmax.f32 %v1942_v36, 0.0  ;;  %v1952_v61 = vmax.f32 %v1951_v57, 0.0 }
 0x9e8   :  { %v1908_v56 = vmul.f32 %v1907_v58, %v3990_v41  ;;  %v1917_v42 = vmul.f32 %v1916_v39, %v5156_v38  ;;  %v1892_v32 = vadd.f32 %v1891_v18, %v3955_v12  ;;  %v1926_v62 = vmul.f32 %v1925_v49, %v3999_v7  ;;  %v4751_v38 = vpop.permute.xlu2 %2083 }
 0x9e9   :  { %v1969_v58 = vsub.f32 %v1964_v14, %v1967_v24  ;;  %v1935_v0 = vmul.f32 %v1934_v25, %v4008_v60  ;;  %v1961_v29 = vmax.f32 %v1960_v19, 0.0  ;;  %v1953_v28 = vmul.f32 %v1952_v61, %v4017_v43  ;;  %v4754_v14 = vpop.permute.xlu1 %2092 }
 0x9ea   :  { %v1909_v23 = vadd.f32 %v1908_v56, %v3992_v2  ;;  %v1973_v54 = vperm.slane %v1892_v32, 0  ;;  %v1982_v8 = vperm.slane %v1892_v32, 1  ;;  %v1944_v56 = vmul.f32 %v1943_v5, %v4012_v11 }
 0x9eb   :  { %v1991_v17 = vperm.slane %v1892_v32, 2  ;;  %v1970_v18 = vmax.f32 %v1969_v58, 0.0  ;;  %v2000_v49 = vperm.slane %v1892_v32, 3  ;;  %v2009_v24 = vperm.slane %v1892_v32, 4 }
 0x9ec   :  { %v1918_v37 = vadd.f32 %v1917_v42, %v1909_v23  ;;  %v1978_v39 = vsub.f32 %v1973_v54, %v1976_v44  ;;  %v1987_v36 = vsub.f32 %v1982_v8, %v1985_v1  ;;  %v1962_v57 = vmul.f32 %v1961_v29, %v4022_v63 }
 0x9ed   :  { %v1996_v25 = vsub.f32 %v1991_v17, %v4723_v13  ;;  %v2018_v19 = vperm.slane %v1892_v32, 5  ;;  %v2005_v54 = vsub.f32 %v2000_v49, %v4725_v52  ;;  %v2014_v1 = vsub.f32 %v2009_v24, %v4727_v27 }
 0x9ee   :  { %v1927_v55 = vadd.f32 %v1926_v62, %v1918_v37  ;;  %v1979_v42 = vmax.f32 %v1978_v39, 0.0  ;;  %v1971_v62 = vmul.f32 %v1970_v18, %v4029_v10  ;;  %v1988_v5 = vmax.f32 %v1987_v36, 0.0 }
 0x9ef   :  { %v1894_v44 = vpop.f32.mrf.mxu0  ;;  %v2027_v58 = vperm.slane %v1892_v32, 6  ;;  %v1997_v61 = vmax.f32 %v1996_v25, 0.0  ;;  %v2023_v29 = vsub.f32 %v2018_v19, %v4729_v33  ;;  %v2036_v39 = vperm.slane %v1892_v32, 7 }
 0x9f0   :  { %v1936_v4 = vadd.f32 %v1935_v0, %v1927_v55  ;;  %v1980_v0 = vmul.f32 %v1979_v42, %v4038_v16  ;;  %v1895_v8 = vadd.f32 %v1894_v44, %v3971_v22  ;;  %v2102_v17 = vpop.permute.xlu2 %2101 }
 0x9f1   :  { %v2032_v18 = vsub.f32 %v2027_v58, %v4731_v3  ;;  %v1998_v27 = vmul.f32 %v1997_v61, %v4051_v35  ;;  %v2111_v36 = vpop.permute.xlu1 %2110  ;;  %v2024_v49 = vmax.f32 %v2023_v29, 0.0  ;;  %v2041_v33 = vsub.f32 %v2036_v39, %v4733_v53 }
 0x9f2   :  { %v1945_v59 = vadd.f32 %v1944_v56, %v1936_v4  ;;  %v1989_v4 = vmul.f32 %v1988_v5, %v4043_v51  ;;  %v2006_v56 = vmax.f32 %v2005_v54, 0.0  ;;  %v2063_v42 = vperm.slane %v1895_v8, 2 }
 0x9f3   :  { %v2033_v19 = vmax.f32 %v2032_v18, 0.0  ;;  %v2025_v44 = vmul.f32 %v2024_v49, %v4066_v40  ;;  %v2072_v54 = vperm.slane %v1895_v8, 3  ;;  %v2081_v58 = vperm.slane %v1895_v8, 4 }
 0x9f4   :  { %v1954_v23 = vadd.f32 %v1953_v28, %v1945_v59  ;;  %v2015_v59 = vmax.f32 %v2014_v1, 0.0  ;;  %v2045_v28 = vperm.slane %v1895_v8, 0  ;;  %v2068_v1 = vsub.f32 %v2063_v42, %v4740_v50 }
 0x9f5   :  { %v2034_v53 = vmul.f32 %v2033_v19, %v4077_v9  ;;  %v2090_v29 = vperm.slane %v1895_v8, 5  ;;  %v2077_v39 = vsub.f32 %v2072_v54, %v4743_v34 }
 0x9f6   :  { %v1963_v37 = vadd.f32 %v1962_v57, %v1954_v23  ;;  %v2007_v23 = vmul.f32 %v2006_v56, %v4056_v45  ;;  %v2054_v57 = vperm.slane %v1895_v8, 1  ;;  %v2016_v32 = vmul.f32 %v2015_v59, %v4064_v21 }
 0x9f7   :  { %v2050_v3 = vsub.f32 %v2045_v28, %v4735_v31  ;;  %v2099_v59 = vperm.slane %v1895_v8, 6  ;;  %v2095_v49 = vsub.f32 %v2090_v29, %v4754_v14  ;;  %v5157_v29 = vld [vmem:[#allocation13_spill] sm:$0xff] }
 0x9f8   :  { %v1972_v55 = vadd.f32 %v1971_v62, %v1963_v37  ;;  %v2042_v62 = vmax.f32 %v2041_v33, 0.0  ;;  %v2059_v5 = vsub.f32 %v2054_v57, %v4737_v30  ;;  %v2120_v61 = vpop.permute.xlu2 %2119  ;;  %v2086_v30 = vsub.f32 %v2081_v58, %v4751_v38 }
 0x9f9   :  { %v2129_v18 = vpop.permute.xlu1 %2128  ;;  %v2078_v33 = vmax.f32 %v2077_v39, 0.0  ;;  %v2108_v57 = vperm.slane %v1895_v8, 7  ;;  %v2096_v38 = vmax.f32 %v2095_v49, 0.0 }
 0x9fa   :  { %v1981_v13 = vadd.f32 %v1980_v0, %v1972_v55  ;;  %v2051_v0 = vmax.f32 %v2050_v3, 0.0  ;;  %v2043_v31 = vmul.f32 %v2042_v62, %v4083_v47  ;;  %v2060_v56 = vmax.f32 %v2059_v5, 0.0 }
 0x9fb   :  { %v2087_v42 = vmax.f32 %v2086_v30, 0.0 }
 0x9fc   :  { %v1990_v52 = vadd.f32 %v1989_v4, %v1981_v13  ;;  %v1897_v13 = vpop.f32.mrf.mxu0  ;;  %v2052_v50 = vmul.f32 %v2051_v0, %v4088_v6 }
 0x9fd   :  { %v1898_v28 = vadd.f32 %v1897_v13, %v4006_v46  ;;  %v2088_v14 = vmul.f32 %v2087_v42, %v4109_v26  ;;  %v2097_v13 = vmul.f32 %v2096_v38, %v5157_v29  ;;  %v5160_v42 = vld [vmem:[#allocation16_spill] sm:$0xff] }
 0x9fe   :  { %v1999_v24 = vadd.f32 %v1998_v27, %v1990_v52  ;;  %v2069_v52 = vmax.f32 %v2068_v1, 0.0 }
 0x9ff   :  { %v2117_v19 = vperm.slane %v1898_v28, 0  ;;  %v2126_v62 = vperm.slane %v1898_v28, 1 }
 0xa00   :  { %v2008_v25 = vadd.f32 %v2007_v23, %v1999_v24  ;;  %v2061_v23 = vmul.f32 %v2060_v56, %v4093_v48  ;;  %v2070_v34 = vmul.f32 %v2069_v52, %v4101_v20  ;;  %v2147_v5 = vpop.permute.xlu2 %2146  ;;  %v2153_v56 = vperm.slane %v1898_v28, 4  ;;  %v5158_v52 = vld [vmem:[#allocation14_spill] sm:$0xff] }
 0xa01   :  { %v2122_v58 = vsub.f32 %v2117_v19, %v2120_v61  ;;  %v2156_v8 = vpop.permute.xlu1 %2155 }
 0xa02   :  { %v2017_v37 = vadd.f32 %v2016_v32, %v2008_v25  ;;  %v2104_v32 = vsub.f32 %v2099_v59, %v2102_v17  ;;  %v5159_v59 = vld [vmem:[#allocation15_spill] sm:$0xff] }
 0xa03   :  { %v2123_v30 = vmax.f32 %v2122_v58, 0.0 }
 0xa04   :  { %v2026_v55 = vadd.f32 %v2025_v44, %v2017_v37  ;;  %v2079_v44 = vmul.f32 %v2078_v33, %v4107_v15  ;;  %v2113_v37 = vsub.f32 %v2108_v57, %v2111_v36  ;;  %v2105_v1 = vmax.f32 %v2104_v32, 0.0 }
 0xa05   :  { %v2158_v33 = vsub.f32 %v2153_v56, %v2156_v8  ;;  %v2171_v32 = vperm.slane %v1898_v28, 6  ;;  %v5164_v56 = vld [vmem:[#allocation20_spill] sm:$0xff] }
 0xa06   :  { %v2035_v4 = vadd.f32 %v2034_v53, %v2026_v55  ;;  %v2135_v55 = vperm.slane %v1898_v28, 2  ;;  %v2144_v53 = vperm.slane %v1898_v28, 3  ;;  %v2114_v17 = vmax.f32 %v2113_v37, 0.0 }
 0xa07   :  { %v2106_v36 = vmul.f32 %v2105_v1, %v5158_v52  ;;  %v2159_v58 = vmax.f32 %v2158_v33, 0.0  ;;  %v5167_v33 = vld [vmem:[#allocation23_spill] sm:$0xff] }
 0xa08   :  { %v2044_v27 = vadd.f32 %v2043_v31, %v2035_v4  ;;  %v2131_v4 = vsub.f32 %v2126_v62, %v2129_v18  ;;  %v2138_v31 = vpop.permute.xlu0 %2137  ;;  %v2115_v49 = vmul.f32 %v2114_v17, %v5159_v59  ;;  %v2165_v18 = vpop.permute.xlu2 %2164  ;;  %v2180_v62 = vperm.slane %v1898_v28, 7 }
 0xa0a   :  { %v2053_v24 = vadd.f32 %v2052_v50, %v2044_v27  ;;  %v2140_v27 = vsub.f32 %v2135_v55, %v2138_v31  ;;  %v2149_v50 = vsub.f32 %v2144_v53, %v2147_v5 }
 0xa0c   :  { %v2062_v25 = vadd.f32 %v2061_v23, %v2053_v24  ;;  %v2132_v24 = vmax.f32 %v2131_v4, 0.0  ;;  %v2162_v23 = vperm.slane %v1898_v28, 5  ;;  %v2150_v19 = vmax.f32 %v2149_v50, 0.0 }
 0xa0e   :  { %v2071_v3 = vadd.f32 %v2070_v34, %v2062_v25  ;;  %v2124_v25 = vmul.f32 %v2123_v30, %v5160_v42  ;;  %v2141_v34 = vmax.f32 %v2140_v27, 0.0  ;;  %v2167_v37 = vsub.f32 %v2162_v23, %v2165_v18  ;;  %v5165_v27 = vld [vmem:[#allocation21_spill] sm:$0xff] }
 0xa10   :  { %v2080_v54 = vadd.f32 %v2079_v44, %v2071_v3  ;;  %v5161_v3 = vld [vmem:[#allocation17_spill] sm:$0xff]  ;;  %v2183_v53 = vpop.permute.xlu0 %2182  ;;  %v2168_v17 = vmax.f32 %v2167_v37, 0.0 }
 0xa11   :  { %v2133_v44 = vmul.f32 %v2132_v24, %v5161_v3  ;;  %v2185_v4 = vsub.f32 %v2180_v62, %v2183_v53  ;;  %v5166_v24 = vld [vmem:[#allocation22_spill] sm:$0xff] }
 0xa12   :  { %v2089_v0 = vadd.f32 %v2088_v14, %v2080_v54  ;;  %v2174_v14 = vpop.permute.xlu1 %2173  ;;  %v5162_v54 = vld [vmem:[#allocation18_spill] sm:$0xff]  ;;  %v2169_v50 = vmul.f32 %v2168_v17, %v5165_v27 }
 0xa13   :  { %v2142_v1 = vmul.f32 %v2141_v34, %v5162_v54  ;;  %v2176_v55 = vsub.f32 %v2171_v32, %v2174_v14  ;;  %v2186_v28 = vmax.f32 %v2185_v4, 0.0 }
 0xa14   :  { %v2098_v39 = vadd.f32 %v2097_v13, %v2089_v0  ;;  %v5163_v0 = vld [vmem:[#allocation19_spill] sm:$0xff] }
 0xa15   :  { %v2151_v13 = vmul.f32 %v2150_v19, %v5163_v0 }
 0xa16   :  { %v2107_v61 = vadd.f32 %v2106_v36, %v2098_v39  ;;  %v2160_v39 = vmul.f32 %v2159_v58, %v5164_v56  ;;  %v2177_v36 = vmax.f32 %v2176_v55, 0.0 }
 0xa18   :  { %v2116_v57 = vadd.f32 %v2115_v49, %v2107_v61  ;;  %v2178_v61 = vmul.f32 %v2177_v36, %v5166_v24 }
 0xa1a   :  { %v2125_v38 = vadd.f32 %v2124_v25, %v2116_v57  ;;  %v2187_v57 = vmul.f32 %v2186_v28, %v5167_v33 }
 0xa1c   :  { %v2134_v5 = vadd.f32 %v2133_v44, %v2125_v38 }
 0xa1e   :  { %v2143_v8 = vadd.f32 %v2142_v1, %v2134_v5 }
 0xa20   :  { %v2152_v31 = vadd.f32 %v2151_v13, %v2143_v8  ;;  %v5168_v13 = vmov 0  }
 0xa22   :  { %v2161_v30 = vadd.f32 %v2160_v39, %v2152_v31  ;;  %v1808_v39 = vpop.f32.mrf.mxu1 }
 0xa24   :  { %v2170_v49 = vadd.f32 %v2169_v50, %v2161_v30 }
 0xa26   :  { %v2179_v23 = vadd.f32 %v2178_v61, %v2170_v49 }
 0xa28   :  { %v2188_v25 = vadd.f32 %v2187_v57, %v2179_v23 }
 0xa2a   :  { %v3214_v34 = vmul.f32 -1.442695, %v2188_v25  ;;  %v1810_v36 = vpop.f32.mrf.mxu1 }
 0xa2c   :  { %3493 = vpow2.f32 %v3214_v34  ;;  %v5169_v34 = vld [vmem:[#allocation8_spill] sm:$0xff] }
 0xa32   :  { %v3494_v32 = vpop.eup %3493 }
 0xa33   :  { %v2192_v18 = vadd.f32 1.0, %v3494_v32 }
 0xa35   :  { %3495 = vrcp.f32 %v2192_v18  ;;  %v2204_v37 = vand.u32 2147483648, %v2192_v18  ;;  %v2202_v14 = vand.u32 2147483647, %v2192_v18  ;;  %vm2198_vm12 = vweird.f32 %v2192_v18 }
 0xa37   :  { %v2205_v1 = vor.u32 1.1754944e-38, %v2204_v37  ;;  %vm2203_vm14 = vcmp.eq.f32.partialorder %v2202_v14, 8.507059e+37 }
 0xa3b   :  { %v3496_v19 = vpop.eup %3495 }
 0xa3c   :  { %v2194_v38 = vmul.f32 %v3496_v19, %v2192_v18  ;;  %vm2199_vm11 = vweird.f32 %v3496_v19  ;;  %v5170_v18 = vld [vmem:[#allocation9_spill] sm:$0xff] }
 0xa3d   :  { %vm2200_vm13 = vmor %vm2198_vm12, %vm2199_vm11 }
 0xa3e   :  { %v2195_v44 = vsub.f32 1.0, %v2194_v38 }
 0xa40   :  { %v2196_v62 = vmul.f32 %v3496_v19, %v2195_v44 }
 0xa42   :  { %v2197_v5 = vadd.f32 %v3496_v19, %v2196_v62 }
 0xa44   :  { %v2201_v58 = vsel %vm2200_vm13, %v3496_v19, %v2197_v5  ;;  %v5171_v5 = vmov 3  }
 0xa45   :  { %v2206_v55 = vsel %vm2203_vm14, %v2205_v1, %v2201_v58  ;;  %v5172_v1 = vmov 12   ;;  %v5173_v58 = vmov 4  }
 0xa46   :  { %v2211_v53 = vsel %vm451_vm2, %v2206_v55, 0.0  ;;  %v2208_v8 = vpack.c.bf16 %v2206_v55, %v2206_v55  ;;  %v5174_v55 = vmov 14  }
 0xa47   :  { %2212 = vadd.xlane.f32.xlu1 %v2211_v53  ;;  %v5175_v53 = vmov 5  }
 0xa48   :  { %2233 = vxpose.xlu2.c.b16.start.end [1/1] (short) (narrow) %v2208_v8, 16  ;;  %3215 = vmatmul.msk.bf16.vlgmr.msrb.gmra.mxu2 %vm451_vm2, %v2208_v8  ;;  %v5176_v8 = vmov 16  }
 0xaaa   :  { %3452 = vset.pattern.permute.xlu2 %v5168_v13  ;;  %v5177_v13 = vmov 6  }
 0xaba   :  { %v2213_v23 = vpop.xlane.xlu1 %2212 }
 0xabb   :  { %v2282_v32 = vmul.f32 %v2213_v23, %v5169_v34  ;;  %v5188_v23 = vmov 29   ;;  %v5191_v34 = vmov 15  }
 0xacb   :  { %v2229_v17 = vpop.f32.mrf.mxu2 }
 0xacc   :  { %v2281_v57 = vadd.f32 %v2229_v17, %v1808_v39  ;;  %v5178_v17 = vmov 18   ;;  %v5181_v39 = vmov 8  }
 0xace   :  { %v2283_v38 = vsub.f32 %v2281_v57, %v2282_v32  ;;  %v5189_v57 = vmov 13   ;;  %v5192_v32 = vmov 17  }
 0xad3   :  { %v2231_v4 = vpop.f32.mrf.mxu2 }
 0xad4   :  { %v5179_v4 = vmov 7  }
 0xae9   :  { %v2241_v31 = vpop.trf.xlu2 }
 0xaea   :  { %3216 = vmatmul.msk.bf16.vlgmr.msrb.gmra.mxu1 %vm451_vm2, %v2241_v31  ;;  %3217 = vmatmul.msk.bf16.vlgmr.msra.gmra.mxu2 %vm451_vm2, %v2241_v31  ;;  %v5180_v31 = vmov 20  }
 0xb67   :  { %v2264_v30 = vpop.f32.mrf.mxu1 }
 0xb68   :  { %v2284_v50 = vadd.f32 %v2264_v30, %v1810_v36  ;;  %v5182_v36 = vmov 22   ;;  %v5183_v30 = vmov 9  }
 0xb6d   :  { %v2277_v28 = vpop.f32.mrf.mxu2 }
 0xb6e   :  { %2287 = vperm.xlu0 %3451, %v2277_v28   ;;  %v5185_v28 = vmov 10  }
 0xb6f   :  { %v2266_v49 = vpop.f32.mrf.mxu1 }
 0xb70   :  { %v5186_v49 = vmov 26  }
 0xb75   :  { %v2279_v61 = vpop.f32.mrf.mxu2 }
 0xb76   :  { %v5187_v61 = vmov 11  }
 0xbe0   :  { %v2288_v25 = vpop.permute.xlu0 %2287 }
 0xbe1   :  { %v2290_v19 = vmul.f32 %v2288_v25, %v5170_v18  ;;  %v5190_v25 = vmov 31   ;;  %v5193_v18 = vmov 2  }
 0xbe3   :  { %v2291_v44 = vsub.f32 %v2284_v50, %v2290_v19  ;;  %v5184_v50 = vmov 24   ;;  %v5194_v19 = vmov 19  }
 0xbe5   :  { %v2292_v37 = vpack.c.bf16 %v2291_v44, %v2283_v38  ;;  %v5195_v38 = vmov 21   ;;  %v5196_v44 = vmov 23  }
 0xbe7   :  { %2301 = vmatmul.bf16.vlgmr.msrb.gmra.mxu0 %v2292_v37  ;;  %v5197_v37 = vmov 25  }
 0xc64   :  { %v4803_v62 = vpop.f32.mrf.mxu0 }
 0xc65   :  { %2392 = vperm.xlu1 %3453, %v4803_v62   ;;  %2383 = vperm.xlu2 %3452, %v4803_v62  }
 0xc6c   :  { %v2304_v14 = vpop.f32.mrf.mxu0 }
 0xc6d   :  { %3455 = vset.pattern.permute.xlu1 %v5171_v5  ;;  %3464 = vset.pattern.permute.xlu2 %v5172_v1  ;;  %v5199_v5 = vmov 28   ;;  %v5200_v1 = vmov 30  }
 0xc6e   :  { %2307 = vxpose.xlu0.b32.start.end [1/1] (short) (narrow) %v2304_v14, 32  ;;  %2410 = vperm.xlu1 %3455, %v4803_v62   ;;  %v5198_v14 = vmov 27  }
 0xc6f   :  { %2491 = vperm.xlu2 %3464, %v4803_v62  }
 0xc76   :  { %3456 = vset.pattern.permute.xlu1 %v5173_v58 }
 0xc77   :  { %3466 = vset.pattern.permute.xlu2 %v5174_v55  ;;  %2419 = vperm.xlu1 %3456, %v4803_v62  }
 0xc78   :  { %2509 = vperm.xlu2 %3466, %v4803_v62  }
 0xc7f   :  { %3457 = vset.pattern.permute.xlu1 %v5175_v53 }
 0xc80   :  { %3468 = vset.pattern.permute.xlu2 %v5176_v8  ;;  %2428 = vperm.xlu1 %3457, %v4803_v62  }
 0xc81   :  { %2527 = vperm.xlu2 %3468, %v4803_v62  }
 0xc88   :  { %3458 = vset.pattern.permute.xlu1 %v5177_v13 }
 0xc89   :  { %3470 = vset.pattern.permute.xlu2 %v5178_v17  ;;  %2437 = vperm.xlu1 %3458, %v4803_v62  }
 0xc8a   :  { %2545 = vperm.xlu2 %3470, %v4803_v62  }
 0xc91   :  { %3459 = vset.pattern.permute.xlu1 %v5179_v4 }
 0xc92   :  { %3472 = vset.pattern.permute.xlu2 %v5180_v31  ;;  %2446 = vperm.xlu1 %3459, %v4803_v62  }
 0xc93   :  { %2563 = vperm.xlu2 %3472, %v4803_v62  }
 0xc9a   :  { %3460 = vset.pattern.permute.xlu1 %v5181_v39 }
 0xc9b   :  { %3474 = vset.pattern.permute.xlu2 %v5182_v36  ;;  %2455 = vperm.xlu1 %3460, %v4803_v62  }
 0xc9c   :  { %2581 = vperm.xlu2 %3474, %v4803_v62  }
 0xca3   :  { %3461 = vset.pattern.permute.xlu1 %v5183_v30 }
 0xca4   :  { %3476 = vset.pattern.permute.xlu2 %v5184_v50  ;;  %2464 = vperm.xlu1 %3461, %v4803_v62  }
 0xca5   :  { %2599 = vperm.xlu2 %3476, %v4803_v62  }
 0xcac   :  { %3462 = vset.pattern.permute.xlu1 %v5185_v28 }
 0xcad   :  { %3478 = vset.pattern.permute.xlu2 %v5186_v49  ;;  %2473 = vperm.xlu1 %3462, %v4803_v62  }
 0xcae   :  { %2617 = vperm.xlu2 %3478, %v4803_v62  }
 0xcb5   :  { %3463 = vset.pattern.permute.xlu1 %v5187_v61 }
 0xcb6   :  { %3481 = vset.pattern.permute.xlu2 %v5188_v23  ;;  %2482 = vperm.xlu1 %3463, %v4803_v62  }
 0xcb7   :  { %2644 = vperm.xlu2 %3481, %v4803_v62  }
 0xcbe   :  { %3465 = vset.pattern.permute.xlu1 %v5189_v57 }
 0xcbf   :  { %3483 = vset.pattern.permute.xlu2 %v5190_v25  ;;  %2500 = vperm.xlu1 %3465, %v4803_v62   ;;  %v2384_v28 = vpop.permute.xlu2 %2383 }
 0xcc0   :  { %2662 = vperm.xlu2 %3483, %v4803_v62  }
 0xcc7   :  { %3467 = vset.pattern.permute.xlu1 %v5191_v34 }
 0xcc8   :  { %2518 = vperm.xlu1 %3467, %v4803_v62  }
 0xcc9   :  { %v4876_v61 = vpop.permute.xlu2 %2491 }
 0xcd0   :  { %3469 = vset.pattern.permute.xlu1 %v5192_v32 }
 0xcd1   :  { %2536 = vperm.xlu1 %3469, %v4803_v62  }
 0xcd2   :  { %v4880_v57 = vpop.permute.xlu2 %2509 }
 0xcd5   :  { %3454 = vset.pattern.permute.xlu0 %v5193_v18 }
 0xcd7   :  { %v2393_v53 = vpop.permute.xlu1 %2392 }
 0xcd9   :  { %3471 = vset.pattern.permute.xlu1 %v5194_v19  ;;  %v5201_v19 = vld [vmem:[#allocation10_spill] sm:$0xff] }
 0xcda   :  { %2554 = vperm.xlu1 %3471, %v4803_v62  }
 0xcdb   :  { %v4884_v34 = vpop.permute.xlu2 %2527 }
 0xce0   :  { %v2411_v13 = vpop.permute.xlu1 %2410 }
 0xce2   :  { %3473 = vset.pattern.permute.xlu1 %v5195_v38 }
 0xce3   :  { %2572 = vperm.xlu1 %3473, %v4803_v62  }
 0xce9   :  { %v2420_v4 = vpop.permute.xlu1 %2419 }
 0xceb   :  { %3475 = vset.pattern.permute.xlu1 %v5196_v44  ;;  %v4889_v44 = vpop.permute.xlu2 %2545 }
 0xcec   :  { %2590 = vperm.xlu1 %3475, %v4803_v62  }
 0xcf2   :  { %v2429_v31 = vpop.permute.xlu1 %2428 }
 0xcf4   :  { %2401 = vperm.xlu0 %3454, %v4803_v62   ;;  %3477 = vset.pattern.permute.xlu1 %v5197_v37 }
 0xcf5   :  { %2608 = vperm.xlu1 %3477, %v4803_v62  }
 0xcfb   :  { %v2438_v39 = vpop.permute.xlu1 %2437 }
 0xcfc   :  { %3479 = vset.pattern.permute.xlu0 %v5198_v14 }
 0xcfd   :  { %2626 = vperm.xlu0 %3479, %v4803_v62   ;;  %3480 = vset.pattern.permute.xlu1 %v5199_v5 }
 0xcfe   :  { %2635 = vperm.xlu1 %3480, %v4803_v62  }
 0xd04   :  { %v2447_v36 = vpop.permute.xlu1 %2446 }
 0xd05   :  { %3484 = vset.pattern.permute.xlu0 %v5190_v25 }
 0xd06   :  { %3482 = vset.pattern.permute.xlu1 %v5200_v1 }
 0xd07   :  { %2653 = vperm.xlu1 %3482, %v4803_v62  }
 0xd0d   :  { %v2456_v30 = vpop.permute.xlu1 %2455 }
 0xd12   :  { %v2323_v58 = vpop.trf.xlu0 }
 0xd13   :  { %3219 = vmatmul.msk.f32.vlgmr.msrb.gmra.mxu3 %vm451_vm2, %v2323_v58 }
 0xd16   :  { %v2465_v62 = vpop.permute.xlu1 %2464 }
 0xd1a   :  { %v2324_v55 = vpop.trf.xlu0 }
 0xd1b   :  { %3220 = vmatmul.msk.f32.gmra.mxu3 %vm451_vm2, %v2324_v55 }
 0xd1f   :  { %v4872_v50 = vpop.permute.xlu1 %2473 }
 0xd22   :  { %v2325_v8 = vpop.trf.xlu0 }
 0xd23   :  { %3221 = vmatmul.msk.f32.gmra.mxu3 %vm451_vm2, %v2325_v8 }
 0xd28   :  { %v4874_v49 = vpop.permute.xlu1 %2482 }
 0xd2a   :  { %v2326_v17 = vpop.trf.xlu0 }
 0xd2b   :  { %3222 = vmatmul.msk.f32.gmra.mxu3 %vm451_vm2, %v2326_v17 }
 0xd31   :  { %v4878_v23 = vpop.permute.xlu1 %2500 }
 0xd3a   :  { %v4882_v25 = vpop.permute.xlu1 %2518 }
 0xd43   :  { %v4886_v32 = vpop.permute.xlu1 %2536 }
 0xd4c   :  { %v4892_v59 = vpop.permute.xlu1 %2554 }
 0xd66   :  { %v2402_v58 = vpop.permute.xlu0 %2401 }
 0xd96   :  { %v2368_v18 = vpop.f32.mrf.mxu3 }
 0xd97   :  { %v2369_v38 = vadd.f32 %v2368_v18, %v5201_v19 }
 0xd99   :  { %v2380_v37 = vperm.slane %v2369_v38, 0  ;;  %v2390_v14 = vperm.slane %v2369_v38, 1  ;;  %v2399_v5 = vperm.slane %v2369_v38, 2  ;;  %v2408_v1 = vperm.slane %v2369_v38, 3 }
 0xd9a   :  { %v2417_v33 = vperm.slane %v2369_v38, 4  ;;  %v2426_v24 = vperm.slane %v2369_v38, 5  ;;  %v2435_v54 = vperm.slane %v2369_v38, 6  ;;  %v2444_v29 = vperm.slane %v2369_v38, 7 }
 0xd9b   :  { %v2386_v55 = vsub.f32 %v2380_v37, %v2384_v28  ;;  %v2395_v8 = vsub.f32 %v2390_v14, %v2393_v53  ;;  %v2404_v17 = vsub.f32 %v2399_v5, %v2402_v58  ;;  %v2413_v0 = vsub.f32 %v2408_v1, %v2411_v13  ;;  %v5202_v28 = vld [vmem:[#allocation11_spill] sm:$0xff]  ;;  %v4897_v5 = vpop.permute.xlu2 %2563 }
 0xd9c   :  { %v2422_v19 = vsub.f32 %v2417_v33, %v2420_v4  ;;  %v2431_v52 = vsub.f32 %v2426_v24, %v2429_v31  ;;  %v2440_v13 = vsub.f32 %v2435_v54, %v2438_v39  ;;  %v2449_v33 = vsub.f32 %v2444_v29, %v2447_v36  ;;  %v4903_v39 = vpop.permute.xlu1 %2572 }
 0xd9d   :  { %v2387_v27 = vmax.f32 %v2386_v55, 0.0  ;;  %v2396_v56 = vmax.f32 %v2395_v8, 0.0  ;;  %v2405_v18 = vmax.f32 %v2404_v17, 0.0  ;;  %v2414_v37 = vmax.f32 %v2413_v0, 0.0 }
 0xd9e   :  { %v2371_v3 = vpop.f32.mrf.mxu3  ;;  %v2432_v31 = vmax.f32 %v2431_v52, 0.0 }
 0xd9f   :  { %v2388_v42 = vmul.f32 %v2387_v27, %v3990_v41  ;;  %v2397_v53 = vmul.f32 %v2396_v56, %v5202_v28  ;;  %v2372_v14 = vadd.f32 %v2371_v3, %v3955_v12  ;;  %v2406_v58 = vmul.f32 %v2405_v18, %v3999_v7 }
 0xda0   :  { %v2423_v41 = vmax.f32 %v2422_v19, 0.0  ;;  %v2415_v24 = vmul.f32 %v2414_v37, %v4008_v60  ;;  %v2450_v3 = vmax.f32 %v2449_v33, 0.0 }
 0xda1   :  { %v2389_v26 = vadd.f32 %v2388_v42, %v3992_v2  ;;  %v2453_v27 = vperm.slane %v2372_v14, 0  ;;  %v2462_v38 = vperm.slane %v2372_v14, 1  ;;  %v2441_v2 = vmax.f32 %v2440_v13, 0.0 }
 0xda2   :  { %v2424_v0 = vmul.f32 %v2423_v41, %v4012_v11  ;;  %v2471_v12 = vperm.slane %v2372_v14, 2  ;;  %v2480_v7 = vperm.slane %v2372_v14, 3  ;;  %v2489_v29 = vperm.slane %v2372_v14, 4 }
 0xda3   :  { %v2398_v1 = vadd.f32 %v2397_v53, %v2389_v26  ;;  %v2458_v56 = vsub.f32 %v2453_v27, %v2456_v30  ;;  %v2433_v26 = vmul.f32 %v2432_v31, %v4017_v43  ;;  %v2467_v54 = vsub.f32 %v2462_v38, %v2465_v62  ;;  %v4907_v17 = vpop.permute.xlu2 %2581 }
 0xda4   :  { %v2442_v60 = vmul.f32 %v2441_v2, %v4022_v63  ;;  %v2476_v8 = vsub.f32 %v2471_v12, %v4872_v50  ;;  %v2498_v11 = vperm.slane %v2372_v14, 5  ;;  %v2451_v19 = vmul.f32 %v2450_v3, %v4029_v10  ;;  %v2591_v31 = vpop.permute.xlu1 %2590 }
 0xda5   :  { %v2407_v4 = vadd.f32 %v2406_v58, %v2398_v1  ;;  %v2459_v52 = vmax.f32 %v2458_v56, 0.0  ;;  %v2468_v28 = vmax.f32 %v2467_v54, 0.0  ;;  %v2485_v43 = vsub.f32 %v2480_v7, %v4874_v49 }
 0xda6   :  { %v2374_v30 = vpop.f32.mrf.mxu3  ;;  %v2494_v62 = vsub.f32 %v2489_v29, %v4876_v61  ;;  %v2507_v53 = vperm.slane %v2372_v14, 6  ;;  %v2477_v63 = vmax.f32 %v2476_v8, 0.0  ;;  %v2503_v50 = vsub.f32 %v2498_v11, %v4878_v23 }
 0xda7   :  { %v2416_v42 = vadd.f32 %v2415_v24, %v2407_v4  ;;  %v2460_v13 = vmul.f32 %v2459_v52, %v4038_v16  ;;  %v2375_v1 = vadd.f32 %v2374_v30, %v3971_v22  ;;  %v2469_v41 = vmul.f32 %v2468_v28, %v4043_v51 }
 0xda8   :  { %v2486_v27 = vmax.f32 %v2485_v43, 0.0  ;;  %v2516_v33 = vperm.slane %v2372_v14, 7  ;;  %v2512_v10 = vsub.f32 %v2507_v53, %v4880_v57  ;;  %v2478_v49 = vmul.f32 %v2477_v63, %v4051_v35 }
 0xda9   :  { %v2425_v55 = vadd.f32 %v2424_v0, %v2416_v42  ;;  %v2495_v61 = vmax.f32 %v2494_v62, 0.0  ;;  %v2525_v24 = vperm.slane %v2375_v1, 0  ;;  %v2504_v38 = vmax.f32 %v2503_v50, 0.0 }
 0xdaa   :  { %v2487_v2 = vmul.f32 %v2486_v27, %v4056_v45  ;;  %v2521_v22 = vsub.f32 %v2516_v33, %v4882_v25  ;;  %v2534_v23 = vperm.slane %v2375_v1, 1  ;;  %v2543_v0 = vperm.slane %v2375_v1, 2  ;;  %v5203_v27 = vld [vmem:[#allocation12_spill] sm:$0xff] }
 0xdab   :  { %v2434_v36 = vadd.f32 %v2433_v26, %v2425_v55  ;;  %v2600_v42 = vpop.permute.xlu2 %2599  ;;  %v2496_v14 = vmul.f32 %v2495_v61, %v4064_v21  ;;  %v2513_v56 = vmax.f32 %v2512_v10, 0.0  ;;  %v2530_v57 = vsub.f32 %v2525_v24, %v4884_v34  ;;  %v5204_v24 = vld [vmem:[#allocation13_spill] sm:$0xff] }
 0xdac   :  { %v2505_v35 = vmul.f32 %v2504_v38, %v4066_v40  ;;  %v2522_v3 = vmax.f32 %v2521_v22, 0.0  ;;  %v2539_v55 = vsub.f32 %v2534_v23, %v4886_v32  ;;  %v2552_v26 = vperm.slane %v2375_v1, 3  ;;  %v2609_v8 = vpop.permute.xlu1 %2608  ;;  %v2627_v22 = vpop.permute.xlu0 %2626 }
 0xdad   :  { %v2443_v18 = vadd.f32 %v2442_v60, %v2434_v36  ;;  %v2548_v45 = vsub.f32 %v2543_v0, %v4889_v44  ;;  %v2561_v54 = vperm.slane %v2375_v1, 4  ;;  %v2514_v7 = vmul.f32 %v2513_v56, %v4077_v9  ;;  %v5206_v56 = vld [vmem:[#allocation15_spill] sm:$0xff] }
 0xdae   :  { %v2531_v29 = vmax.f32 %v2530_v57, 0.0  ;;  %v2570_v36 = vperm.slane %v2375_v1, 5  ;;  %v2377_v60 = vpop.f32.mrf.mxu3  ;;  %v2523_v52 = vmul.f32 %v2522_v3, %v4083_v47  ;;  %v2540_v34 = vmax.f32 %v2539_v55, 0.0 }
 0xdaf   :  { %v2452_v37 = vadd.f32 %v2451_v19, %v2443_v18  ;;  %v2557_v40 = vsub.f32 %v2552_v26, %v4892_v59  ;;  %v2549_v11 = vmax.f32 %v2548_v45, 0.0  ;;  %v2566_v32 = vsub.f32 %v2561_v54, %v4897_v5  ;;  %v5207_v26 = vld [vmem:[#allocation16_spill] sm:$0xff] }
 0xdb0   :  { %v2532_v44 = vmul.f32 %v2531_v29, %v4088_v6  ;;  %v2579_v18 = vperm.slane %v2375_v1, 6  ;;  %v2378_v19 = vadd.f32 %v2377_v60, %v4006_v46  ;;  %v2575_v28 = vsub.f32 %v2570_v36, %v4903_v39  ;;  %v5208_v36 = vld [vmem:[#allocation17_spill] sm:$0xff] }
 0xdb1   :  { %v2461_v58 = vadd.f32 %v2460_v13, %v2452_v37  ;;  %v2541_v62 = vmul.f32 %v2540_v34, %v4093_v48  ;;  %v2558_v47 = vmax.f32 %v2557_v40, 0.0  ;;  %v2588_v53 = vperm.slane %v2375_v1, 7 }
 0xdb2   :  { %v2567_v37 = vmax.f32 %v2566_v32, 0.0  ;;  %v2550_v13 = vmul.f32 %v2549_v11, %v4101_v20  ;;  %v2584_v5 = vsub.f32 %v2579_v18, %v4907_v17  ;;  %v2597_v63 = vperm.slane %v2378_v19, 0 }
 0xdb3   :  { %v2470_v4 = vadd.f32 %v2469_v41, %v2461_v58  ;;  %v2618_v9 = vpop.permute.xlu2 %2617  ;;  %v2576_v50 = vmax.f32 %v2575_v28, 0.0  ;;  %v2559_v58 = vmul.f32 %v2558_v47, %v4107_v15  ;;  %v2593_v46 = vsub.f32 %v2588_v53, %v2591_v31  ;;  %v5205_v15 = vld [vmem:[#allocation14_spill] sm:$0xff]  ;;  %v5211_v53 = vld [vmem:[#allocation20_spill] sm:$0xff] }
 0xdb4   :  { %v2606_v41 = vperm.slane %v2378_v19, 1  ;;  %v2568_v39 = vmul.f32 %v2567_v37, %v5203_v27  ;;  %v2585_v10 = vmax.f32 %v2584_v5, 0.0  ;;  %v2602_v48 = vsub.f32 %v2597_v63, %v2600_v42  ;;  %v2636_v1 = vpop.permute.xlu1 %2635  ;;  %v5212_v5 = vld [vmem:[#allocation21_spill] sm:$0xff] }
 0xdb5   :  { %v2479_v16 = vadd.f32 %v2478_v49, %v2470_v4  ;;  %v2615_v4 = vperm.slane %v2378_v19, 2  ;;  %v2624_v49 = vperm.slane %v2378_v19, 3  ;;  %v2577_v20 = vmul.f32 %v2576_v50, %v5204_v24 }
 0xdb6   :  { %v2594_v38 = vmax.f32 %v2593_v46, 0.0  ;;  %v2611_v17 = vsub.f32 %v2606_v41, %v2609_v8  ;;  %v2586_v31 = vmul.f32 %v2585_v10, %v5205_v15  ;;  %v2603_v0 = vmax.f32 %v2602_v48, 0.0  ;;  %v5209_v8 = vld [vmem:[#allocation18_spill] sm:$0xff]  ;;  %v5214_v41 = vld [vmem:[#allocation23_spill] sm:$0xff] }
 0xdb7   :  { %v2488_v51 = vadd.f32 %v2487_v2, %v2479_v16  ;;  %v2633_v2 = vperm.slane %v2378_v19, 4 }
 0xdb8   :  { %v2595_v57 = vmul.f32 %v2594_v38, %v5206_v56  ;;  %v2612_v42 = vmax.f32 %v2611_v17, 0.0  ;;  %v2604_v45 = vmul.f32 %v2603_v0, %v5207_v26 }
 0xdb9   :  { %v2497_v12 = vadd.f32 %v2496_v14, %v2488_v51  ;;  %v2620_v51 = vsub.f32 %v2615_v4, %v2618_v9  ;;  %v2629_v14 = vsub.f32 %v2624_v49, %v2627_v22  ;;  %v2638_v3 = vsub.f32 %v2633_v2, %v2636_v1  ;;  %v5210_v9 = vld [vmem:[#allocation19_spill] sm:$0xff] }
 0xdba   :  { %v2613_v60 = vmul.f32 %v2612_v42, %v5208_v36 }
 0xdbb   :  { %v2506_v25 = vadd.f32 %v2505_v35, %v2497_v12  ;;  %v2645_v16 = vpop.permute.xlu2 %2644  ;;  %v2642_v12 = vperm.slane %v2378_v19, 5  ;;  %v2621_v54 = vmax.f32 %v2620_v51, 0.0  ;;  %v2639_v32 = vmax.f32 %v2638_v3, 0.0 }
 0xdbc   :  { %v2654_v34 = vpop.permute.xlu1 %2653 }
 0xdbd   :  { %v2515_v21 = vadd.f32 %v2514_v7, %v2506_v25  ;;  %v2651_v25 = vperm.slane %v2378_v19, 6  ;;  %v2630_v7 = vmax.f32 %v2629_v14, 0.0  ;;  %v2622_v11 = vmul.f32 %v2621_v54, %v5209_v8 }
 0xdbe   :  { %v2640_v37 = vmul.f32 %v2639_v32, %v5211_v53 }
 0xdbf   :  { %v2524_v30 = vadd.f32 %v2523_v52, %v2515_v21  ;;  %v2647_v21 = vsub.f32 %v2642_v12, %v2645_v16  ;;  %v2660_v52 = vperm.slane %v2378_v19, 7  ;;  %v2631_v28 = vmul.f32 %v2630_v7, %v5210_v9 }
 0xdc1   :  { %v2533_v43 = vadd.f32 %v2532_v44, %v2524_v30  ;;  %v2656_v30 = vsub.f32 %v2651_v25, %v2654_v34 }
 0xdc3   :  { %v2542_v59 = vadd.f32 %v2541_v62, %v2533_v43  ;;  %v2663_v44 = vpop.permute.xlu2 %2662  ;;  %v2648_v43 = vmax.f32 %v2647_v21, 0.0 }
 0xdc4   :  { %v2665_v62 = vsub.f32 %v2660_v52, %v2663_v44 }
 0xdc5   :  { %v2551_v6 = vadd.f32 %v2550_v13, %v2542_v59  ;;  %v2657_v59 = vmax.f32 %v2656_v30, 0.0  ;;  %v2649_v63 = vmul.f32 %v2648_v43, %v5212_v5 }
 0xdc6   :  { %v2666_v19 = vmax.f32 %v2665_v62, 0.0 }
 0xdc7   :  { %v2560_v33 = vadd.f32 %v2559_v58, %v2551_v6  ;;  %v5213_v6 = vld [vmem:[#allocation22_spill] sm:$0xff] }
 0xdc8   :  { %v2658_v58 = vmul.f32 %v2657_v59, %v5213_v6  ;;  %v2667_v27 = vmul.f32 %v2666_v19, %v5214_v41 }
 0xdc9   :  { %v2569_v61 = vadd.f32 %v2568_v39, %v2560_v33 }
 0xdcb   :  { %v2578_v23 = vadd.f32 %v2577_v20, %v2569_v61 }
 0xdcd   :  { %v2587_v35 = vadd.f32 %v2586_v31, %v2578_v23 }
 0xdcf   :  { %v2596_v55 = vadd.f32 %v2595_v57, %v2587_v35 }
 0xdd1   :  { %v2605_v29 = vadd.f32 %v2604_v45, %v2596_v55 }
 0xdd3   :  { %v2614_v40 = vadd.f32 %v2613_v60, %v2605_v29 }
 0xdd5   :  { %v2623_v18 = vadd.f32 %v2622_v11, %v2614_v40 }
 0xdd7   :  { %v2632_v47 = vadd.f32 %v2631_v28, %v2623_v18 }
 0xdd9   :  { %v2641_v13 = vadd.f32 %v2640_v37, %v2632_v47 }
 0xddb   :  { %v2650_v50 = vadd.f32 %v2649_v63, %v2641_v13 }
 0xddd   :  { %v2659_v46 = vadd.f32 %v2658_v58, %v2650_v50 }
 0xddf   :  { %v2668_v39 = vadd.f32 %v2667_v27, %v2659_v46 }
 0xde1   :  { %v3223_v33 = vmul.f32 -1.442695, %v2668_v39 }
 0xde3   :  { %3497 = vpow2.f32 %v3223_v33 }
 0xde9   :  { %v3498_v10 = vpop.eup %3497 }
 0xdea   :  { %v2672_v48 = vadd.f32 1.0, %v3498_v10 }
 0xdec   :  { %3499 = vrcp.f32 %v2672_v48  ;;  %v2684_v61 = vand.u32 2147483648, %v2672_v48  ;;  %v2682_v20 = vand.u32 2147483647, %v2672_v48  ;;  %vm2678_vm0 = vweird.f32 %v2672_v48 }
 0xdee   :  { %v2685_v17 = vor.u32 1.1754944e-38, %v2684_v61  ;;  %vm2683_vm3 = vcmp.eq.f32.partialorder %v2682_v20, 8.507059e+37 }
 0xdf2   :  { %v3500_v4 = vpop.eup %3499 }
 0xdf3   :  { %v2674_v1 = vmul.f32 %v3500_v4, %v2672_v48  ;;  %vm2679_vm15 = vweird.f32 %v3500_v4 }
 0xdf4   :  { %vm2680_vm1 = vmor %vm2678_vm0, %vm2679_vm15 }
 0xdf5   :  { %v2675_v49 = vsub.f32 1.0, %v2674_v1 }
 0xdf7   :  { %v2676_v24 = vmul.f32 %v3500_v4, %v2675_v49 }
 0xdf9   :  { %v2677_v38 = vadd.f32 %v3500_v4, %v2676_v24 }
 0xdfb   :  { %v2681_v16 = vsel %vm2680_vm1, %v3500_v4, %v2677_v38 }
 0xdfc   :  { %v2686_v2 = vsel %vm2683_vm3, %v2685_v17, %v2681_v16 }
 0xdfd   :  { %2688 = vst.msk [vmem:[#allocation5] sm:$0xff] %vm451_vm2, %v2686_v2 }
 0xdfe   :  { %2699 = dma.vmem_to_hbm [thread:$0]  %s2695_s17, 128, %s2697_s20, [#allocation3]  }
 0xdff   :  { %3539 = dma.done.wait [#allocation3], 128  }
 0xe00   :  { %3540 = vsyncadd [#allocation3], 4294967168 }
 0xe01   :  { %2704 = vsyncpa [#allocation3], 1 }
 0xe02   :  { %2705 = vsyncpa [#allocation4], 1 }

</bundles_post_ra>
